<compile_context>
chip_gen: v7x
topology: tpu7x:2x2x1
jax: 0.10.0
libtpu: 0.0.40
codegen_flags: <defaults>
</compile_context>

<pallas_src>
import functools

import jax
import jax.numpy as jnp
from jax.experimental import pallas as pl
from jax.experimental.pallas import tpu as pltpu


# ----------------------------- Pallas kernels ------------------------------ #

def _conv3x3_bn_relu_kernel(xp_ref, w_ref, s_ref, b_ref, o_ref):
    """One halo-padded sample -> relu(conv3x3(x) * scale + bias).

    xp_ref: [1, H+2, W+2, Cin]  bf16 (halo-padded sample)
    w_ref:  [9, Cin, Cout]      bf16 (tap-major conv weights)
    s_ref/b_ref: [1, Cout]      f32  (folded BatchNorm)
    o_ref:  [1, H, W, Cout]     bf16
    """
    Hp, Wp, Cin = xp_ref.shape[1], xp_ref.shape[2], xp_ref.shape[3]
    H, W = Hp - 2, Wp - 2
    Cout = w_ref.shape[-1]
    xp = xp_ref[0]                                              # [H+2, W+2, Cin]
    acc = jnp.zeros((H * W, Cout), jnp.float32)
    for kh in range(3):                                         # in-kernel im2col:
        for kw in range(3):                                     # 9 shifted-window matmuls
            win = xp[kh:kh + H, kw:kw + W, :].reshape(H * W, Cin)
            acc += jnp.dot(win, w_ref[kh * 3 + kw],
                           preferred_element_type=jnp.float32)
    y = jnp.maximum(acc * s_ref[...] + b_ref[...], 0.0)
    o_ref[0] = y.reshape(H, W, Cout).astype(o_ref.dtype)


def _conv3x3_bn_add_relu_gap_kernel(xp_ref, w_ref, s_ref, b_ref, skip_ref, gap_ref):
    """Second block conv with fused skip-add + ReLU + global-average-pool.

    The full post-ReLU activation is only consumed by GAP, so it never leaves VMEM:
    the kernel emits just the [1, 1, Cout] per-sample pooled features.
    """
    Hp, Wp, Cin = xp_ref.shape[1], xp_ref.shape[2], xp_ref.shape[3]
    H, W = Hp - 2, Wp - 2
    Cout = w_ref.shape[-1]
    xp = xp_ref[0]
    acc = jnp.zeros((H * W, Cout), jnp.float32)
    for kh in range(3):
        for kw in range(3):
            win = xp[kh:kh + H, kw:kw + W, :].reshape(H * W, Cin)
            acc += jnp.dot(win, w_ref[kh * 3 + kw],
                           preferred_element_type=jnp.float32)
    y = acc * s_ref[...] + b_ref[...]
    y = y + skip_ref[0].reshape(H * W, Cout).astype(jnp.float32)
    y = jnp.maximum(y, 0.0)
    gap_ref[0] = jnp.sum(y, axis=0, keepdims=True) * (1.0 / (H * W))   # [1, Cout] f32


def _head_kernel(feat_ref, w_ref, b_ref, tgt_ref, logits_ref, loss_ref, *, num_classes):
    """Fused FC + softmax cross-entropy (mean over batch) on GAP features."""
    feat = feat_ref[...]                                               # [N, C_pad] f32
    logits = jnp.dot(feat, w_ref[...],
                     preferred_element_type=jnp.float32) + b_ref[...]  # [N, K_pad]
    n, kp = logits.shape
    cls = jax.lax.broadcasted_iota(jnp.int32, (n, kp), 1)
    valid = cls < num_classes
    masked = jnp.where(valid, logits, jnp.float32(-1e30))
    m = jnp.max(masked, axis=-1, keepdims=True)
    lse = m + jnp.log(jnp.sum(jnp.where(valid, jnp.exp(masked - m), 0.0),
                              axis=-1, keepdims=True))
    # TODO(synk): assumes 0 <= target < num_classes (no ignore_index semantics).
    tgt_logit = jnp.sum(jnp.where(cls == tgt_ref[...], logits, 0.0),
                        axis=-1, keepdims=True)                        # [N, 1]
    logits_ref[...] = jnp.where(valid, logits, 0.0)
    loss_ref[...] = jnp.mean(lse - tgt_logit, keepdims=True)           # (1, 1)


# ------------------------------ Pallas wrappers ----------------------------- #

def conv3x3_bn_relu(x, w9, scale, bias):
    """x: [N,H,W,Cin] bf16 -> [N,H,W,Cout] bf16, 'SAME' 3x3 conv + folded BN + ReLU."""
    N, H, W, Cin = x.shape
    Cout = w9.shape[-1]
    xp = jnp.pad(x, ((0, 0), (1, 1), (1, 1), (0, 0)))          # 1-pixel halo
    return pl.pallas_call(
        _conv3x3_bn_relu_kernel,
        out_shape=jax.ShapeDtypeStruct((N, H, W, Cout), jnp.bfloat16),
        grid=(N,),
        in_specs=[
            pl.BlockSpec((1, H + 2, W + 2, Cin), lambda n: (n, 0, 0, 0)),
            pl.BlockSpec((9, Cin, Cout), lambda n: (0, 0, 0)),   # resident weights
            pl.BlockSpec((1, Cout), lambda n: (0, 0)),
            pl.BlockSpec((1, Cout), lambda n: (0, 0)),
        ],
        out_specs=pl.BlockSpec((1, H, W, Cout), lambda n: (n, 0, 0, 0)),
        compiler_params=pltpu.CompilerParams(
            dimension_semantics=("parallel",)),                 # shard samples over TCs
    )(xp, w9, scale, bias)


def conv3x3_bn_add_relu_gap(x, w9, scale, bias, skip):
    """Second block conv: conv+BN+skip+ReLU fused with GAP. Returns [N, Cout] f32."""
    N, H, W, Cin = x.shape
    Cout = w9.shape[-1]
    xp = jnp.pad(x, ((0, 0), (1, 1), (1, 1), (0, 0)))
    gap = pl.pallas_call(
        _conv3x3_bn_add_relu_gap_kernel,
        out_shape=jax.ShapeDtypeStruct((N, 1, Cout), jnp.float32),
        grid=(N,),
        in_specs=[
            pl.BlockSpec((1, H + 2, W + 2, Cin), lambda n: (n, 0, 0, 0)),
            pl.BlockSpec((9, Cin, Cout), lambda n: (0, 0, 0)),
            pl.BlockSpec((1, Cout), lambda n: (0, 0)),
            pl.BlockSpec((1, Cout), lambda n: (0, 0)),
            pl.BlockSpec((1, H, W, Cout), lambda n: (n, 0, 0, 0)),
        ],
        out_specs=pl.BlockSpec((1, 1, Cout), lambda n: (n, 0, 0)),
        compiler_params=pltpu.CompilerParams(
            dimension_semantics=("parallel",)),
    )(xp, w9, scale, bias, skip)
    return gap.reshape(N, Cout)


def head_fc_ce(feat, w_fc, b_fc, target_2d, *, num_classes):
    """Fused FC + cross-entropy. feat: [N, C_pad] f32. Returns (logits_pad, loss)."""
    N, Cp = feat.shape
    _, Kp = w_fc.shape
    logits_p, loss = pl.pallas_call(
        functools.partial(_head_kernel, num_classes=num_classes),
        out_shape=(
            jax.ShapeDtypeStruct((N, Kp), jnp.float32),
            jax.ShapeDtypeStruct((1, 1), jnp.float32),
        ),
        grid=(1,),
        in_specs=[
            pl.BlockSpec((N, Cp), lambda i: (0, 0)),
            pl.BlockSpec((Cp, Kp), lambda i: (0, 0)),
            pl.BlockSpec((1, Kp), lambda i: (0, 0)),
            pl.BlockSpec((N, 1), lambda i: (0, 0)),
        ],
        out_specs=(
            pl.BlockSpec((N, Kp), lambda i: (0, 0)),
            pl.BlockSpec((1, 1), lambda i: (0, 0)),
        ),
    )(feat, w_fc, b_fc, target_2d)
    return logits_p, loss[0, 0]


# ------------------------------- parameters --------------------------------- #

def init_params(cin=4, c=32, num_classes=10, c_pad=128):
    """Params with channel / class dims zero-padded to 128 (lane-dense, inert padding)."""
    key = jax.random.PRNGKey(0)
    ks = jax.random.split(key, 4)
    p = {}

    def pad_conv_w(w, ci, co):
        wp = jnp.zeros((3, 3, c_pad, c_pad), jnp.float32).at[:, :, :ci, :co].set(w)
        return wp.reshape(9, c_pad, c_pad).astype(jnp.bfloat16)   # tap-major [9, Cin, Cout]

    p["w_stem"] = pad_conv_w(0.1 * jax.random.normal(ks[0], (3, 3, cin, c), jnp.float32),
                             cin, c)
    p["w1"] = pad_conv_w(0.1 * jax.random.normal(ks[1], (3, 3, c, c), jnp.float32), c, c)
    p["w2"] = pad_conv_w(0.1 * jax.random.normal(ks[2], (3, 3, c, c), jnp.float32), c, c)

    def folded_bn():
        gamma = 1.0 + 0.01 * jnp.arange(c, dtype=jnp.float32)
        beta = 0.01 * jnp.arange(c, dtype=jnp.float32)
        mean = jnp.zeros((c,), jnp.float32)
        var = jnp.ones((c,), jnp.float32)
        scale = gamma / jnp.sqrt(var + 1e-5)
        bias = beta - mean * scale
        sp = jnp.zeros((1, c_pad), jnp.float32).at[0, :c].set(scale)
        bp = jnp.zeros((1, c_pad), jnp.float32).at[0, :c].set(bias)
        return sp, bp

    p["bn_stem"] = folded_bn()
    p["bn_b1"] = folded_bn()
    p["bn_b2"] = folded_bn()

    w_fc = 0.1 * jax.random.normal(ks[3], (c, num_classes), jnp.float32)
    p["w_fc"] = jnp.zeros((c_pad, c_pad), jnp.float32).at[:c, :num_classes].set(w_fc)
    p["b_fc"] = jnp.zeros((1, c_pad), jnp.float32)
    return p


# ------------------------------- forward ------------------------------------ #

def model_and_loss_forward(data_nchw, target, params, num_classes=10):
    """Mirrors ModelAndLoss.forward: returns (loss, output_logits)."""
    x = jnp.transpose(data_nchw, (0, 2, 3, 1))                       # NCHW -> NHWC
    N, H, W, Cin = x.shape
    c_pad = params["w_stem"].shape[-1]
    # Pad input channels to the lane-dense width once (tiny tensor, uniform layout).
    x = jnp.pad(x, ((0, 0), (0, 0), (0, 0), (0, c_pad - Cin))).astype(jnp.bfloat16)

    # stem: conv + BN + ReLU
    s0, b0 = params["bn_stem"]
    h = conv3x3_bn_relu(x, params["w_stem"], s0, b0)                 # [N,H,W,128] bf16

    # residual basic block; second conv fuses skip-add + ReLU + global-avg-pool
    s1, b1 = params["bn_b1"]
    y = conv3x3_bn_relu(h, params["w1"], s1, b1)
    s2, b2 = params["bn_b2"]
    feat = conv3x3_bn_add_relu_gap(y, params["w2"], s2, b2, skip=h)  # [N,128] f32

    # head: fused FC + softmax cross-entropy
    logits_p, loss = head_fc_ce(
        feat, params["w_fc"], params["b_fc"],
        target.reshape(N, 1).astype(jnp.int32),
        num_classes=num_classes)
    return loss, logits_p[:, :num_classes]


# --------------------------------- main ------------------------------------- #

if __name__ == "__main__":
    NUM_CLASSES = 10
    key = jax.random.PRNGKey(0)
    kx, kt = jax.random.split(key)
    data = jax.random.normal(kx, (2, 4, 16, 16), jnp.float32)        # NCHW input
    target = jax.random.randint(kt, (2,), 0, NUM_CLASSES)

    params = init_params(cin=4, c=32, num_classes=NUM_CLASSES)

    fwd = jax.jit(functools.partial(model_and_loss_forward, num_classes=NUM_CLASSES))
    loss, logits = fwd(data, target, params)
    jax.block_until_ready((loss, logits))

    assert logits.shape == (2, NUM_CLASSES)
    assert loss.shape == ()
    assert bool(jnp.isfinite(loss)) and bool(jnp.all(jnp.isfinite(logits)))
    print("KERNEL_OK")
</pallas_src>

<mosaic_0001>
module attributes {stable_mosaic.version = 11 : i64} {
  func.func @_conv3x3_bn_relu_kernel(%arg0: i32, %arg1: memref<1x18x18x128xbf16, #tpu.memory_space<vmem>>, %arg2: memref<9x128x128xbf16, #tpu.memory_space<vmem>>, %arg3: memref<1x128xf32, #tpu.memory_space<vmem>>, %arg4: memref<1x128xf32, #tpu.memory_space<vmem>>, %arg5: memref<1x16x16x128xbf16, #tpu.memory_space<vmem>>) attributes {dimension_semantics = [#tpu.dimension_semantics<parallel>], iteration_bounds = array<i64: 2>, scalar_prefetch = 0 : i64, scratch_operands = 0 : i64, tpu.core_type = #tpu.core_type<tc>, window_params = [{transform_indices = @transform_0, window_bounds = array<i64: 1, 18, 18, 128>}, {pipeline_mode = #tpu.pipeline_mode<synchronous>, transform_indices = @transform_1, window_bounds = array<i64: 9, 128, 128>}, {pipeline_mode = #tpu.pipeline_mode<synchronous>, transform_indices = @transform_2, window_bounds = array<i64: 1, 128>}, {pipeline_mode = #tpu.pipeline_mode<synchronous>, transform_indices = @transform_3, window_bounds = array<i64: 1, 128>}, {transform_indices = @transform_4, window_bounds = array<i64: 1, 16, 16, 128>}]} {
    %c0 = arith.constant 0 : index
    %c0_0 = arith.constant 0 : index
    %c0_1 = arith.constant 0 : index
    %c0_2 = arith.constant 0 : index
    %0 = vector.load %arg1[%c0, %c0_0, %c0_1, %c0_2] : memref<1x18x18x128xbf16, #tpu.memory_space<vmem>>, vector<1x18x18x128xbf16>
    %1 = vector.shape_cast %0 : vector<1x18x18x128xbf16> to vector<18x18x128xbf16>
    %cst = arith.constant 0.000000e+00 : f32
    %2 = vector.broadcast %cst : f32 to vector<256x128xf32>
    %3 = vector.extract_strided_slice %1 {offsets = [0, 0, 0], sizes = [16, 16, 128], strides = [1, 1, 1]} : vector<18x18x128xbf16> to vector<16x16x128xbf16>
    %4 = vector.shape_cast %3 : vector<16x16x128xbf16> to vector<256x128xbf16>
    %c0_3 = arith.constant 0 : index
    %c0_4 = arith.constant 0 : index
    %c0_5 = arith.constant 0 : index
    %5 = vector.load %arg2[%c0_3, %c0_4, %c0_5] : memref<9x128x128xbf16, #tpu.memory_space<vmem>>, vector<1x128x128xbf16>
    %6 = vector.shape_cast %5 : vector<1x128x128xbf16> to vector<128x128xbf16>
    %cst_6 = arith.constant dense<0.000000e+00> : vector<256x128xf32>
    %7 = tpu.matmul %4, %6, %cst_6 {dimension_numbers = #tpu.dot_dimension_numbers<[1], [0], [0], [1], [0, 0, 1, 1], [], []>} : vector<256x128xbf16>, vector<128x128xbf16>, vector<256x128xf32> -> vector<256x128xf32>
    %8 = arith.addf %2, %7 : vector<256x128xf32>
    %9 = vector.extract_strided_slice %1 {offsets = [0, 1, 0], sizes = [16, 16, 128], strides = [1, 1, 1]} : vector<18x18x128xbf16> to vector<16x16x128xbf16>
    %10 = vector.shape_cast %9 : vector<16x16x128xbf16> to vector<256x128xbf16>
    %c1 = arith.constant 1 : index
    %c0_7 = arith.constant 0 : index
    %c0_8 = arith.constant 0 : index
    %11 = vector.load %arg2[%c1, %c0_7, %c0_8] : memref<9x128x128xbf16, #tpu.memory_space<vmem>>, vector<1x128x128xbf16>
    %12 = vector.shape_cast %11 : vector<1x128x128xbf16> to vector<128x128xbf16>
    %cst_9 = arith.constant dense<0.000000e+00> : vector<256x128xf32>
    %13 = tpu.matmul %10, %12, %cst_9 {dimension_numbers = #tpu.dot_dimension_numbers<[1], [0], [0], [1], [0, 0, 1, 1], [], []>} : vector<256x128xbf16>, vector<128x128xbf16>, vector<256x128xf32> -> vector<256x128xf32>
    %14 = arith.addf %8, %13 : vector<256x128xf32>
    %15 = vector.extract_strided_slice %1 {offsets = [0, 2, 0], sizes = [16, 16, 128], strides = [1, 1, 1]} : vector<18x18x128xbf16> to vector<16x16x128xbf16>
    %16 = vector.shape_cast %15 : vector<16x16x128xbf16> to vector<256x128xbf16>
    %c2 = arith.constant 2 : index
    %c0_10 = arith.constant 0 : index
    %c0_11 = arith.constant 0 : index
    %17 = vector.load %arg2[%c2, %c0_10, %c0_11] : memref<9x128x128xbf16, #tpu.memory_space<vmem>>, vector<1x128x128xbf16>
    %18 = vector.shape_cast %17 : vector<1x128x128xbf16> to vector<128x128xbf16>
    %cst_12 = arith.constant dense<0.000000e+00> : vector<256x128xf32>
    %19 = tpu.matmul %16, %18, %cst_12 {dimension_numbers = #tpu.dot_dimension_numbers<[1], [0], [0], [1], [0, 0, 1, 1], [], []>} : vector<256x128xbf16>, vector<128x128xbf16>, vector<256x128xf32> -> vector<256x128xf32>
    %20 = arith.addf %14, %19 : vector<256x128xf32>
    %21 = vector.extract_strided_slice %1 {offsets = [1, 0, 0], sizes = [16, 16, 128], strides = [1, 1, 1]} : vector<18x18x128xbf16> to vector<16x16x128xbf16>
    %22 = vector.shape_cast %21 : vector<16x16x128xbf16> to vector<256x128xbf16>
    %c3 = arith.constant 3 : index
    %c0_13 = arith.constant 0 : index
    %c0_14 = arith.constant 0 : index
    %23 = vector.load %arg2[%c3, %c0_13, %c0_14] : memref<9x128x128xbf16, #tpu.memory_space<vmem>>, vector<1x128x128xbf16>
    %24 = vector.shape_cast %23 : vector<1x128x128xbf16> to vector<128x128xbf16>
    %cst_15 = arith.constant dense<0.000000e+00> : vector<256x128xf32>
    %25 = tpu.matmul %22, %24, %cst_15 {dimension_numbers = #tpu.dot_dimension_numbers<[1], [0], [0], [1], [0, 0, 1, 1], [], []>} : vector<256x128xbf16>, vector<128x128xbf16>, vector<256x128xf32> -> vector<256x128xf32>
    %26 = arith.addf %20, %25 : vector<256x128xf32>
    %27 = vector.extract_strided_slice %1 {offsets = [1, 1, 0], sizes = [16, 16, 128], strides = [1, 1, 1]} : vector<18x18x128xbf16> to vector<16x16x128xbf16>
    %28 = vector.shape_cast %27 : vector<16x16x128xbf16> to vector<256x128xbf16>
    %c4 = arith.constant 4 : index
    %c0_16 = arith.constant 0 : index
    %c0_17 = arith.constant 0 : index
    %29 = vector.load %arg2[%c4, %c0_16, %c0_17] : memref<9x128x128xbf16, #tpu.memory_space<vmem>>, vector<1x128x128xbf16>
    %30 = vector.shape_cast %29 : vector<1x128x128xbf16> to vector<128x128xbf16>
    %cst_18 = arith.constant dense<0.000000e+00> : vector<256x128xf32>
    %31 = tpu.matmul %28, %30, %cst_18 {dimension_numbers = #tpu.dot_dimension_numbers<[1], [0], [0], [1], [0, 0, 1, 1], [], []>} : vector<256x128xbf16>, vector<128x128xbf16>, vector<256x128xf32> -> vector<256x128xf32>
    %32 = arith.addf %26, %31 : vector<256x128xf32>
    %33 = vector.extract_strided_slice %1 {offsets = [1, 2, 0], sizes = [16, 16, 128], strides = [1, 1, 1]} : vector<18x18x128xbf16> to vector<16x16x128xbf16>
    %34 = vector.shape_cast %33 : vector<16x16x128xbf16> to vector<256x128xbf16>
    %c5 = arith.constant 5 : index
    %c0_19 = arith.constant 0 : index
    %c0_20 = arith.constant 0 : index
    %35 = vector.load %arg2[%c5, %c0_19, %c0_20] : memref<9x128x128xbf16, #tpu.memory_space<vmem>>, vector<1x128x128xbf16>
    %36 = vector.shape_cast %35 : vector<1x128x128xbf16> to vector<128x128xbf16>
    %cst_21 = arith.constant dense<0.000000e+00> : vector<256x128xf32>
    %37 = tpu.matmul %34, %36, %cst_21 {dimension_numbers = #tpu.dot_dimension_numbers<[1], [0], [0], [1], [0, 0, 1, 1], [], []>} : vector<256x128xbf16>, vector<128x128xbf16>, vector<256x128xf32> -> vector<256x128xf32>
    %38 = arith.addf %32, %37 : vector<256x128xf32>
    %39 = vector.extract_strided_slice %1 {offsets = [2, 0, 0], sizes = [16, 16, 128], strides = [1, 1, 1]} : vector<18x18x128xbf16> to vector<16x16x128xbf16>
    %40 = vector.shape_cast %39 : vector<16x16x128xbf16> to vector<256x128xbf16>
    %c6 = arith.constant 6 : index
    %c0_22 = arith.constant 0 : index
    %c0_23 = arith.constant 0 : index
    %41 = vector.load %arg2[%c6, %c0_22, %c0_23] : memref<9x128x128xbf16, #tpu.memory_space<vmem>>, vector<1x128x128xbf16>
    %42 = vector.shape_cast %41 : vector<1x128x128xbf16> to vector<128x128xbf16>
    %cst_24 = arith.constant dense<0.000000e+00> : vector<256x128xf32>
    %43 = tpu.matmul %40, %42, %cst_24 {dimension_numbers = #tpu.dot_dimension_numbers<[1], [0], [0], [1], [0, 0, 1, 1], [], []>} : vector<256x128xbf16>, vector<128x128xbf16>, vector<256x128xf32> -> vector<256x128xf32>
    %44 = arith.addf %38, %43 : vector<256x128xf32>
    %45 = vector.extract_strided_slice %1 {offsets = [2, 1, 0], sizes = [16, 16, 128], strides = [1, 1, 1]} : vector<18x18x128xbf16> to vector<16x16x128xbf16>
    %46 = vector.shape_cast %45 : vector<16x16x128xbf16> to vector<256x128xbf16>
    %c7 = arith.constant 7 : index
    %c0_25 = arith.constant 0 : index
    %c0_26 = arith.constant 0 : index
    %47 = vector.load %arg2[%c7, %c0_25, %c0_26] : memref<9x128x128xbf16, #tpu.memory_space<vmem>>, vector<1x128x128xbf16>
    %48 = vector.shape_cast %47 : vector<1x128x128xbf16> to vector<128x128xbf16>
    %cst_27 = arith.constant dense<0.000000e+00> : vector<256x128xf32>
    %49 = tpu.matmul %46, %48, %cst_27 {dimension_numbers = #tpu.dot_dimension_numbers<[1], [0], [0], [1], [0, 0, 1, 1], [], []>} : vector<256x128xbf16>, vector<128x128xbf16>, vector<256x128xf32> -> vector<256x128xf32>
    %50 = arith.addf %44, %49 : vector<256x128xf32>
    %51 = vector.extract_strided_slice %1 {offsets = [2, 2, 0], sizes = [16, 16, 128], strides = [1, 1, 1]} : vector<18x18x128xbf16> to vector<16x16x128xbf16>
    %52 = vector.shape_cast %51 : vector<16x16x128xbf16> to vector<256x128xbf16>
    %c8 = arith.constant 8 : index
    %c0_28 = arith.constant 0 : index
    %c0_29 = arith.constant 0 : index
    %53 = vector.load %arg2[%c8, %c0_28, %c0_29] : memref<9x128x128xbf16, #tpu.memory_space<vmem>>, vector<1x128x128xbf16>
    %54 = vector.shape_cast %53 : vector<1x128x128xbf16> to vector<128x128xbf16>
    %cst_30 = arith.constant dense<0.000000e+00> : vector<256x128xf32>
    %55 = tpu.matmul %52, %54, %cst_30 {dimension_numbers = #tpu.dot_dimension_numbers<[1], [0], [0], [1], [0, 0, 1, 1], [], []>} : vector<256x128xbf16>, vector<128x128xbf16>, vector<256x128xf32> -> vector<256x128xf32>
    %56 = arith.addf %50, %55 : vector<256x128xf32>
    %c0_31 = arith.constant 0 : index
    %c0_32 = arith.constant 0 : index
    %57 = vector.load %arg3[%c0_31, %c0_32] : memref<1x128xf32, #tpu.memory_space<vmem>>, vector<1x128xf32>
    %58 = vector.broadcast %57 : vector<1x128xf32> to vector<256x128xf32>
    %59 = arith.mulf %56, %58 : vector<256x128xf32>
    %c0_33 = arith.constant 0 : index
    %c0_34 = arith.constant 0 : index
    %60 = vector.load %arg4[%c0_33, %c0_34] : memref<1x128xf32, #tpu.memory_space<vmem>>, vector<1x128xf32>
    %61 = vector.broadcast %60 : vector<1x128xf32> to vector<256x128xf32>
    %62 = arith.addf %59, %61 : vector<256x128xf32>
    %cst_35 = arith.constant 0.000000e+00 : f32
    %63 = vector.broadcast %cst_35 : f32 to vector<256x128xf32>
    %64 = arith.maximumf %62, %63 : vector<256x128xf32>
    %65 = vector.shape_cast %64 : vector<256x128xf32> to vector<16x16x128xf32>
    %66 = arith.truncf %65 : vector<16x16x128xf32> to vector<16x16x128xbf16>
    %c0_36 = arith.constant 0 : index
    %c0_37 = arith.constant 0 : index
    %c0_38 = arith.constant 0 : index
    %c0_39 = arith.constant 0 : index
    %67 = vector.load %arg5[%c0_36, %c0_37, %c0_38, %c0_39] : memref<1x16x16x128xbf16, #tpu.memory_space<vmem>>, vector<1x16x16x128xbf16>
    %68 = vector.shape_cast %67 : vector<1x16x16x128xbf16> to vector<16x16x128xbf16>
    %69 = vector.shape_cast %66 : vector<16x16x128xbf16> to vector<1x16x16x128xbf16>
    tpu.vector_store %arg5[%c0_36, %c0_37, %c0_38, %c0_39], %69 {strides = array<i32>} : memref<1x16x16x128xbf16, #tpu.memory_space<vmem>>, vector<1x16x16x128xbf16>,
    return
  }
  func.func @transform_0(%arg0: i32) -> (i32, i32, i32, i32) {
    %c0_i32 = arith.constant 0 : i32
    %c0_i32_0 = arith.constant 0 : i32
    %c0_i32_1 = arith.constant 0 : i32
    %c0_i32_2 = arith.constant 0 : i32
    return %arg0, %c0_i32, %c0_i32_0, %c0_i32_1 : i32, i32, i32, i32
  }
  func.func @transform_1(%arg0: i32) -> (i32, i32, i32) {
    %c0_i32 = arith.constant 0 : i32
    %c0_i32_0 = arith.constant 0 : i32
    %c0_i32_1 = arith.constant 0 : i32
    %c0_i32_2 = arith.constant 0 : i32
    return %c0_i32, %c0_i32_0, %c0_i32_1 : i32, i32, i32
  }
  func.func @transform_2(%arg0: i32) -> (i32, i32) {
    %c0_i32 = arith.constant 0 : i32
    %c0_i32_0 = arith.constant 0 : i32
    %c0_i32_1 = arith.constant 0 : i32
    return %c0_i32, %c0_i32_0 : i32, i32
  }
  func.func @transform_3(%arg0: i32) -> (i32, i32) {
    %c0_i32 = arith.constant 0 : i32
    %c0_i32_0 = arith.constant 0 : i32
    %c0_i32_1 = arith.constant 0 : i32
    return %c0_i32, %c0_i32_0 : i32, i32
  }
  func.func @transform_4(%arg0: i32) -> (i32, i32, i32, i32) {
    %c0_i32 = arith.constant 0 : i32
    %c0_i32_0 = arith.constant 0 : i32
    %c0_i32_1 = arith.constant 0 : i32
    %c0_i32_2 = arith.constant 0 : i32
    return %arg0, %c0_i32, %c0_i32_0, %c0_i32_1 : i32, i32, i32, i32
  }
}

module attributes {stable_mosaic.version = 11 : i64} {
  func.func @_conv3x3_bn_add_relu_gap_kernel(%arg0: i32, %arg1: memref<1x18x18x128xbf16, #tpu.memory_space<vmem>>, %arg2: memref<9x128x128xbf16, #tpu.memory_space<vmem>>, %arg3: memref<1x128xf32, #tpu.memory_space<vmem>>, %arg4: memref<1x128xf32, #tpu.memory_space<vmem>>, %arg5: memref<1x16x16x128xbf16, #tpu.memory_space<vmem>>, %arg6: memref<1x1x128xf32, #tpu.memory_space<vmem>>) attributes {dimension_semantics = [#tpu.dimension_semantics<parallel>], iteration_bounds = array<i64: 2>, scalar_prefetch = 0 : i64, scratch_operands = 0 : i64, tpu.core_type = #tpu.core_type<tc>, window_params = [{transform_indices = @transform_0, window_bounds = array<i64: 1, 18, 18, 128>}, {pipeline_mode = #tpu.pipeline_mode<synchronous>, transform_indices = @transform_1, window_bounds = array<i64: 9, 128, 128>}, {pipeline_mode = #tpu.pipeline_mode<synchronous>, transform_indices = @transform_2, window_bounds = array<i64: 1, 128>}, {pipeline_mode = #tpu.pipeline_mode<synchronous>, transform_indices = @transform_3, window_bounds = array<i64: 1, 128>}, {transform_indices = @transform_4, window_bounds = array<i64: 1, 16, 16, 128>}, {transform_indices = @transform_5, window_bounds = array<i64: 1, 1, 128>}]} {
    %c0 = arith.constant 0 : index
    %c0_0 = arith.constant 0 : index
    %c0_1 = arith.constant 0 : index
    %c0_2 = arith.constant 0 : index
    %0 = vector.load %arg1[%c0, %c0_0, %c0_1, %c0_2] : memref<1x18x18x128xbf16, #tpu.memory_space<vmem>>, vector<1x18x18x128xbf16>
    %1 = vector.shape_cast %0 : vector<1x18x18x128xbf16> to vector<18x18x128xbf16>
    %cst = arith.constant 0.000000e+00 : f32
    %2 = vector.broadcast %cst : f32 to vector<256x128xf32>
    %3 = vector.extract_strided_slice %1 {offsets = [0, 0, 0], sizes = [16, 16, 128], strides = [1, 1, 1]} : vector<18x18x128xbf16> to vector<16x16x128xbf16>
    %4 = vector.shape_cast %3 : vector<16x16x128xbf16> to vector<256x128xbf16>
    %c0_3 = arith.constant 0 : index
    %c0_4 = arith.constant 0 : index
    %c0_5 = arith.constant 0 : index
    %5 = vector.load %arg2[%c0_3, %c0_4, %c0_5] : memref<9x128x128xbf16, #tpu.memory_space<vmem>>, vector<1x128x128xbf16>
    %6 = vector.shape_cast %5 : vector<1x128x128xbf16> to vector<128x128xbf16>
    %cst_6 = arith.constant dense<0.000000e+00> : vector<256x128xf32>
    %7 = tpu.matmul %4, %6, %cst_6 {dimension_numbers = #tpu.dot_dimension_numbers<[1], [0], [0], [1], [0, 0, 1, 1], [], []>} : vector<256x128xbf16>, vector<128x128xbf16>, vector<256x128xf32> -> vector<256x128xf32>
    %8 = arith.addf %2, %7 : vector<256x128xf32>
    %9 = vector.extract_strided_slice %1 {offsets = [0, 1, 0], sizes = [16, 16, 128], strides = [1, 1, 1]} : vector<18x18x128xbf16> to vector<16x16x128xbf16>
    %10 = vector.shape_cast %9 : vector<16x16x128xbf16> to vector<256x128xbf16>
    %c1 = arith.constant 1 : index
    %c0_7 = arith.constant 0 : index
    %c0_8 = arith.constant 0 : index
    %11 = vector.load %arg2[%c1, %c0_7, %c0_8] : memref<9x128x128xbf16, #tpu.memory_space<vmem>>, vector<1x128x128xbf16>
    %12 = vector.shape_cast %11 : vector<1x128x128xbf16> to vector<128x128xbf16>
    %cst_9 = arith.constant dense<0.000000e+00> : vector<256x128xf32>
    %13 = tpu.matmul %10, %12, %cst_9 {dimension_numbers = #tpu.dot_dimension_numbers<[1], [0], [0], [1], [0, 0, 1, 1], [], []>} : vector<256x128xbf16>, vector<128x128xbf16>, vector<256x128xf32> -> vector<256x128xf32>
    %14 = arith.addf %8, %13 : vector<256x128xf32>
    %15 = vector.extract_strided_slice %1 {offsets = [0, 2, 0], sizes = [16, 16, 128], strides = [1, 1, 1]} : vector<18x18x128xbf16> to vector<16x16x128xbf16>
    %16 = vector.shape_cast %15 : vector<16x16x128xbf16> to vector<256x128xbf16>
    %c2 = arith.constant 2 : index
    %c0_10 = arith.constant 0 : index
    %c0_11 = arith.constant 0 : index
    %17 = vector.load %arg2[%c2, %c0_10, %c0_11] : memref<9x128x128xbf16, #tpu.memory_space<vmem>>, vector<1x128x128xbf16>
    %18 = vector.shape_cast %17 : vector<1x128x128xbf16> to vector<128x128xbf16>
    %cst_12 = arith.constant dense<0.000000e+00> : vector<256x128xf32>
    %19 = tpu.matmul %16, %18, %cst_12 {dimension_numbers = #tpu.dot_dimension_numbers<[1], [0], [0], [1], [0, 0, 1, 1], [], []>} : vector<256x128xbf16>, vector<128x128xbf16>, vector<256x128xf32> -> vector<256x128xf32>
    %20 = arith.addf %14, %19 : vector<256x128xf32>
    %21 = vector.extract_strided_slice %1 {offsets = [1, 0, 0], sizes = [16, 16, 128], strides = [1, 1, 1]} : vector<18x18x128xbf16> to vector<16x16x128xbf16>
    %22 = vector.shape_cast %21 : vector<16x16x128xbf16> to vector<256x128xbf16>
    %c3 = arith.constant 3 : index
    %c0_13 = arith.constant 0 : index
    %c0_14 = arith.constant 0 : index
    %23 = vector.load %arg2[%c3, %c0_13, %c0_14] : memref<9x128x128xbf16, #tpu.memory_space<vmem>>, vector<1x128x128xbf16>
    %24 = vector.shape_cast %23 : vector<1x128x128xbf16> to vector<128x128xbf16>
    %cst_15 = arith.constant dense<0.000000e+00> : vector<256x128xf32>
    %25 = tpu.matmul %22, %24, %cst_15 {dimension_numbers = #tpu.dot_dimension_numbers<[1], [0], [0], [1], [0, 0, 1, 1], [], []>} : vector<256x128xbf16>, vector<128x128xbf16>, vector<256x128xf32> -> vector<256x128xf32>
    %26 = arith.addf %20, %25 : vector<256x128xf32>
    %27 = vector.extract_strided_slice %1 {offsets = [1, 1, 0], sizes = [16, 16, 128], strides = [1, 1, 1]} : vector<18x18x128xbf16> to vector<16x16x128xbf16>
    %28 = vector.shape_cast %27 : vector<16x16x128xbf16> to vector<256x128xbf16>
    %c4 = arith.constant 4 : index
    %c0_16 = arith.constant 0 : index
    %c0_17 = arith.constant 0 : index
    %29 = vector.load %arg2[%c4, %c0_16, %c0_17] : memref<9x128x128xbf16, #tpu.memory_space<vmem>>, vector<1x128x128xbf16>
    %30 = vector.shape_cast %29 : vector<1x128x128xbf16> to vector<128x128xbf16>
    %cst_18 = arith.constant dense<0.000000e+00> : vector<256x128xf32>
    %31 = tpu.matmul %28, %30, %cst_18 {dimension_numbers = #tpu.dot_dimension_numbers<[1], [0], [0], [1], [0, 0, 1, 1], [], []>} : vector<256x128xbf16>, vector<128x128xbf16>, vector<256x128xf32> -> vector<256x128xf32>
    %32 = arith.addf %26, %31 : vector<256x128xf32>
    %33 = vector.extract_strided_slice %1 {offsets = [1, 2, 0], sizes = [16, 16, 128], strides = [1, 1, 1]} : vector<18x18x128xbf16> to vector<16x16x128xbf16>
    %34 = vector.shape_cast %33 : vector<16x16x128xbf16> to vector<256x128xbf16>
    %c5 = arith.constant 5 : index
    %c0_19 = arith.constant 0 : index
    %c0_20 = arith.constant 0 : index
    %35 = vector.load %arg2[%c5, %c0_19, %c0_20] : memref<9x128x128xbf16, #tpu.memory_space<vmem>>, vector<1x128x128xbf16>
    %36 = vector.shape_cast %35 : vector<1x128x128xbf16> to vector<128x128xbf16>
    %cst_21 = arith.constant dense<0.000000e+00> : vector<256x128xf32>
    %37 = tpu.matmul %34, %36, %cst_21 {dimension_numbers = #tpu.dot_dimension_numbers<[1], [0], [0], [1], [0, 0, 1, 1], [], []>} : vector<256x128xbf16>, vector<128x128xbf16>, vector<256x128xf32> -> vector<256x128xf32>
    %38 = arith.addf %32, %37 : vector<256x128xf32>
    %39 = vector.extract_strided_slice %1 {offsets = [2, 0, 0], sizes = [16, 16, 128], strides = [1, 1, 1]} : vector<18x18x128xbf16> to vector<16x16x128xbf16>
    %40 = vector.shape_cast %39 : vector<16x16x128xbf16> to vector<256x128xbf16>
    %c6 = arith.constant 6 : index
    %c0_22 = arith.constant 0 : index
    %c0_23 = arith.constant 0 : index
    %41 = vector.load %arg2[%c6, %c0_22, %c0_23] : memref<9x128x128xbf16, #tpu.memory_space<vmem>>, vector<1x128x128xbf16>
    %42 = vector.shape_cast %41 : vector<1x128x128xbf16> to vector<128x128xbf16>
    %cst_24 = arith.constant dense<0.000000e+00> : vector<256x128xf32>
    %43 = tpu.matmul %40, %42, %cst_24 {dimension_numbers = #tpu.dot_dimension_numbers<[1], [0], [0], [1], [0, 0, 1, 1], [], []>} : vector<256x128xbf16>, vector<128x128xbf16>, vector<256x128xf32> -> vector<256x128xf32>
    %44 = arith.addf %38, %43 : vector<256x128xf32>
    %45 = vector.extract_strided_slice %1 {offsets = [2, 1, 0], sizes = [16, 16, 128], strides = [1, 1, 1]} : vector<18x18x128xbf16> to vector<16x16x128xbf16>
    %46 = vector.shape_cast %45 : vector<16x16x128xbf16> to vector<256x128xbf16>
    %c7 = arith.constant 7 : index
    %c0_25 = arith.constant 0 : index
    %c0_26 = arith.constant 0 : index
    %47 = vector.load %arg2[%c7, %c0_25, %c0_26] : memref<9x128x128xbf16, #tpu.memory_space<vmem>>, vector<1x128x128xbf16>
    %48 = vector.shape_cast %47 : vector<1x128x128xbf16> to vector<128x128xbf16>
    %cst_27 = arith.constant dense<0.000000e+00> : vector<256x128xf32>
    %49 = tpu.matmul %46, %48, %cst_27 {dimension_numbers = #tpu.dot_dimension_numbers<[1], [0], [0], [1], [0, 0, 1, 1], [], []>} : vector<256x128xbf16>, vector<128x128xbf16>, vector<256x128xf32> -> vector<256x128xf32>
    %50 = arith.addf %44, %49 : vector<256x128xf32>
    %51 = vector.extract_strided_slice %1 {offsets = [2, 2, 0], sizes = [16, 16, 128], strides = [1, 1, 1]} : vector<18x18x128xbf16> to vector<16x16x128xbf16>
    %52 = vector.shape_cast %51 : vector<16x16x128xbf16> to vector<256x128xbf16>
    %c8 = arith.constant 8 : index
    %c0_28 = arith.constant 0 : index
    %c0_29 = arith.constant 0 : index
    %53 = vector.load %arg2[%c8, %c0_28, %c0_29] : memref<9x128x128xbf16, #tpu.memory_space<vmem>>, vector<1x128x128xbf16>
    %54 = vector.shape_cast %53 : vector<1x128x128xbf16> to vector<128x128xbf16>
    %cst_30 = arith.constant dense<0.000000e+00> : vector<256x128xf32>
    %55 = tpu.matmul %52, %54, %cst_30 {dimension_numbers = #tpu.dot_dimension_numbers<[1], [0], [0], [1], [0, 0, 1, 1], [], []>} : vector<256x128xbf16>, vector<128x128xbf16>, vector<256x128xf32> -> vector<256x128xf32>
    %56 = arith.addf %50, %55 : vector<256x128xf32>
    %c0_31 = arith.constant 0 : index
    %c0_32 = arith.constant 0 : index
    %57 = vector.load %arg3[%c0_31, %c0_32] : memref<1x128xf32, #tpu.memory_space<vmem>>, vector<1x128xf32>
    %58 = vector.broadcast %57 : vector<1x128xf32> to vector<256x128xf32>
    %59 = arith.mulf %56, %58 : vector<256x128xf32>
    %c0_33 = arith.constant 0 : index
    %c0_34 = arith.constant 0 : index
    %60 = vector.load %arg4[%c0_33, %c0_34] : memref<1x128xf32, #tpu.memory_space<vmem>>, vector<1x128xf32>
    %61 = vector.broadcast %60 : vector<1x128xf32> to vector<256x128xf32>
    %62 = arith.addf %59, %61 : vector<256x128xf32>
    %c0_35 = arith.constant 0 : index
    %c0_36 = arith.constant 0 : index
    %c0_37 = arith.constant 0 : index
    %c0_38 = arith.constant 0 : index
    %63 = vector.load %arg5[%c0_35, %c0_36, %c0_37, %c0_38] : memref<1x16x16x128xbf16, #tpu.memory_space<vmem>>, vector<1x16x16x128xbf16>
    %64 = vector.shape_cast %63 : vector<1x16x16x128xbf16> to vector<16x16x128xbf16>
    %65 = vector.shape_cast %64 : vector<16x16x128xbf16> to vector<256x128xbf16>
    %66 = arith.extf %65 : vector<256x128xbf16> to vector<256x128xf32>
    %67 = arith.addf %62, %66 : vector<256x128xf32>
    %cst_39 = arith.constant 0.000000e+00 : f32
    %68 = vector.broadcast %cst_39 : f32 to vector<256x128xf32>
    %69 = arith.maximumf %67, %68 : vector<256x128xf32>
    %cst_40 = arith.constant dense<0.000000e+00> : vector<128xf32>
    %70 = vector.multi_reduction <add>, %69, %cst_40 [0] : vector<256x128xf32> to vector<128xf32>
    %71 = vector.shape_cast %70 : vector<128xf32> to vector<1x128xf32>
    %cst_41 = arith.constant 3.906250e-03 : f32
    %72 = vector.broadcast %cst_41 : f32 to vector<1x128xf32>
    %73 = arith.mulf %71, %72 : vector<1x128xf32>
    %c0_42 = arith.constant 0 : index
    %c0_43 = arith.constant 0 : index
    %c0_44 = arith.constant 0 : index
    %74 = vector.load %arg6[%c0_42, %c0_43, %c0_44] : memref<1x1x128xf32, #tpu.memory_space<vmem>>, vector<1x1x128xf32>
    %75 = vector.shape_cast %74 : vector<1x1x128xf32> to vector<1x128xf32>
    %76 = vector.shape_cast %73 : vector<1x128xf32> to vector<1x1x128xf32>
    tpu.vector_store %arg6[%c0_42, %c0_43, %c0_44], %76 {strides = array<i32>} : memref<1x1x128xf32, #tpu.memory_space<vmem>>, vector<1x1x128xf32>,
    return
  }
  func.func @transform_0(%arg0: i32) -> (i32, i32, i32, i32) {
    %c0_i32 = arith.constant 0 : i32
    %c0_i32_0 = arith.constant 0 : i32
    %c0_i32_1 = arith.constant 0 : i32
    %c0_i32_2 = arith.constant 0 : i32
    return %arg0, %c0_i32, %c0_i32_0, %c0_i32_1 : i32, i32, i32, i32
  }
  func.func @transform_1(%arg0: i32) -> (i32, i32, i32) {
    %c0_i32 = arith.constant 0 : i32
    %c0_i32_0 = arith.constant 0 : i32
    %c0_i32_1 = arith.constant 0 : i32
    %c0_i32_2 = arith.constant 0 : i32
    return %c0_i32, %c0_i32_0, %c0_i32_1 : i32, i32, i32
  }
  func.func @transform_2(%arg0: i32) -> (i32, i32) {
    %c0_i32 = arith.constant 0 : i32
    %c0_i32_0 = arith.constant 0 : i32
    %c0_i32_1 = arith.constant 0 : i32
    return %c0_i32, %c0_i32_0 : i32, i32
  }
  func.func @transform_3(%arg0: i32) -> (i32, i32) {
    %c0_i32 = arith.constant 0 : i32
    %c0_i32_0 = arith.constant 0 : i32
    %c0_i32_1 = arith.constant 0 : i32
    return %c0_i32, %c0_i32_0 : i32, i32
  }
  func.func @transform_4(%arg0: i32) -> (i32, i32, i32, i32) {
    %c0_i32 = arith.constant 0 : i32
    %c0_i32_0 = arith.constant 0 : i32
    %c0_i32_1 = arith.constant 0 : i32
    %c0_i32_2 = arith.constant 0 : i32
    return %arg0, %c0_i32, %c0_i32_0, %c0_i32_1 : i32, i32, i32, i32
  }
  func.func @transform_5(%arg0: i32) -> (i32, i32, i32) {
    %c0_i32 = arith.constant 0 : i32
    %c0_i32_0 = arith.constant 0 : i32
    %c0_i32_1 = arith.constant 0 : i32
    return %arg0, %c0_i32, %c0_i32_0 : i32, i32, i32
  }
}

module attributes {stable_mosaic.version = 11 : i64} {
  func.func @_head_kernel(%arg0: i32, %arg1: memref<2x128xf32, #tpu.memory_space<vmem>>, %arg2: memref<128x128xf32, #tpu.memory_space<vmem>>, %arg3: memref<1x128xf32, #tpu.memory_space<vmem>>, %arg4: memref<2x1xi32, #tpu.memory_space<vmem>>, %arg5: memref<2x128xf32, #tpu.memory_space<vmem>>, %arg6: memref<1x1xf32, #tpu.memory_space<vmem>>) attributes {dimension_semantics = [#tpu.dimension_semantics<arbitrary>], iteration_bounds = array<i64: 1>, scalar_prefetch = 0 : i64, scratch_operands = 0 : i64, tpu.core_type = #tpu.core_type<tc>, window_params = [{pipeline_mode = #tpu.pipeline_mode<synchronous>, transform_indices = @transform_0, window_bounds = array<i64: 2, 128>}, {pipeline_mode = #tpu.pipeline_mode<synchronous>, transform_indices = @transform_1, window_bounds = array<i64: 128, 128>}, {pipeline_mode = #tpu.pipeline_mode<synchronous>, transform_indices = @transform_2, window_bounds = array<i64: 1, 128>}, {pipeline_mode = #tpu.pipeline_mode<synchronous>, transform_indices = @transform_3, window_bounds = array<i64: 2, 1>}, {pipeline_mode = #tpu.pipeline_mode<synchronous>, transform_indices = @transform_4, window_bounds = array<i64: 2, 128>}, {pipeline_mode = #tpu.pipeline_mode<synchronous>, transform_indices = @transform_5, window_bounds = array<i64: 1, 1>}]} {
    %c0 = arith.constant 0 : index
    %c0_0 = arith.constant 0 : index
    %0 = vector.load %arg1[%c0, %c0_0] : memref<2x128xf32, #tpu.memory_space<vmem>>, vector<2x128xf32>
    %c0_1 = arith.constant 0 : index
    %c0_2 = arith.constant 0 : index
    %1 = vector.load %arg2[%c0_1, %c0_2] : memref<128x128xf32, #tpu.memory_space<vmem>>, vector<128x128xf32>
    %cst = arith.constant dense<0.000000e+00> : vector<2x128xf32>
    %2 = tpu.matmul %0, %1, %cst {dimension_numbers = #tpu.dot_dimension_numbers<[1], [0], [0], [1], [0, 0, 1, 1], [], []>} : vector<2x128xf32>, vector<128x128xf32>, vector<2x128xf32> -> vector<2x128xf32>
    %c0_3 = arith.constant 0 : index
    %c0_4 = arith.constant 0 : index
    %3 = vector.load %arg3[%c0_3, %c0_4] : memref<1x128xf32, #tpu.memory_space<vmem>>, vector<1x128xf32>
    %4 = vector.broadcast %3 : vector<1x128xf32> to vector<2x128xf32>
    %5 = arith.addf %2, %4 : vector<2x128xf32>
    %6 = tpu.iota {dimensions = array<i32: 1>} : vector<2x128xi32>
    %c10_i32 = arith.constant 10 : i32
    %7 = vector.broadcast %c10_i32 : i32 to vector<2x128xi32>
    %8 = arith.cmpi slt, %6, %7 : vector<2x128xi32>
    %cst_5 = arith.constant -1.000000e+30 : f32
    %9 = vector.broadcast %cst_5 : f32 to vector<2x128xf32>
    %10 = arith.select %8, %5, %9 : vector<2x128xi1>, vector<2x128xf32>
    %cst_6 = arith.constant dense<0xFF800000> : vector<2xf32>
    %11 = vector.multi_reduction <maximumf>, %10, %cst_6 [1] : vector<2x128xf32> to vector<2xf32>
    %12 = vector.shape_cast %11 : vector<2xf32> to vector<2x1xf32>
    %13 = vector.broadcast %12 : vector<2x1xf32> to vector<2x128xf32>
    %14 = arith.subf %10, %13 : vector<2x128xf32>
    %15 = math.exp %14 : vector<2x128xf32>
    %cst_7 = arith.constant 0.000000e+00 : f32
    %16 = vector.broadcast %cst_7 : f32 to vector<2x128xf32>
    %17 = arith.select %8, %15, %16 : vector<2x128xi1>, vector<2x128xf32>
    %cst_8 = arith.constant dense<0.000000e+00> : vector<2xf32>
    %18 = vector.multi_reduction <add>, %17, %cst_8 [1] : vector<2x128xf32> to vector<2xf32>
    %19 = vector.shape_cast %18 : vector<2xf32> to vector<2x1xf32>
    %20 = math.log %19 : vector<2x1xf32>
    %21 = arith.addf %12, %20 : vector<2x1xf32>
    %c0_9 = arith.constant 0 : index
    %c0_10 = arith.constant 0 : index
    %22 = vector.load %arg4[%c0_9, %c0_10] : memref<2x1xi32, #tpu.memory_space<vmem>>, vector<2x1xi32>
    %23 = vector.broadcast %22 : vector<2x1xi32> to vector<2x128xi32>
    %24 = arith.cmpi eq, %6, %23 : vector<2x128xi32>
    %cst_11 = arith.constant 0.000000e+00 : f32
    %25 = vector.broadcast %cst_11 : f32 to vector<2x128xf32>
    %26 = arith.select %24, %5, %25 : vector<2x128xi1>, vector<2x128xf32>
    %cst_12 = arith.constant dense<0.000000e+00> : vector<2xf32>
    %27 = vector.multi_reduction <add>, %26, %cst_12 [1] : vector<2x128xf32> to vector<2xf32>
    %28 = vector.shape_cast %27 : vector<2xf32> to vector<2x1xf32>
    %cst_13 = arith.constant 0.000000e+00 : f32
    %29 = vector.broadcast %cst_13 : f32 to vector<2x128xf32>
    %30 = arith.select %8, %5, %29 : vector<2x128xi1>, vector<2x128xf32>
    %c0_14 = arith.constant 0 : index
    %c0_15 = arith.constant 0 : index
    %31 = vector.load %arg5[%c0_14, %c0_15] : memref<2x128xf32, #tpu.memory_space<vmem>>, vector<2x128xf32>
    tpu.vector_store %arg5[%c0_14, %c0_15], %30 {strides = array<i32>} : memref<2x128xf32, #tpu.memory_space<vmem>>, vector<2x128xf32>,
    %32 = arith.subf %21, %28 : vector<2x1xf32>
    %33 = vector.shape_cast %32 : vector<2x1xf32> to vector<1x2x1xf32>
    %cst_16 = arith.constant dense<0.000000e+00> : vector<1xf32>
    %34 = vector.multi_reduction <add>, %33, %cst_16 [1, 2] : vector<1x2x1xf32> to vector<1xf32>
    %35 = vector.shape_cast %34 : vector<1xf32> to vector<1x1x1xf32>
    %36 = vector.extract %35[0, 0, 0] : f32 from vector<1x1x1xf32>
    %37 = vector.broadcast %36 : f32 to vector<1x1xf32>
    %cst_17 = arith.constant 2.000000e+00 : f32
    %38 = vector.broadcast %cst_17 : f32 to vector<1x1xf32>
    %39 = arith.divf %37, %38 : vector<1x1xf32>
    %c0_18 = arith.constant 0 : index
    %c0_19 = arith.constant 0 : index
    %40 = vector.load %arg6[%c0_18, %c0_19] : memref<1x1xf32, #tpu.memory_space<vmem>>, vector<1x1xf32>
    tpu.vector_store %arg6[%c0_18, %c0_19], %39 {strides = array<i32>} : memref<1x1xf32, #tpu.memory_space<vmem>>, vector<1x1xf32>,
    return
  }
  func.func @transform_0(%arg0: i32) -> (i32, i32) {
    %c0_i32 = arith.constant 0 : i32
    %c0_i32_0 = arith.constant 0 : i32
    %c0_i32_1 = arith.constant 0 : i32
    return %c0_i32, %c0_i32_0 : i32, i32
  }
  func.func @transform_1(%arg0: i32) -> (i32, i32) {
    %c0_i32 = arith.constant 0 : i32
    %c0_i32_0 = arith.constant 0 : i32
    %c0_i32_1 = arith.constant 0 : i32
    return %c0_i32, %c0_i32_0 : i32, i32
  }
  func.func @transform_2(%arg0: i32) -> (i32, i32) {
    %c0_i32 = arith.constant 0 : i32
    %c0_i32_0 = arith.constant 0 : i32
    %c0_i32_1 = arith.constant 0 : i32
    return %c0_i32, %c0_i32_0 : i32, i32
  }
  func.func @transform_3(%arg0: i32) -> (i32, i32) {
    %c0_i32 = arith.constant 0 : i32
    %c0_i32_0 = arith.constant 0 : i32
    %c0_i32_1 = arith.constant 0 : i32
    return %c0_i32, %c0_i32_0 : i32, i32
  }
  func.func @transform_4(%arg0: i32) -> (i32, i32) {
    %c0_i32 = arith.constant 0 : i32
    %c0_i32_0 = arith.constant 0 : i32
    %c0_i32_1 = arith.constant 0 : i32
    return %c0_i32, %c0_i32_0 : i32, i32
  }
  func.func @transform_5(%arg0: i32) -> (i32, i32) {
    %c0_i32 = arith.constant 0 : i32
    %c0_i32_0 = arith.constant 0 : i32
    %c0_i32_1 = arith.constant 0 : i32
    return %c0_i32, %c0_i32_0 : i32, i32
  }
}

</mosaic_0001>

<bundles_post_ra>
// kernel: model_and_loss_forward.7
= control target key start
LH: loop header
LB: loop body
LE: loop exit
PB: predicated region body
PF: predicated region fallthrough
CT: control target
= control target key end

     0   :  { %11 = vsyncpa [#allocation3], 0  ;;  %v327_v3 = vmov 0.0|0.0   ;;  %vm328_vm0 = vmmov 0   ;;  %v329_v6 = vmov 0.0   ;;  %s450_s0 = inlined_call_operand.vmem [shape: f32[2,128], index: 0, kind: input, shape index: {}]   ;;  %s451_s1 = inlined_call_operand.vmem [shape: f32[128,128], index: 1, kind: input, shape index: {}]   ;;  %s452_s2 = inlined_call_operand.vmem [shape: f32[1,128], index: 2, kind: input, shape index: {}]   ;;  %s453_s3 = inlined_call_operand.vmem [shape: s32[2,1], index: 3, kind: input, shape index: {}]   ;;  %s454_s4 = inlined_call_operand.hbm [shape: f32[2,128], index: 4, kind: output, shape index: {0}]   ;;  %s455_s5 = inlined_call_operand.hbm [shape: f32[1,1], index: 5, kind: output, shape index: {1}]  }
   0x1   :  { %v22_v0 = vld [vmem:[%s451_s1] sm:$0xff]  ;;  %v23_v1 = vld [vmem:[%s451_s1 + $0x8] sm:$0xff]  ;;  %v24_v2 = vld [vmem:[%s451_s1 + $0x10] sm:$0xff]  ;;  %242 = vmatprep.subr.bf16.mxu0 %v327_v3  ;;  %239 = vmatprep.mubr.msk.f32.mxu0 %vm328_vm0, %v329_v6 }
   0x2   :  { %v243_v4 = vpack.c.bf16 %v23_v1, %v22_v0  ;;  %v25_v5 = vld [vmem:[%s451_s1 + $0x18] sm:$0xff]  ;;  %v26_v8 = vld [vmem:[%s451_s1 + $0x20] sm:$0xff]  ;;  %v27_v9 = vld [vmem:[%s451_s1 + $0x28] sm:$0xff] }
   0x3   :  { %v246_v7 = vpack.c.bf16 %v25_v5, %v24_v2 }
   0x4   :  { %244 = vmatpush3.bf16.msra.mxu0 %v243_v4 }
   0x5   :  { %245 = vmatprep.subr.bf16.mxu0 %v327_v3 }
   0x6   :  { %12 = vsyncpa [#allocation5], 0  ;;  %v249_v10 = vpack.c.bf16 %v27_v9, %v26_v8  ;;  %v28_v11 = vld [vmem:[%s451_s1 + $0x30] sm:$0xff]  ;;  %v29_v12 = vld [vmem:[%s451_s1 + $0x38] sm:$0xff]  ;;  %v330_v27 = vmov 0   ;;  %v115_v28 = vlaneseq  ;;  %vm119_vm2 = vcmask 1041408  }
   0x7   :  { %v252_v13 = vpack.c.bf16 %v29_v12, %v28_v11  ;;  %v30_v14 = vld [vmem:[%s451_s1 + $0x40] sm:$0xff]  ;;  %v31_v15 = vld [vmem:[%s451_s1 + $0x48] sm:$0xff]  ;;  %v32_v17 = vld [vmem:[%s451_s1 + $0x50] sm:$0xff]  ;;  %274 = vset.pattern.permute.xlu0 %v330_v27  ;;  %vm145_vm4 = vcmask 1024  }
   0x8   :  { %247 = vmatpush3.bf16.msra.mxu0 %v246_v7  ;;  %v255_v16 = vpack.c.bf16 %v31_v15, %v30_v14  ;;  %v33_v18 = vld [vmem:[%s451_s1 + $0x58] sm:$0xff]  ;;  %v34_v20 = vld [vmem:[%s451_s1 + $0x60] sm:$0xff]  ;;  %v35_v21 = vld [vmem:[%s451_s1 + $0x68] sm:$0xff]  ;;  %v116_v29 = vand.u32 127, %v115_v28 }
   0x9   :  { %248 = vmatprep.subr.bf16.mxu0 %v327_v3  ;;  %v258_v19 = vpack.c.bf16 %v33_v18, %v32_v17  ;;  %v261_v22 = vpack.c.bf16 %v35_v21, %v34_v20  ;;  %v36_v23 = vld [vmem:[%s451_s1 + $0x70] sm:$0xff]  ;;  %v37_v24 = vld [vmem:[%s451_s1 + $0x78] sm:$0xff]  ;;  %v21_v26 = vld [vmem:[%s450_s0] sm:$0x3] }
   0xa   :  { %v264_v25 = vpack.c.bf16 %v37_v24, %v36_v23  ;;  %v189_v30 = vld [vmem:[%s452_s2] ss:$0 sm:$0xff]  ;;  %vm117_vm1 = vcmp.lt.s32.totalorder %v116_v29, 10  ;;  %s331_s2 = smov [#allocation2]  }
   0xb   :  { %v133_v37 = vld [vmem:[%s453_s3] sm:$0x3]  ;;  %s167_s3 = sshll.u32 %s331_s2, 4  ;;  %s168_s3 = int_to_ptr.vmem [resolvable:$true] %s167_s3 }
   0xc   :  { %250 = vmatpush3.bf16.msra.mxu0 %v249_v10  ;;  %s279_s29 = scalar_lea.vmem %s168_s3, 32  ;;  %p284_p1 = scmp.lt.s32.totalorder %s168_s3, %s168_s3 }
   0xd   :  { %251 = vmatprep.subr.bf16.mxu0 %v327_v3  ;;  %p280_p0 = scmp.ne.s32.totalorder %s168_s3, %s279_s29  ;;  %p285_p2 = scmp.lt.s32.totalorder %s279_s29, %s279_s29 }
   0xf   :  { %p286_p3 = por %p285_p2, %p284_p1 }
  0x10   :  { %253 = vmatpush3.bf16.msra.mxu0 %v252_v13 }
  0x11   :  { %254 = vmatprep.subr.bf16.mxu0 %v327_v3  ;;  %p287_p4 = pnand %p286_p3, %p280_p0 }
  0x14   :  { %256 = vmatpush3.bf16.msra.mxu0 %v255_v16 }
  0x15   :  { %257 = vmatprep.subr.bf16.mxu0 %v327_v3 }
  0x18   :  { %259 = vmatpush3.bf16.msra.mxu0 %v258_v19 }
  0x19   :  { %260 = vmatprep.subr.bf16.mxu0 %v327_v3 }
  0x1c   :  { %262 = vmatpush3.bf16.msra.mxu0 %v261_v22 }
  0x1d   :  { %263 = vmatprep.subr.bf16.mxu0 %v327_v3 }
  0x20   :  { %265 = vmatpush3.bf16.msra.mxu0 %v264_v25 }
  0x23   :  { %240 = vmatmul.mubr.f32.vlgmr.msra.gmra.mrb[0].mxu0 %v21_v26 }
  0xf6   :  { %v111_v31 = vpop.f32.mrb[0].mxu0 }
  0xf7   :  { %v112_v32 = vadd.f32 %v189_v30, %v111_v31  ;;  %v241_v33 = vpop.f32.mrb[1].mxu0 }
  0xf9   :  { %v118_v34 = vsel %vm117_vm1, %v112_v32, -1e+30  ;;  %v142_v35 = vsel %vm117_vm1, %v112_v32, 0.0 }
  0xfa   :  { %v120_v36 = vsel %vm119_vm2, %v118_v34, -inf  ;;  %143 = vst [vmem:[#allocation2] sm:$0x3] %v142_v35 }
  0xfb   :  { %121 = vmax.xlane.f32.xlu0 %v120_v36 }
 0x111   :  { %135 = vperm.xlu0 %274, %v133_v37  }
 0x188   :  { %v122_v38 = vpop.xlane.xlu0 %121 }
 0x189   :  { %v123_v39 = vsub.f32 %v118_v34, %v122_v38 }
 0x18b   :  { %v124_v40 = vmul.f32 1.442695, %v123_v39 }
 0x18d   :  { %275 = vpow2.f32 %v124_v40 }
 0x190   :  { %v136_v41 = vpop.permute.xlu0 %135 }
 0x191   :  { %vm137_vm3 = vcmp.eq.s32.totalorder %v116_v29, %v136_v41 }
 0x192   :  { %v138_v45 = vsel %vm137_vm3, %v112_v32, 0.0 }
 0x193   :  { %v139_v46 = vsel %vm119_vm2, %v138_v45, 0.0 }
 0x197   :  { %v276_v42 = vpop.eup %275 }
 0x198   :  { %v126_v43 = vsel %vm117_vm1, %v276_v42, 0.0 }
 0x199   :  { %v127_v44 = vsel %vm119_vm2, %v126_v43, 0.0 }
 0x19a   :  { %128 = vadd.xlane.f32.xlu1 %v127_v44 }
 0x19e   :  { %140 = vadd.xlane.f32.xlu1 %v139_v46 }
 0x227   :  { %v129_v47 = vpop.xlane.xlu1 %128 }
 0x228   :  { %277 = vlog2.f32 %v129_v47 }
 0x22b   :  { %v141_v51 = vpop.xlane.xlu1 %140 }
 0x232   :  { %v278_v48 = vpop.eup %277 }
 0x233   :  { %v131_v49 = vmul.f32 0.6931472, %v278_v48 }
 0x235   :  { %v132_v50 = vadd.f32 %v131_v49, %v122_v38 }
 0x237   :  { %v144_v52 = vsub.f32 %v132_v50, %v141_v51 }
 0x239   :  { %v146_v53 = vsel %vm145_vm4, %v144_v52, 0.0 }
 0x23a   :  { %147 = vadd.xlane.f32.xlu1 %v146_v53 }
 0x23b   :  { %290 = shalt.err (!%p287_p4)
}
 0x23c   :  { %s291_s7 = scalar_lea.hbm %s454_s4, 32 }
 0x23d   :  { %p292_p5 = scmp.ne.s32.totalorder %s454_s4, %s291_s7  ;;  %p295_p6 = scmp.lt.u32.totalorder %s291_s7, %s454_s4 }
 0x23f   :  { %p297_p7 = pnand %p295_p6, %p292_p5 }
 0x241   :  { %300 = shalt.err (!%p297_p7)
}
 0x242   :  { %170 = dma.vmem_to_hbm [thread:$0]  %s168_s3, 32, %s454_s4, [#allocation3]   ;;  %vm159_vm5 = vcmask 0  }
 0x243   :  { %s332_s14 = smov [#allocation4]  }
 0x244   :  { %s177_s15 = sshll.u32 %s332_s14, 4  ;;  %s178_s15 = int_to_ptr.vmem [resolvable:$true] %s177_s15 }
 0x245   :  { %s301_s17 = scalar_lea.vmem %s178_s15, 16  ;;  %s305_s18 = scalar_lea.vmem %s178_s15, 32 }
 0x246   :  { %p302_p8 = scmp.ne.s32.totalorder %s178_s15, %s301_s17  ;;  %p306_p9 = scmp.lt.s32.totalorder %s178_s15, %s178_s15 }
 0x247   :  { %p307_p10 = scmp.lt.s32.totalorder %s305_s18, %s301_s17 }
 0x249   :  { %p308_p11 = por %p307_p10, %p306_p9 }
 0x24b   :  { %p309_p12 = pnand %p308_p11, %p302_p8 }
 0x2c7   :  { %v148_v54 = vpop.xlane.xlu1 %147 }
 0x2c8   :  { %v149_v55 = vrot.slane %v148_v54, 4 }
 0x2ca   :  { %v150_v56 = vadd.f32 %v149_v55, %v148_v54 }
 0x2cc   :  { %v151_v57 = vrot.slane %v150_v56, 2 }
 0x2ce   :  { %v152_v58 = vadd.f32 %v151_v57, %v150_v56 }
 0x2d0   :  { %v153_v59 = vrot.slane %v152_v58, 1 }
 0x2d2   :  { %v154_v60 = vadd.f32 %v153_v59, %v152_v58 }
 0x2d4   :  { %266 = vpush %v154_v60 }
 0x305   :  { %s267_s16 = spop %266 }
 0x306   :  { %v156_v61 = vstv %s267_s16 }
 0x307   :  { %v158_v62 = vmul.f32 0.5, %v156_v61 }
 0x309   :  { %160 = vst.msk [vmem:[#allocation4] sm:$0x1] %vm159_vm5, %v158_v62 }
 0x30a   :  { %312 = shalt.err (!%p309_p12)
}
 0x30b   :  { %s313_s20 = scalar_lea.hbm %s455_s5, 16 }
 0x30c   :  { %p314_p13 = scmp.ne.s32.totalorder %s455_s5, %s313_s20  ;;  %p317_p0 = scmp.lt.u32.totalorder %s313_s20, %s455_s5 }
 0x30e   :  { %p319_p1 = pnand %p317_p0, %p314_p13 }
 0x310   :  { %322 = shalt.err (!%p319_p1)
}
 0x311   :  { %180 = dma.vmem_to_hbm [thread:$0]  %s178_s15, 16, %s455_s5, [#allocation5]  }
 0x312   :  { %323 = dma.done.wait [#allocation3], 32  }
 0x313   :  { %324 = vsyncadd [#allocation3], 4294967264 }
 0x314   :  { %325 = dma.done.wait [#allocation5], 16  }
 0x315   :  { %326 = vsyncadd [#allocation5], 4294967280 }
 0x316   :  { %187 = vsyncpa [#allocation3], 1 }
 0x317   :  { %188 = vsyncpa [#allocation5], 1 }

// kernel: model_and_loss_forward.4
= control target key start
LH: loop header
LB: loop body
LE: loop exit
PB: predicated region body
PF: predicated region fallthrough
CT: control target
= control target key end

     0   :  { %s5182_s15 = smov 0   ;;  %s6286_s0 = inlined_call_operand.vmem [shape: bf16[2,18,18,128], index: 0, kind: input, shape index: {}]   ;;  %s6287_s1 = inlined_call_operand.vmem [shape: bf16[9,128,128], index: 1, kind: input, shape index: {}]   ;;  %s6288_s2 = inlined_call_operand.vmem [shape: f32[1,128], index: 2, kind: input, shape index: {}]   ;;  %s6289_s3 = inlined_call_operand.vmem [shape: f32[1,128], index: 3, kind: input, shape index: {}]   ;;  %s6290_s4 = inlined_call_operand.vmem [shape: bf16[2,16,16,128], index: 4, kind: output, shape index: {}]  }
   0x1 LB: > { %s3669_s16 = sadd.s32 4294967295, %s5155_s15   ;;  %p3673_p0 = scmp.ge.s32.totalorder %s5155_s15, 1  ;;  %s5155_s15 = sphi %s5182_s15, %s14_s15  }
   0x2   : > { %p162_p1 = scmp.lt.s32.totalorder %s5155_s15, 3 }
   0x4   : > { %p163_p2 = pnand %p3673_p0, %p162_p1 }
   0x6   : > { %166 = sbr.rel (%p163_p2) target bundleno = 563 (0x233), region = 36 }
   0xd   : > { %v5042_v0 = vld [vmem:[%s6287_s1 + $0x40] sm:$0xff]   ;;  %p188_p3 = scmp.lt.s32.totalorder %s3669_s16, 1  ;;  %v5044_v2 = vld [vmem:[%s6287_s1 + $0x48] sm:$0xff]   ;;  %v5046_v4 = vld [vmem:[%s6287_s1 + $0x50] sm:$0xff]   ;;  %vm269_vm0 = vsmask.f32 3328 }
   0xe   : > { %v5043_v1 = vld [vmem:[%s6287_s1 + $0x100] sm:$0xff]   ;;  %4329 = vmatprep.subr.bf16.mxu1 %v5042_v0  ;;  %v5045_v3 = vld [vmem:[%s6287_s1 + $0x108] sm:$0xff]   ;;  %v5047_v5 = vld [vmem:[%s6287_s1 + $0x110] sm:$0xff]   ;;  %vm270_vm1 = vsmask.f32 7440  ;;  %vm1267_vm3 = vcmask 1042432  }
   0xf   : > { %4521 = vmatprep.subr.bf16.mxu0 %v5043_v1  ;;  %4330 = vmatpush3.bf16.msra.mxu1 %v5042_v0  ;;  %s6335_s16 = smov (!%p188_p3, %s3669_s16), 1  ;;  %v5048_v6 = vld [vmem:[%s6287_s1 + $0x58] sm:$0xff]   ;;  %v5050_v8 = vld [vmem:[%s6287_s1 + $0x60] sm:$0xff]   ;;  %v5052_v10 = vld [vmem:[%s6287_s1 + $0x68] sm:$0xff]   ;;  %vm1268_vm4 = vcmask 1046532  }
  0x10   : > { %4522 = vmatpush3.bf16.msra.mxu0 %v5043_v1  ;;  %4331 = vmatprep.subr.bf16.mxu1 %v5044_v2  ;;  %v5049_v7 = vld [vmem:[%s6287_s1 + $0x118] sm:$0xff]   ;;  %s5033_s7 = smul.u32 216, %s6335_s16  ;;  %v5051_v9 = vld [vmem:[%s6287_s1 + $0x120] sm:$0xff]   ;;  %v5053_v11 = vld [vmem:[%s6287_s1 + $0x128] sm:$0xff]   ;;  %s3985_s22 = sshll.u32 %s6335_s16, 7 }
  0x11   : > { %4523 = vmatprep.subr.bf16.mxu0 %v5045_v3  ;;  %v5054_v17 = vld [vmem:[%s6287_s1 + $0x70] sm:$0xff]   ;;  %v5056_v36 = vld [vmem:[%s6287_s1 + $0x78] sm:$0xff]   ;;  %vm5271_vm2 = vmor %vm269_vm0, %vm270_vm1  ;;  %s6204_s25 = scalar_lea.vmem %s6290_s4, %s3985_s22 }
  0x12   : > { %s5226_s14 = scalar_lea.vmem %s6286_s0, %s5033_s7  ;;  %v5055_v31 = vld [vmem:[%s6287_s1 + $0x130] sm:$0xff]   ;;  %v5057_v53 = vld [vmem:[%s6287_s1 + $0x138] sm:$0xff]   ;;  %v5058_v1 = vld [vmem:[%s6287_s1] sm:$0xff]  }
  0x13   : > { %4332 = vmatpush3.bf16.msra.mxu1 %v5044_v2  ;;  %v5235_v12 = vld [vmem:[%s5226_s14] sm:$0xf]  ;;  %v5238_v13 = vld [vmem:[%s5226_s14 + $0x4] sm:$0xf]  ;;  %v201_v14 = vld [vmem:[%s5226_s14 + $0x8] sm:$0x1] }
  0x14   : > { %4524 = vmatpush3.bf16.msra.mxu0 %v5045_v3  ;;  %4333 = vmatprep.subr.bf16.mxu1 %v5046_v4  ;;  %v273_v15 = vshrl.u32 %v5235_v12, 16  ;;  %v276_v16 = vshll.u32 %v5235_v12, 16  ;;  %v282_v18 = vshll.u32 %v5238_v13, 16  ;;  %v286_v19 = vshrl.u32 %v5238_v13, 16  ;;  %v5249_v21 = vld [vmem:[%s5226_s14 + $0xc] sm:$0xf]  ;;  %vm5478_vm5 = vmor %vm1267_vm3, %vm1268_vm4 }
  0x15   : > { %4525 = vmatprep.subr.bf16.mxu0 %v5047_v5  ;;  %v292_v20 = vshll.u32 %v201_v14, 16  ;;  %v5252_v24 = vld [vmem:[%s5226_s14 + $0x10] sm:$0xf]  ;;  %v5255_v25 = vld [vmem:[%s5226_s14 + $0x14] sm:$0x1]  ;;  %v297_v30 = vshrl.u32 %v5249_v21, 16 }
  0x16   : > { %v275_v22 = vrot.slane %v273_v15, 4  ;;  %v278_v23 = vrot.slane %v276_v16, 5  ;;  %v284_v27 = vrot.slane %v282_v18, 5  ;;  %v288_v28 = vrot.slane %v286_v19, 4  ;;  %v5277_v41 = vld [vmem:[%s5226_s14 + $0x18] sm:$0xf] }
  0x17   : > { %4334 = vmatpush3.bf16.msra.mxu1 %v5046_v4  ;;  %v294_v29 = vrot.slane %v292_v20, 5  ;;  %v300_v33 = vshll.u32 %v5249_v21, 16  ;;  %v306_v34 = vshll.u32 %v5252_v24, 16  ;;  %v310_v35 = vshrl.u32 %v5252_v24, 16  ;;  %v5280_v42 = vld [vmem:[%s5226_s14 + $0x1c] sm:$0xf] }
  0x18   : > { %4526 = vmatpush3.bf16.msra.mxu0 %v5047_v5  ;;  %4335 = vmatprep.subr.bf16.mxu1 %v5048_v6  ;;  %v279_v32 = vor.u32 %v278_v23, %v275_v22  ;;  %v289_v38 = vor.u32 %v288_v28, %v284_v27  ;;  %v299_v39 = vrot.slane %v297_v30, 4  ;;  %v316_v40 = vshll.u32 %v5255_v25, 16  ;;  %v5287_v48 = vld [vmem:[%s5226_s14 + $0x20] sm:$0x1]  ;;  %v5304_v3 = vld [vmem:[%s5226_s14 + $0x24] sm:$0xf] }
  0x19   : > { %4527 = vmatprep.subr.bf16.mxu0 %v5049_v7  ;;  %v5284_v43 = vcombine.low %v5249_v21, %v5252_v24  ;;  %v302_v45 = vrot.slane %v300_v33, 5  ;;  %v308_v46 = vrot.slane %v306_v34, 5  ;;  %v312_v47 = vrot.slane %v310_v35, 4  ;;  %v5319_v14 = vld [vmem:[%s5226_s14 + $0x2c] sm:$0x1]  ;;  %v5148_v37 = vld [vmem:[%s6287_s1 + $0x138] sm:$0xff]  }
  0x1a   : > { %v280_v44 = vrot.slane %v279_v32, 4  ;;  %v290_v49 = vrot.slane %v289_v38, 4  ;;  %v318_v50 = vrot.slane %v316_v40, 5  ;;  %v321_v51 = vshrl.u32 %v5277_v41, 16  ;;  %v5324_v22 = vld [vmem:[%s5226_s14 + $0x30] sm:$0xf] }
  0x1b   : > { %4336 = vmatpush3.bf16.msra.mxu1 %v5048_v6  ;;  %v324_v52 = vshll.u32 %v5277_v41, 16  ;;  %v303_v55 = vor.u32 %v302_v45, %v299_v39  ;;  %v313_v56 = vor.u32 %v312_v47, %v308_v46  ;;  %v330_v57 = vshll.u32 %v5280_v42, 16  ;;  %v5329_v30 = vld [vmem:[%s5226_s14 + $0x34] sm:$0xf]  ;;  %v5061_v34 = vld [vmem:[%s6287_s1 + $0x8] sm:$0xff]  }
  0x1c   : > { %4528 = vmatpush3.bf16.msra.mxu0 %v5049_v7  ;;  %4337 = vmatprep.subr.bf16.mxu1 %v5050_v8  ;;  %v285_v54 = vsel %vm5271_vm2, %v280_v44, %v284_v27  ;;  %v295_v58 = vsel %vm5271_vm2, %v290_v49, %v294_v29  ;;  %v323_v59 = vrot.slane %v321_v51, 4  ;;  %v334_v61 = vshrl.u32 %v5280_v42, 16  ;;  %v5338_v35 = vld [vmem:[%s5226_s14 + $0x38] sm:$0x1] }
  0x1d   : > { %4529 = vmatprep.subr.bf16.mxu0 %v5051_v9  ;;  %v326_v60 = vrot.slane %v324_v52, 5  ;;  %v3693_v62 = vcombine.low %v285_v54, %v295_v58  ;;  %v304_v63 = vrot.slane %v303_v55, 4  ;;  %v314_v0 = vrot.slane %v313_v56, 4  ;;  %v5353_v58 = vld [vmem:[%s5226_s14 + $0x3c] sm:$0xf] }
  0x1e   : > { %v332_v2 = vrot.slane %v330_v57, 5  ;;  %v336_v5 = vrot.slane %v334_v61, 4  ;;  %v340_v6 = vshll.u32 %v5287_v48, 16  ;;  %v1289_v7 = vrot.slane %v5287_v48, 5 }
  0x1f   : > { %4338 = vmatpush3.bf16.msra.mxu1 %v5050_v8  ;;  %v327_v4 = vor.u32 %v326_v60, %v323_v59  ;;  %v5059_v8 = vld [vmem:[%s6287_s1 + $0x140] sm:$0xff]   ;;  %4345 = vmatprep.mubr.bf16.mxu1 %v3693_v62  ;;  %v345_v15 = vshrl.u32 %v5304_v3, 16  ;;  %v348_v16 = vshll.u32 %v5304_v3, 16  ;;  %v364_v33 = vshll.u32 %v5319_v14, 16  ;;  %v5064_v59 = vld [vmem:[%s6287_s1 + $0x10] sm:$0xff]  }
  0x20   : > { %4530 = vmatpush3.bf16.msra.mxu0 %v5051_v9  ;;  %4339 = vmatprep.subr.bf16.mxu1 %v5052_v10  ;;  %v5312_v9 = vld [vmem:[%s5226_s14 + $0x28] sm:$0xf]  ;;  %v337_v19 = vor.u32 %v336_v5, %v332_v2  ;;  %v342_v20 = vrot.slane %v340_v6, 5  ;;  %v372_v44 = vshll.u32 %v5324_v22, 16  ;;  %v382_v56 = vshrl.u32 %v5329_v30, 16 }
  0x21   : > { %4531 = vmatprep.subr.bf16.mxu0 %v5053_v11  ;;  %v328_v18 = vrot.slane %v327_v4, 4  ;;  %v347_v23 = vrot.slane %v345_v15, 4  ;;  %v350_v27 = vrot.slane %v348_v16, 5  ;;  %v354_v28 = vshll.u32 %v5312_v9, 16  ;;  %v5062_v16 = vld [vmem:[%s6287_s1 + $0x150] sm:$0xff]  }
  0x22   : > { %v358_v29 = vshrl.u32 %v5312_v9, 16  ;;  %v338_v32 = vrot.slane %v337_v19, 4  ;;  %v366_v47 = vrot.slane %v364_v33, 5  ;;  %v374_v54 = vrot.slane %v372_v44, 5  ;;  %v5393_v33 = vld [vmem:[%s5226_s14 + $0x50] sm:$0x1] }
  0x23   : > { %4340 = vmatpush3.bf16.msra.mxu1 %v5052_v10  ;;  %v309_v10 = vsel %vm5271_vm2, %v304_v63, %v308_v46  ;;  %v351_v38 = vor.u32 %v350_v27, %v347_v23  ;;  %v356_v39 = vrot.slane %v354_v28, 5  ;;  %v5060_v46 = vld [vmem:[%s6287_s1 + $0x148] sm:$0xff]   ;;  %v388_v57 = vshll.u32 %v5338_v35, 16 }
  0x24   : > { %4532 = vmatpush3.bf16.msra.mxu0 %v5053_v11  ;;  %4341 = vmatprep.subr.bf16.mxu1 %v5054_v17  ;;  %v319_v11 = vsel %vm5271_vm2, %v314_v0, %v318_v50  ;;  %v360_v40 = vrot.slane %v358_v29, 4  ;;  %v343_v45 = vsel %vm5271_vm2, %v338_v32, %v342_v20  ;;  %v378_v50 = vshll.u32 %v5329_v30, 16  ;;  %v5367_v0 = vld [vmem:[%s5226_s14 + $0x40] sm:$0xf]  ;;  %v5384_v27 = vld [vmem:[%s5226_s14 + $0x48] sm:$0xf] }
  0x25   : > { %4533 = vmatprep.subr.bf16.mxu0 %v5055_v31  ;;  %v352_v52 = vrot.slane %v351_v38, 4  ;;  %v5360_v60 = vcombine.low %v5277_v41, %v5280_v42  ;;  %v384_v4 = vrot.slane %v382_v56, 4  ;;  %v390_v5 = vrot.slane %v388_v57, 5  ;;  %v5387_v28 = vld [vmem:[%s5226_s14 + $0x4c] sm:$0xf] }
  0x26   : > { %v380_v55 = vrot.slane %v378_v50, 5  ;;  %v396_v6 = vshll.u32 %v5353_v58, 16  ;;  %v426_v44 = vshll.u32 %v5387_v28, 16  ;;  %v430_v50 = vshrl.u32 %v5387_v28, 16 }
  0x27   : > { %4342 = vmatpush3.bf16.msra.mxu1 %v5054_v17  ;;  %v3694_v17 = vcombine.low %v309_v10, %v319_v11  ;;  %v357_v61 = vsel %vm5271_vm2, %v352_v52, %v356_v39  ;;  %v402_v10 = vshll.u32 %v5367_v0, 16 }
  0x28   : > { %4534 = vmatpush3.bf16.msra.mxu0 %v5055_v31  ;;  %4343 = vmatprep.subr.bf16.mxu1 %v5056_v36  ;;  %v333_v31 = vsel %vm5271_vm2, %v328_v18, %v332_v2  ;;  %v393_v2 = vshrl.u32 %v5353_v58, 16  ;;  %v385_v19 = vor.u32 %v384_v4, %v380_v55  ;;  %v398_v20 = vrot.slane %v396_v6, 5  ;;  %v5424_v6 = vld [vmem:[%s5226_s14 + $0x58] sm:$0xf] }
  0x29   : > { %4535 = vmatprep.subr.bf16.mxu0 %v5057_v53  ;;  %4537 = vmatprep.mubr.bf16.mxu0 %v3694_v17  ;;  %v5348_v51 = vcombine.low %v333_v31, %v343_v45  ;;  %v404_v23 = vrot.slane %v402_v10, 5  ;;  %v5063_v45 = vld [vmem:[%s6287_s1 + $0x158] sm:$0xff]  }
  0x2a   : > { %v386_v38 = vrot.slane %v385_v19, 4  ;;  %v5427_v10 = vld [vmem:[%s5226_s14 + $0x5c] sm:$0x1] }
  0x2b   : > { %4344 = vmatpush3.bf16.msra.mxu1 %v5056_v36  ;;  %v369_v36 = vshrl.u32 %v5324_v22, 16 }
  0x2c   : > { %4536 = vmatpush3.bf16.msra.mxu0 %v5057_v53  ;;  %4377 = vmatprep.subr.bf16.mxu1 %v5058_v1  ;;  %v361_v53 = vor.u32 %v360_v40, %v356_v39  ;;  %v420_v40 = vshll.u32 %v5384_v27, 16  ;;  %v391_v52 = vsel %vm5271_vm2, %v386_v38, %v390_v5  ;;  %v5421_v5 = vld [vmem:[%s5226_s14 + $0x54] sm:$0xf] }
  0x2d   : > { %4569 = vmatprep.subr.bf16.mxu0 %v5059_v8  ;;  %v371_v49 = vrot.slane %v369_v36, 4  ;;  %v5067_v36 = vld [vmem:[%s6287_s1 + $0x18] sm:$0xff]   ;;  %v441_v19 = vshrl.u32 %v5421_v5, 16 }
  0x2e   : > { %4346 = vmatmul.mubr.bf16.vlgmr.msra.gmra.mrb[0].mxu1 %v3694_v17  ;;  %v362_v62 = vrot.slane %v361_v53, 4  ;;  %v406_v17 = vshrl.u32 %v5367_v0, 16 }
  0x2f   : > { %4378 = vmatpush3.bf16.msra.mxu1 %v5058_v1  ;;  %4538 = vmatmul.mubr.bf16.vlgmr.msra.gmra.mrb[0].mxu0 %v5348_v51  ;;  %v375_v63 = vor.u32 %v374_v54, %v371_v49  ;;  %v5370_v1 = vld [vmem:[%s5226_s14 + $0x44] sm:$0x1]  ;;  %v422_v54 = vrot.slane %v420_v40, 5  ;;  %v454_v40 = vshrl.u32 %v5424_v6, 16 }
  0x30   : > { %4379 = vmatprep.subr.bf16.mxu1 %v5061_v34  ;;  %4349 = vmatprep.mubr.bf16.mxu1 %v5348_v51  ;;  %v367_v11 = vsel %vm5271_vm2, %v362_v62, %v366_v47  ;;  %v408_v31 = vrot.slane %v406_v17, 4  ;;  %v412_v32 = vshll.u32 %v5370_v1, 16  ;;  %v436_v62 = vshll.u32 %v5393_v33, 16 }
  0x31   : > { %4570 = vmatpush3.bf16.msra.mxu0 %v5059_v8  ;;  %v376_v15 = vrot.slane %v375_v63, 4  ;;  %v395_v8 = vrot.slane %v393_v2, 4  ;;  %v5381_v18 = vcombine.low %v357_v61, %v367_v11  ;;  %v432_v61 = vrot.slane %v430_v50, 4  ;;  %v5065_v63 = vld [vmem:[%s6287_s1 + $0x160] sm:$0xff]   ;;  %v5461_v50 = vld [vmem:[%s5226_s14 + $0x68] sm:$0x1] }
  0x32   : > { %4571 = vmatprep.subr.bf16.mxu0 %v5060_v46  ;;  %v409_v47 = vor.u32 %v408_v31, %v404_v23  ;;  %v414_v49 = vrot.slane %v412_v32, 5  ;;  %v5070_v2 = vld [vmem:[%s6287_s1 + $0x20] sm:$0xff]   ;;  %v5431_v11 = vcombine.low %v5304_v3, %v5312_v9  ;;  %v438_v17 = vrot.slane %v436_v62, 5 }
  0x33   : > { %4380 = vmatpush3.bf16.msra.mxu1 %v5061_v34  ;;  %6309 = vst [vmem:[#allocation2_spill] sm:$0xff] %v5381_v18  ;;  %v381_v29 = vsel %vm5271_vm2, %v376_v15, %v380_v55  ;;  %v417_v34 = vshrl.u32 %v5384_v27, 16  ;;  %4541 = vmatprep.mubr.bf16.mxu0 %v5381_v18  ;;  %v399_v39 = vor.u32 %v398_v20, %v395_v8  ;;  %v428_v55 = vrot.slane %v426_v44, 5  ;;  %v5447_v32 = vld [vmem:[%s5226_s14 + $0x60] sm:$0xf] }
  0x34   : > { %4381 = vmatprep.subr.bf16.mxu1 %v5064_v59  ;;  %v5409_v56 = vcombine.low %v381_v29, %v391_v52  ;;  %v410_v57 = vrot.slane %v409_v47, 4  ;;  %v5435_v15 = vcombine.low %v5324_v22, %v5329_v30  ;;  %v444_v29 = vshll.u32 %v5421_v5, 16  ;;  %v5455_v47 = vld [vmem:[%s5226_s14 + $0x64] sm:$0xf] }
  0x35   : > { %4572 = vmatpush3.bf16.msra.mxu0 %v5060_v46  ;;  %v419_v46 = vrot.slane %v417_v34, 4  ;;  %v400_v53 = vrot.slane %v399_v39, 4  ;;  %v433_v8 = vor.u32 %v432_v61, %v428_v55  ;;  %v450_v31 = vshll.u32 %v5424_v6, 16  ;;  %v5072_v34 = vld [vmem:[%s6287_s1 + $0x28] sm:$0xff]  }
  0x36   : > { %4350 = vmatmul.mubr.bf16.gmra.mrb[4].mxu1 %v5381_v18  ;;  %4573 = vmatprep.subr.bf16.mxu0 %v5062_v16  ;;  %6310 = vst [vmem:[#allocation3_spill] sm:$0xff] %v5409_v56  ;;  %v443_v39 = vrot.slane %v441_v19, 4  ;;  %v460_v44 = vshll.u32 %v5427_v10, 16  ;;  %v465_v52 = vshrl.u32 %v5447_v32, 16  ;;  %v484_v19 = vshll.u32 %v5461_v50, 16 }
  0x37   : > { %4382 = vmatpush3.bf16.msra.mxu1 %v5064_v59  ;;  %v405_v4 = vsel %vm5271_vm2, %v400_v53, %v404_v23  ;;  %v423_v59 = vor.u32 %v422_v54, %v419_v46  ;;  %4542 = vmatmul.mubr.bf16.gmra.mrb[4].mxu0 %v5409_v56  ;;  %v434_v38 = vrot.slane %v433_v8, 4  ;;  %v452_v46 = vrot.slane %v450_v31, 5 }
  0x38   : > { %4383 = vmatprep.subr.bf16.mxu1 %v5067_v36  ;;  %4353 = vmatprep.mubr.bf16.mxu1 %v5409_v56  ;;  %v456_v54 = vrot.slane %v454_v40, 4  ;;  %v5489_v40 = vld [vmem:[%s5226_s14 + $0x6c] sm:$0xf] }
  0x39   : > { %4574 = vmatpush3.bf16.msra.mxu0 %v5062_v16  ;;  %v415_v16 = vsel %vm5271_vm2, %v410_v57, %v414_v49  ;;  %v424_v23 = vrot.slane %v423_v59, 4  ;;  %v439_v53 = vsel %vm5271_vm2, %v434_v38, %v438_v17  ;;  %v462_v57 = vrot.slane %v460_v44, 5 }
  0x3a   : > { %4575 = vmatprep.subr.bf16.mxu0 %v5063_v45  ;;  %v5442_v20 = vcombine.low %v405_v4, %v415_v16  ;;  %v467_v4 = vrot.slane %v465_v52, 4  ;;  %v474_v59 = vshll.u32 %v5455_v47, 16  ;;  %v457_v16 = vor.u32 %v456_v54, %v452_v46 }
  0x3b   : > { %4384 = vmatpush3.bf16.msra.mxu1 %v5067_v36  ;;  %v429_v49 = vsel %vm5271_vm2, %v424_v23, %v428_v55  ;;  %v446_v36 = vrot.slane %v444_v29, 5  ;;  %v468_v55 = vshll.u32 %v5447_v32, 16  ;;  %v478_v17 = vshrl.u32 %v5455_v47, 16  ;;  %v5074_v29 = vld [vmem:[%s6287_s1 + $0x30] sm:$0xff]  }
  0x3c   : > { %6311 = vst [vmem:[#allocation4_spill] sm:$0xff] %v5442_v20  ;;  %4385 = vmatprep.subr.bf16.mxu1 %v5070_v2  ;;  %4545 = vmatprep.mubr.bf16.mxu0 %v5442_v20  ;;  %v5471_v61 = vcombine.low %v429_v49, %v439_v53  ;;  %v476_v31 = vrot.slane %v474_v59, 5  ;;  %v3742_v38 = vrot.slane %v5249_v21, 9  ;;  %v458_v44 = vrot.slane %v457_v16, 4  ;;  %v5496_v53 = vld [vmem:[%s5226_s14 + $0x70] sm:$0xf] }
  0x3d   : > { %4576 = vmatpush3.bf16.msra.mxu0 %v5063_v45  ;;  %v5066_v45 = vld [vmem:[%s6287_s1 + $0x168] sm:$0xff]   ;;  %v447_v62 = vor.u32 %v446_v36, %v443_v39  ;;  %v470_v8 = vrot.slane %v468_v55, 5  ;;  %v1279_v39 = vrot.slane %v5252_v24, 5  ;;  %v480_v36 = vrot.slane %v478_v17, 4 }
  0x3e   : > { %4354 = vmatmul.mubr.bf16.gmra.mrb[8].mxu1 %v5442_v20  ;;  %4577 = vmatprep.subr.bf16.mxu0 %v5065_v63  ;;  %6312 = vst [vmem:[#allocation5_spill] sm:$0xff] %v5471_v61  ;;  %v486_v52 = vrot.slane %v484_v19, 5  ;;  %v1282_v55 = vrot.slane %v5255_v25, 5  ;;  %v463_v59 = vsel %vm5271_vm2, %v458_v44, %v462_v57  ;;  %v498_v19 = vshll.u32 %v5496_v53, 16 }
  0x3f   : > { %4386 = vmatpush3.bf16.msra.mxu1 %v5070_v2  ;;  %4357 = vmatprep.mubr.bf16.mxu1 %v5471_v61  ;;  %v448_v2 = vrot.slane %v447_v62, 4  ;;  %v471_v49 = vor.u32 %v470_v8, %v467_v4  ;;  %v1280_v24 = vsel %vm5478_vm5, %v3742_v38, %v1279_v39  ;;  %v1281_v54 = vrot.slane %v1279_v39, 4  ;;  %v5504_v62 = vld [vmem:[%s5226_s14 + $0x74] sm:$0x1]  ;;  %v5076_v4 = vld [vmem:[%s6287_s1 + $0x38] sm:$0xff]  }
  0x40   : > { %4387 = vmatprep.subr.bf16.mxu1 %v5072_v34  ;;  %4546 = vmatmul.mubr.bf16.gmra.mrb[8].mxu0 %v5471_v61  ;;  %v481_v8 = vor.u32 %v480_v36, %v476_v31  ;;  %v500_v36 = vrot.slane %v498_v19, 5  ;;  %v1300_v20 = vrot.slane %v5329_v30, 5 }
  0x41   : > { %4578 = vmatpush3.bf16.msra.mxu0 %v5065_v63  ;;  %v5068_v63 = vld [vmem:[%s6287_s1 + $0x170] sm:$0xff]   ;;  %v453_v21 = vsel %vm5271_vm2, %v448_v2, %v452_v46  ;;  %v472_v16 = vrot.slane %v471_v49, 4  ;;  %v489_v46 = vshrl.u32 %v5489_v40, 16  ;;  %v1283_v25 = vsel %vm5478_vm5, %v1281_v54, %v1282_v55  ;;  %v5519_v2 = vld [vmem:[%s5226_s14 + $0x78] sm:$0xf] }
  0x42   : > { %4579 = vmatprep.subr.bf16.mxu0 %v5066_v45  ;;  %v5512_v17 = vcombine.low %v453_v21, %v463_v59  ;;  %v482_v38 = vrot.slane %v481_v8, 4  ;;  %v5526_v39 = vcombine.low %v1280_v24, %v1283_v25  ;;  %v502_v21 = vshrl.u32 %v5496_v53, 16  ;;  %v5533_v54 = vld [vmem:[%s5226_s14 + $0x7c] sm:$0xf] }
  0x43   : > { %4388 = vmatpush3.bf16.msra.mxu1 %v5072_v34  ;;  %v492_v34 = vshll.u32 %v5489_v40, 16  ;;  %v477_v57 = vsel %vm5271_vm2, %v472_v16, %v476_v31  ;;  %v491_v44 = vrot.slane %v489_v46, 4  ;;  %v508_v31 = vshll.u32 %v5504_v62, 16  ;;  %v5540_v16 = vld [vmem:[%s5226_s14 + $0x80] sm:$0x1] }
  0x44   : > { %4389 = vmatprep.subr.bf16.mxu1 %v5074_v29  ;;  %6315 = vst [vmem:[#allocation6_spill] sm:$0xff] %v5512_v17  ;;  %4549 = vmatprep.mubr.bf16.mxu0 %v5512_v17  ;;  %v487_v55 = vsel %vm5271_vm2, %v482_v38, %v486_v52  ;;  %v3743_v59 = vrot.slane %v5277_v41, 9  ;;  %v1286_v24 = vrot.slane %v5280_v42, 5  ;;  %v513_v8 = vshrl.u32 %v5519_v2, 16  ;;  %v5548_v52 = vld [vmem:[%s6287_s1 + $0x80] sm:$0xff]  }
  0x45   : > { %4580 = vmatpush3.bf16.msra.mxu0 %v5066_v45  ;;  %v5069_v45 = vld [vmem:[%s6287_s1 + $0x178] sm:$0xff]   ;;  %v494_v49 = vrot.slane %v492_v34, 5  ;;  %v5543_v46 = vcombine.low %v477_v57, %v487_v55  ;;  %v504_v34 = vrot.slane %v502_v21, 4  ;;  %v510_v19 = vrot.slane %v508_v31, 5  ;;  %v5557_v38 = vld [vmem:[%s5226_s14 + $0x84] sm:$0xf] }
  0x46   : > { %4581 = vmatprep.subr.bf16.mxu0 %v5068_v63  ;;  %4358 = vmatmul.mubr.bf16.gmra.mrb[12].mxu1 %v5512_v17  ;;  %v1287_v41 = vsel %vm5478_vm5, %v3743_v59, %v1286_v24  ;;  %v1288_v42 = vrot.slane %v1286_v24, 4  ;;  %v515_v57 = vrot.slane %v513_v8, 4  ;;  %v522_v21 = vshll.u32 %v5533_v54, 16 }
  0x47   : > { %4390 = vmatpush3.bf16.msra.mxu1 %v5074_v29  ;;  %6316 = vst [vmem:[#allocation7_spill] sm:$0xff] %v5543_v46  ;;  %v495_v25 = vor.u32 %v494_v49, %v491_v44  ;;  %v5071_v29 = vld [vmem:[%s6287_s1 + $0x180] sm:$0xff]   ;;  %4361 = vmatprep.mubr.bf16.mxu1 %v5543_v46  ;;  %v505_v49 = vor.u32 %v504_v34, %v500_v36  ;;  %v526_v31 = vshrl.u32 %v5533_v54, 16  ;;  %v532_v24 = vshll.u32 %v5540_v16, 16 }
  0x48   : > { %4391 = vmatprep.subr.bf16.mxu1 %v5076_v4  ;;  %4550 = vmatmul.mubr.bf16.gmra.mrb[12].mxu0 %v5543_v46  ;;  %v1290_v55 = vsel %vm5478_vm5, %v1288_v42, %v1289_v7  ;;  %v3744_v8 = vrot.slane %v5304_v3, 9  ;;  %v524_v46 = vrot.slane %v522_v21, 5  ;;  %v5577_v3 = vld [vmem:[%s5226_s14 + $0x88] sm:$0xf] }
  0x49   : > { %4582 = vmatpush3.bf16.msra.mxu0 %v5068_v63  ;;  %v516_v63 = vshll.u32 %v5519_v2, 16  ;;  %v496_v44 = vrot.slane %v495_v25, 4  ;;  %4585 = vmatprep.mubr.bf16.mxu0 %v5526_v39  ;;  %v506_v34 = vrot.slane %v505_v49, 4  ;;  %v5572_v26 = vcombine.low %v1287_v41, %v1290_v55 }
  0x4a   : > { %4583 = vmatprep.subr.bf16.mxu0 %v5069_v45  ;;  %v528_v7 = vrot.slane %v526_v31, 4  ;;  %v534_v42 = vrot.slane %v532_v24, 5  ;;  %v537_v41 = vshrl.u32 %v5557_v38, 16  ;;  %v5073_v31 = vld [vmem:[%s6287_s1 + $0x188] sm:$0xff]   ;;  %v5596_v24 = vld [vmem:[%s5226_s14 + $0x90] sm:$0xf] }
  0x4b   : > { %v518_v59 = vrot.slane %v516_v63, 5  ;;  %4392 = vmatpush3.bf16.msra.mxu1 %v5076_v4  ;;  %v501_v25 = vsel %vm5271_vm2, %v496_v44, %v500_v36  ;;  %v1293_v63 = vrot.slane %v5312_v9, 5  ;;  %v511_v4 = vsel %vm5271_vm2, %v506_v34, %v510_v19  ;;  %v5583_v36 = vld [vmem:[%s5226_s14 + $0x8c] sm:$0x1]  ;;  %v5599_v34 = vld [vmem:[%s5226_s14 + $0x94] sm:$0xf] }
  0x4c   : > { %4425 = vmatprep.subr.bf16.mxu1 %v5548_v52  ;;  %v540_v44 = vshll.u32 %v5557_v38, 16  ;;  %v529_v21 = vor.u32 %v528_v7, %v524_v46  ;;  %v539_v55 = vrot.slane %v537_v41, 4  ;;  %v556_v7 = vshll.u32 %v5583_v36, 16 }
  0x4d   : > { %4584 = vmatpush3.bf16.msra.mxu0 %v5069_v45  ;;  %v519_v48 = vor.u32 %v518_v59, %v515_v57  ;;  %v1296_v45 = vrot.slane %v5319_v14, 5  ;;  %v5587_v57 = vcombine.low %v501_v25, %v511_v4  ;;  %v1294_v9 = vsel %vm5478_vm5, %v3744_v8, %v1293_v63 }
  0x4e   : > { %4617 = vmatprep.subr.bf16.mxu0 %v5071_v29  ;;  %v1295_v19 = vrot.slane %v1293_v63, 4  ;;  %v542_v14 = vrot.slane %v540_v44, 5  ;;  %v546_v59 = vshll.u32 %v5577_v3, 16  ;;  %v550_v8 = vshrl.u32 %v5577_v3, 16 }
  0x4f   : > { %6317 = vst [vmem:[#allocation8_spill] sm:$0xff] %v5587_v57  ;;  %v520_v49 = vrot.slane %v519_v48, 4  ;;  %4362 = vmatmul.mubr.bf16.gmra.mrb[16].mxu1 %v5587_v57  ;;  %v530_v48 = vrot.slane %v529_v21, 4  ;;  %v3745_v44 = vrot.slane %v5324_v22, 9  ;;  %v558_v21 = vrot.slane %v556_v7, 5  ;;  %v5075_v22 = vld [vmem:[%s6287_s1 + $0x190] sm:$0xff]  }
  0x50   : > { %4586 = vmatmul.mubr.bf16.vlgmr.msra.gmra.mrb[0].mxu0 %v5572_v26  ;;  %v1297_v63 = vsel %vm5478_vm5, %v1295_v19, %v1296_v45  ;;  %v543_v4 = vor.u32 %v542_v14, %v539_v55  ;;  %v548_v41 = vrot.slane %v546_v59, 5  ;;  %v1303_v45 = vrot.slane %v5338_v35, 5  ;;  %v5635_v59 = vld [vmem:[%s5226_s14 + $0x9c] sm:$0xf] }
  0x51   : > { %v525_v25 = vsel %vm5271_vm2, %v520_v49, %v524_v46  ;;  %4618 = vmatpush3.bf16.msra.mxu0 %v5071_v29  ;;  %v535_v57 = vsel %vm5271_vm2, %v530_v48, %v534_v42  ;;  %v5612_v46 = vcombine.low %v1294_v9, %v1297_v63  ;;  %v552_v49 = vrot.slane %v550_v8, 4  ;;  %v5623_v42 = vld [vmem:[%s5226_s14 + $0x98] sm:$0x1]  ;;  %v5638_v63 = vld [vmem:[%s5226_s14 + $0xa0] sm:$0xf] }
  0x52   : > { %v5614_v17 = vcombine.low %v525_v25, %v535_v57  ;;  %v544_v61 = vrot.slane %v543_v4, 4  ;;  %4619 = vmatprep.subr.bf16.mxu0 %v5073_v31  ;;  %v561_v57 = vshrl.u32 %v5596_v24, 16  ;;  %v564_v9 = vshll.u32 %v5596_v24, 16 }
  0x53   : > { %4589 = vmatprep.mubr.bf16.mxu0 %v5612_v46  ;;  %v553_v29 = vor.u32 %v552_v49, %v548_v41  ;;  %v570_v19 = vshll.u32 %v5599_v34, 16  ;;  %v1301_v35 = vsel %vm5478_vm5, %v3745_v44, %v1300_v20  ;;  %v1302_v55 = vrot.slane %v1300_v20, 4  ;;  %v5645_v20 = vld [vmem:[%s5226_s14 + $0xa4] sm:$0x1] }
  0x54   : > { %6318 = vst [vmem:[#allocation9_spill] sm:$0xff] %v5614_v17  ;;  %4365 = vmatprep.mubr.bf16.mxu1 %v5614_v17  ;;  %v549_v30 = vsel %vm5271_vm2, %v544_v61, %v548_v41  ;;  %v574_v14 = vshrl.u32 %v5599_v34, 16  ;;  %v563_v48 = vrot.slane %v561_v57, 4  ;;  %v566_v8 = vrot.slane %v564_v9, 5 }
  0x55   : > { %v554_v25 = vrot.slane %v553_v29, 4  ;;  %4620 = vmatpush3.bf16.msra.mxu0 %v5073_v31  ;;  %v572_v7 = vrot.slane %v570_v19, 5  ;;  %v1304_v4 = vsel %vm5478_vm5, %v1302_v55, %v1303_v45  ;;  %v580_v61 = vshll.u32 %v5623_v42, 16  ;;  %v5077_v45 = vld [vmem:[%s6287_s1 + $0x198] sm:$0xff]  }
  0x56   : > { %v576_v49 = vrot.slane %v574_v14, 4  ;;  %v3746_v41 = vrot.slane %v5353_v58, 9  ;;  %4621 = vmatprep.subr.bf16.mxu0 %v5075_v22  ;;  %v5649_v44 = vcombine.low %v1301_v35, %v1304_v4  ;;  %v567_v29 = vor.u32 %v566_v8, %v563_v48 }
  0x57   : > { %v559_v31 = vsel %vm5271_vm2, %v554_v25, %v558_v21  ;;  %v1307_v57 = vrot.slane %v5367_v0, 5  ;;  %v582_v58 = vrot.slane %v580_v61, 5  ;;  %v1310_v55 = vrot.slane %v5370_v1, 5  ;;  %v5663_v25 = vld [vmem:[%s5226_s14 + $0xa8] sm:$0xf] }
  0x58   : > { %v5655_v9 = vcombine.low %v549_v30, %v559_v31  ;;  %v577_v19 = vor.u32 %v576_v49, %v572_v7  ;;  %4590 = vmatmul.mubr.bf16.gmra.mrb[4].mxu0 %v5649_v44  ;;  %v568_v14 = vrot.slane %v567_v29, 4  ;;  %v585_v0 = vshrl.u32 %v5635_v59, 16  ;;  %v5081_v30 = vld [vmem:[%s6287_s1 + $0x1a0] sm:$0xff]   ;;  %v5673_v49 = vld [vmem:[%s5226_s14 + $0xac] sm:$0xf] }
  0x59   : > { %v1308_v21 = vsel %vm5478_vm5, %v3746_v41, %v1307_v57  ;;  %v1309_v35 = vrot.slane %v1307_v57, 4  ;;  %v588_v1 = vshll.u32 %v5635_v59, 16  ;;  %v594_v8 = vshll.u32 %v5638_v63, 16  ;;  %4622 = vmatpush3.bf16.msra.mxu0 %v5075_v22 }
  0x5a   : > { %6319 = vst [vmem:[#allocation10_spill] sm:$0xff] %v5655_v9  ;;  %4366 = vmatmul.mubr.bf16.gmra.mrb[20].mxu1 %v5655_v9  ;;  %v578_v48 = vrot.slane %v577_v19, 4  ;;  %v598_v4 = vshrl.u32 %v5638_v63, 16  ;;  %v573_v61 = vsel %vm5271_vm2, %v568_v14, %v572_v7  ;;  %v587_v31 = vrot.slane %v585_v0, 4  ;;  %4623 = vmatprep.subr.bf16.mxu0 %v5077_v45  ;;  %v5688_v14 = vld [vmem:[%s5226_s14 + $0xb0] sm:$0x1] }
  0x5b   : > { %v1311_v41 = vsel %vm5478_vm5, %v1309_v35, %v1310_v55  ;;  %v604_v29 = vshll.u32 %v5645_v20, 16  ;;  %v590_v9 = vrot.slane %v588_v1, 5  ;;  %v596_v17 = vrot.slane %v594_v8, 5 }
  0x5c   : > { %v583_v57 = vsel %vm5271_vm2, %v578_v48, %v582_v58  ;;  %v5682_v19 = vcombine.low %v1308_v21, %v1311_v41  ;;  %v600_v56 = vrot.slane %v598_v4, 4  ;;  %v3747_v7 = vrot.slane %v5384_v27, 9 }
  0x5d   : > { %v5684_v22 = vcombine.low %v573_v61, %v583_v57  ;;  %v606_v18 = vrot.slane %v604_v29, 5  ;;  %v591_v55 = vor.u32 %v590_v9, %v587_v31  ;;  %v1314_v35 = vrot.slane %v5387_v28, 5  ;;  %4624 = vmatpush3.bf16.msra.mxu0 %v5077_v45  ;;  %v5085_v28 = vld [vmem:[%s6287_s1 + $0x1a8] sm:$0xff]  }
  0x5e   : > { %4593 = vmatprep.mubr.bf16.mxu0 %v5682_v19  ;;  %v1317_v0 = vrot.slane %v5393_v33, 5  ;;  %v609_v58 = vshrl.u32 %v5663_v25, 16  ;;  %v601_v21 = vor.u32 %v600_v56, %v596_v17  ;;  %v612_v48 = vshll.u32 %v5663_v25, 16  ;;  %4625 = vmatprep.subr.bf16.mxu0 %v5081_v30 }
  0x5f   : > { %6320 = vst [vmem:[#allocation11_spill] sm:$0xff] %v5684_v22  ;;  %4369 = vmatprep.mubr.bf16.mxu1 %v5684_v22  ;;  %v618_v1 = vshll.u32 %v5673_v49, 16  ;;  %v622_v27 = vshrl.u32 %v5673_v49, 16  ;;  %v592_v9 = vrot.slane %v591_v55, 4  ;;  %v1315_v33 = vsel %vm5478_vm5, %v3747_v7, %v1314_v35  ;;  %v5710_v22 = vld [vmem:[%s5226_s14 + $0xb4] sm:$0xf] }
  0x60   : > { %v1316_v45 = vrot.slane %v1314_v35, 4  ;;  %v611_v8 = vrot.slane %v609_v58, 4  ;;  %v602_v56 = vrot.slane %v601_v21, 4  ;;  %v614_v4 = vrot.slane %v612_v48, 5  ;;  %v5717_v48 = vld [vmem:[%s5226_s14 + $0xb8] sm:$0xf] }
  0x61   : > { %v620_v61 = vrot.slane %v618_v1, 5  ;;  %v624_v41 = vrot.slane %v622_v27, 4  ;;  %v597_v31 = vsel %vm5271_vm2, %v592_v9, %v596_v17  ;;  %v628_v57 = vshll.u32 %v5688_v14, 16  ;;  %4626 = vmatpush3.bf16.msra.mxu0 %v5081_v30  ;;  %v5089_v17 = vld [vmem:[%s6287_s1 + $0x1b0] sm:$0xff]   ;;  %v5727_v27 = vld [vmem:[%s5226_s14 + $0xbc] sm:$0x1] }
  0x62   : > { %v1318_v29 = vsel %vm5478_vm5, %v1316_v45, %v1317_v0  ;;  %v3748_v55 = vrot.slane %v5421_v5, 9  ;;  %v607_v7 = vsel %vm5271_vm2, %v602_v56, %v606_v18  ;;  %v615_v58 = vor.u32 %v614_v4, %v611_v8  ;;  %4627 = vmatprep.subr.bf16.mxu0 %v5085_v28  ;;  %v5093_v4 = vld [vmem:[%s6287_s1 + $0x1b8] sm:$0xff]  }
  0x63   : > { %v5714_v35 = vcombine.low %v1315_v33, %v1318_v29  ;;  %v625_v21 = vor.u32 %v624_v41, %v620_v61  ;;  %v5722_v0 = vcombine.low %v597_v31, %v607_v7  ;;  %v630_v5 = vrot.slane %v628_v57, 5 }
  0x64   : > { %v1321_v1 = vrot.slane %v5424_v6, 5  ;;  %v1324_v30 = vrot.slane %v5427_v10, 5  ;;  %v616_v18 = vrot.slane %v615_v58, 4  ;;  %v633_v33 = vshrl.u32 %v5710_v22, 16 }
  0x65   : > { %6321 = vst [vmem:[#allocation12_spill] sm:$0xff] %v5722_v0  ;;  %4594 = vmatmul.mubr.bf16.gmra.mrb[8].mxu0 %v5714_v35  ;;  %v626_v9 = vrot.slane %v625_v21, 4  ;;  %v636_v45 = vshll.u32 %v5710_v22, 16  ;;  %4370 = vmatmul.mubr.bf16.gmra.mrb[24].mxu1 %v5722_v0  ;;  %v642_v6 = vshll.u32 %v5717_v48, 16  ;;  %v646_v10 = vshrl.u32 %v5717_v48, 16 }
  0x66   : > { %v1322_v8 = vsel %vm5478_vm5, %v3748_v55, %v1321_v1  ;;  %v1323_v56 = vrot.slane %v1321_v1, 4  ;;  %4628 = vmatpush3.bf16.msra.mxu0 %v5085_v28  ;;  %v621_v41 = vsel %vm5271_vm2, %v616_v18, %v620_v61  ;;  %v635_v29 = vrot.slane %v633_v33, 4 }
  0x67   : > { %v631_v31 = vsel %vm5271_vm2, %v626_v9, %v630_v5  ;;  %v638_v57 = vrot.slane %v636_v45, 5  ;;  %4629 = vmatprep.subr.bf16.mxu0 %v5089_v17  ;;  %v644_v58 = vrot.slane %v642_v6, 5  ;;  %v648_v28 = vrot.slane %v646_v10, 4 }
  0x68   : > { %v5744_v55 = vcombine.low %v621_v41, %v631_v31  ;;  %v1325_v7 = vsel %vm5478_vm5, %v1323_v56, %v1324_v30  ;;  %v652_v0 = vshll.u32 %v5727_v27, 16  ;;  %v3749_v61 = vrot.slane %v5447_v32, 9  ;;  %v5759_v30 = vld [vmem:[%s6287_s1 + $0x1c0] sm:$0xff]  }
  0x69   : > { %v5748_v21 = vcombine.low %v1322_v8, %v1325_v7  ;;  %v639_v1 = vor.u32 %v638_v57, %v635_v29  ;;  %v649_v5 = vor.u32 %v648_v28, %v644_v58  ;;  %v1328_v18 = vrot.slane %v5455_v47, 5 }
  0x6a   : > { %4373 = vmatprep.mubr.bf16.mxu1 %v5744_v55  ;;  %v1331_v9 = vrot.slane %v5461_v50, 5  ;;  %v3750_v33 = vrot.slane %v5489_v40, 9  ;;  %4630 = vmatpush3.bf16.msra.mxu0 %v5089_v17  ;;  %v654_v8 = vrot.slane %v652_v0, 5  ;;  %v1335_v56 = vrot.slane %v5496_v53, 5 }
  0x6b   : > { %4597 = vmatprep.mubr.bf16.mxu0 %v5748_v21  ;;  %v640_v45 = vrot.slane %v639_v1, 4  ;;  %v1338_v6 = vrot.slane %v5504_v62, 5  ;;  %4631 = vmatprep.subr.bf16.mxu0 %v5093_v4  ;;  %v650_v10 = vrot.slane %v649_v5, 4  ;;  %v1329_v50 = vsel %vm5478_vm5, %v3749_v61, %v1328_v18 }
  0x6c   : > { %v1330_v41 = vrot.slane %v1328_v18, 4  ;;  %v3751_v17 = vrot.slane %v5519_v2, 9  ;;  %v1336_v29 = vsel %vm5478_vm5, %v3750_v33, %v1335_v56  ;;  %v1337_v57 = vrot.slane %v1335_v56, 4 }
  0x6d   : > { %v645_v31 = vsel %vm5271_vm2, %v640_v45, %v644_v58  ;;  %v1342_v0 = vrot.slane %v5533_v54, 5  ;;  %v655_v62 = vsel %vm5271_vm2, %v650_v10, %v654_v8  ;;  %v1345_v28 = vrot.slane %v5540_v16, 5 }
  0x6e   : > { %v1332_v7 = vsel %vm5478_vm5, %v1330_v41, %v1331_v9  ;;  %v3752_v1 = vrot.slane %v5557_v38, 9  ;;  %4632 = vmatpush3.bf16.msra.mxu0 %v5093_v4  ;;  %v5778_v61 = vcombine.low %v645_v31, %v655_v62  ;;  %v1339_v5 = vsel %vm5478_vm5, %v1337_v57, %v1338_v6  ;;  %v5084_v57 = vld [vmem:[%s6287_s1 + $0x88] sm:$0xff]  }
  0x6f   : > { %v5780_v58 = vcombine.low %v1329_v50, %v1332_v7  ;;  %4665 = vmatprep.subr.bf16.mxu0 %v5759_v30  ;;  %v5785_v18 = vcombine.low %v1336_v29, %v1339_v5  ;;  %v1344_v33 = vrot.slane %v1342_v0, 4  ;;  %v1349_v45 = vrot.slane %v5577_v3, 5 }
  0x70   : > { %v1352_v9 = vrot.slane %v5583_v36, 5  ;;  %4374 = vmatmul.mubr.bf16.gmra.mrb[28].mxu1 %v5778_v61  ;;  %v6322_v16 = vcombine.low %v5235_v12, %v5238_v13  ;;  %v1343_v4 = vsel %vm5478_vm5, %v3751_v17, %v1342_v0  ;;  %v1356_v6 = vrot.slane %v5599_v34, 5 }
  0x71   : > { %4598 = vmatmul.mubr.bf16.gmra.mrb[12].mxu0 %v5780_v58  ;;  %v1346_v8 = vsel %vm5478_vm5, %v1344_v33, %v1345_v28  ;;  %v1351_v56 = vrot.slane %v1349_v45, 4  ;;  %v1363_v36 = vrot.slane %v5638_v63, 5  ;;  %v1350_v10 = vsel %vm5478_vm5, %v3752_v1, %v1349_v45 }
  0x72   : > { %4393 = vmatprep.mubr.bf16.mxu1 %v6322_v16  ;;  %4601 = vmatprep.mubr.bf16.mxu0 %v5785_v18  ;;  %v5805_v13 = vcombine.low %v1343_v4, %v1346_v8  ;;  %v3753_v50 = vrot.slane %v5596_v24, 9  ;;  %v1359_v41 = vrot.slane %v5623_v42, 5  ;;  %v1358_v17 = vrot.slane %v1356_v6, 4 }
  0x73   : > { %v1353_v12 = vsel %vm5478_vm5, %v1351_v56, %v1352_v9  ;;  %v3754_v31 = vrot.slane %v5635_v59, 9  ;;  %v1365_v0 = vrot.slane %v1363_v36, 4  ;;  %v1366_v62 = vrot.slane %v5645_v20, 5 }
  0x74   : > { %v5810_v29 = vcombine.low %v1350_v10, %v1353_v12  ;;  %v1357_v7 = vsel %vm5478_vm5, %v3753_v50, %v1356_v6  ;;  %v1370_v42 = vrot.slane %v5673_v49, 5  ;;  %v5823_v28 = vcombine.low %v5447_v32, %v5455_v47  ;;  %v5088_v47 = vld [vmem:[%s6287_s1 + $0x90] sm:$0xff]   ;;  %v249_v6 = vld [vmem:[%s5226_s14 + $0xc8] sm:$0x1]  ;;  %v5133_v10 = vld [vmem:[%s5226_s14 + $0x40] sm:$0xf] }
  0x75   : > { %v1360_v20 = vsel %vm5478_vm5, %v1358_v17, %v1359_v41  ;;  %v1364_v1 = vsel %vm5478_vm5, %v3754_v31, %v1363_v36  ;;  %v3755_v5 = vrot.slane %v5663_v25, 9  ;;  %v5834_v33 = vcombine.low %v5489_v40, %v5496_v53  ;;  %v5132_v36 = vld [vmem:[%s5226_s14 + $0x3c] sm:$0xf]  ;;  %v5134_v41 = vld [vmem:[%s5226_s14 + $0x48] sm:$0xf] }
  0x76   : > { %v1367_v32 = vsel %vm5478_vm5, %v1365_v0, %v1366_v62  ;;  %v5845_v45 = vcombine.low %v5519_v2, %v5533_v54  ;;  %v5849_v40 = vcombine.low %v5557_v38, %v5577_v3  ;;  %v5853_v53 = vcombine.low %v5596_v24, %v5599_v34  ;;  %v5873_v24 = vld [vmem:[%s5226_s14 + $0xc4] sm:$0xf]  ;;  %v5135_v17 = vld [vmem:[%s5226_s14 + $0x4c] sm:$0xf] }
  0x77   : > { %v5857_v9 = vcombine.low %v5635_v59, %v5638_v63  ;;  %v5861_v16 = vcombine.low %v5663_v25, %v5673_v49  ;;  %v5863_v4 = vcombine.low %v1357_v7, %v1360_v20  ;;  %v1372_v2 = vrot.slane %v1370_v42, 4  ;;  %v5092_v25 = vld [vmem:[%s6287_s1 + $0x98] sm:$0xff]  }
  0x78   : > { %4394 = vmatmul.mubr.bf16.vlgmr.msra.gmra.mrb[0].mxu1 %v5284_v43  ;;  %v1373_v54 = vrot.slane %v5688_v14, 5  ;;  %v5868_v38 = vcombine.low %v5710_v22, %v5717_v48  ;;  %v5870_v3 = vcombine.low %v1364_v1, %v1367_v32  ;;  %v3756_v34 = vrot.slane %v5710_v22, 9  ;;  %v5887_v14 = vld [vmem:[%s5226_s14 + $0xc0] sm:$0xf] }
  0x79   : > { %4602 = vmatmul.mubr.bf16.gmra.mrb[16].mxu0 %v5805_v13  ;;  %4426 = vmatpush3.bf16.msra.mxu1 %v5548_v52  ;;  %v1377_v52 = vrot.slane %v5717_v48, 5  ;;  %v1380_v63 = vrot.slane %v5727_v27, 5  ;;  %v1371_v49 = vsel %vm5478_vm5, %v3755_v5, %v1370_v42  ;;  %v2257_v48 = vrot.slane %v5873_v24, 5  ;;  %v5096_v27 = vld [vmem:[%s6287_s1 + $0xa0] sm:$0xff]  }
  0x7a   : > { %4397 = vmatprep.mubr.bf16.mxu1 %v5360_v60  ;;  %4605 = vmatprep.mubr.bf16.mxu0 %v5810_v29  ;;  %v1374_v22 = vsel %vm5478_vm5, %v1372_v2, %v1373_v54  ;;  %v5902_v12 = vcombine.low %v5132_v36, %v5133_v10  ;;  %v5908_v31 = vcombine.low %v5134_v41, %v5135_v17  ;;  %v1972_v0 = vshll.u32 %v5887_v14, 16  ;;  %v5100_v54 = vld [vmem:[%s6287_s1 + $0xa8] sm:$0xff]   ;;  %v5104_v36 = vld [vmem:[%s6287_s1 + $0xb0] sm:$0xff]   ;;  %v5137_v10 = vld [vmem:[%s5226_s14 + $0x58] sm:$0xf] }
  0x7b   : > { %4427 = vmatprep.subr.bf16.mxu1 %v5084_v57  ;;  %v1379_v59 = vrot.slane %v1377_v52, 4  ;;  %v1378_v8 = vsel %vm5478_vm5, %v3756_v34, %v1377_v52  ;;  %v5904_v50 = vcombine.low %v1371_v49, %v1374_v22  ;;  %v1978_v62 = vshll.u32 %v5873_v24, 16 }
  0x7c   : > { %v1982_v7 = vshrl.u32 %v5873_v24, 16  ;;  %v3847_v20 = vrot.slane %v5887_v14, 9  ;;  %v2259_v1 = vrot.slane %v2257_v48, 4  ;;  %v2260_v5 = vrot.slane %v249_v6, 5 }
  0x7d   : > { %4428 = vmatpush3.bf16.msra.mxu1 %v5084_v57  ;;  %v1381_v56 = vsel %vm5478_vm5, %v1379_v59, %v1380_v63  ;;  %v1969_v57 = vshrl.u32 %v5887_v14, 16  ;;  %v1980_v52 = vrot.slane %v1978_v62, 5  ;;  %v1988_v63 = vshll.u32 %v249_v6, 16  ;;  %v5136_v6 = vld [vmem:[%s5226_s14 + $0x54] sm:$0xf]  ;;  %v5110_v62 = vld [vmem:[%s6287_s1 + $0xc0] sm:$0xff]  }
  0x7e   : > { %4429 = vmatprep.subr.bf16.mxu1 %v5088_v47  ;;  %v5914_v42 = vcombine.low %v1378_v8, %v1381_v56  ;;  %v1984_v2 = vrot.slane %v1982_v7, 4  ;;  %v2261_v49 = vsel %vm5478_vm5, %v2259_v1, %v2260_v5  ;;  %v5933_v41 = vcombine.low %v5136_v6, %v5137_v10  ;;  %v5101_v7 = vld [vmem:[%s6287_s1 + $0x1c8] sm:$0xff]   ;;  %v5109_v1 = vld [vmem:[%s6287_s1 + $0x1d8] sm:$0xff]   ;;  %v5114_v6 = vld [vmem:[%s6287_s1 + $0xd0] sm:$0xff]  }
  0x7f   : > { %v1971_v32 = vrot.slane %v1969_v57, 4  ;;  %v1990_v56 = vrot.slane %v1988_v63, 5  ;;  %v5117_v10 = vld [vmem:[%s6287_s1 + $0xd8] sm:$0xff]  }
  0x80   : > { %4398 = vmatmul.mubr.bf16.gmra.mrb[4].mxu1 %v5431_v11  ;;  %v1985_v59 = vor.u32 %v1984_v2, %v1980_v52  ;;  %v5140_v2 = vld [vmem:[%s5226_s14] sm:$0xf] }
  0x81   : > { %4606 = vmatmul.mubr.bf16.gmra.mrb[20].mxu0 %v5863_v4  ;;  %4401 = vmatprep.mubr.bf16.mxu1 %v5435_v15 }
  0x82   : > { %4609 = vmatprep.mubr.bf16.mxu0 %v5870_v3  ;;  %4430 = vmatpush3.bf16.msra.mxu1 %v5088_v47  ;;  %v1974_v47 = vrot.slane %v1972_v0, 5  ;;  %v1986_v8 = vrot.slane %v1985_v59, 4  ;;  %v5108_v0 = vld [vmem:[%s6287_s1 + $0xb8] sm:$0xff]   ;;  %v5113_v59 = vld [vmem:[%s6287_s1 + $0x1e8] sm:$0xff]  }
  0x83   : > { %4431 = vmatprep.subr.bf16.mxu1 %v5092_v25 }
  0x84   : > { %v1975_v34 = vor.u32 %v1974_v47, %v1971_v32  ;;  %v5111_v32 = vld [vmem:[%s6287_s1 + $0x1e0] sm:$0xff]   ;;  %v5139_v47 = vld [vmem:[%s5226_s14 + $0x8] sm:$0x1] }
  0x86   : > { %4432 = vmatpush3.bf16.msra.mxu1 %v5092_v25  ;;  %v2258_v25 = vsel %vm5478_vm5, %v3847_v20, %v2257_v48  ;;  %v1976_v22 = vrot.slane %v1975_v34, 4  ;;  %v5105_v20 = vld [vmem:[%s6287_s1 + $0x1d0] sm:$0xff]  }
  0x87   : > { %4433 = vmatprep.subr.bf16.mxu1 %v5096_v27  ;;  %v5935_v17 = vcombine.low %v2258_v25, %v2261_v49  ;;  %v5115_v49 = vld [vmem:[%s6287_s1 + $0x1f0] sm:$0xff]  }
  0x88   : > { %4402 = vmatmul.mubr.bf16.gmra.mrb[8].mxu1 %v5902_v12  ;;  %v1981_v48 = vsel %vm5271_vm2, %v1976_v22, %v1980_v52  ;;  %v1275_v52 = vrot.slane %v5139_v47, 5  ;;  %v6325_v47 = vld [vmem:[#allocation4_spill] sm:$0xff] }
  0x89   : > { %4610 = vmatmul.mubr.bf16.gmra.mrb[24].mxu0 %v5904_v50  ;;  %4405 = vmatprep.mubr.bf16.mxu1 %v5908_v31 }
  0x8a   : > { %4613 = vmatprep.mubr.bf16.mxu0 %v5914_v42  ;;  %4434 = vmatpush3.bf16.msra.mxu1 %v5096_v27  ;;  %v1991_v27 = vsel %vm5271_vm2, %v1986_v8, %v1990_v56  ;;  %v5119_v8 = vld [vmem:[%s6287_s1 + $0x1f8] sm:$0xff]   ;;  %v5121_v56 = vld [vmem:[%s6287_s1 + $0x200] sm:$0xff]  }
  0x8b   : > { %4435 = vmatprep.subr.bf16.mxu1 %v5100_v54  ;;  %v5941_v57 = vcombine.low %v1981_v48, %v1991_v27  ;;  %v6022_v48 = vcombine.low %v5887_v14, %v5873_v24  ;;  %v5122_v27 = vld [vmem:[%s6287_s1 + $0xe8] sm:$0xff]   ;;  %v5124_v24 = vld [vmem:[%s6287_s1 + $0xf0] sm:$0xff]  }
  0x8e   : > { %4436 = vmatpush3.bf16.msra.mxu1 %v5100_v54  ;;  %v3741_v54 = vrot.slane %v5140_v2, 9  ;;  %v5128_v2 = vld [vmem:[%s6287_s1 + $0x220] sm:$0xff]  }
  0x8f   : > { %4437 = vmatprep.subr.bf16.mxu1 %v5104_v36 }
  0x90   : > { %4406 = vmatmul.mubr.bf16.gmra.mrb[12].mxu1 %v5933_v41 }
  0x91   : > { %4614 = vmatmul.mubr.bf16.gmra.mrb[28].mxu0 %v5935_v17  ;;  %4409 = vmatprep.mubr.bf16.mxu1 %v5823_v28 }
  0x92   : > { %4633 = vmatprep.mubr.bf16.mxu0 %v5360_v60  ;;  %4438 = vmatpush3.bf16.msra.mxu1 %v5104_v36  ;;  %v5112_v36 = vld [vmem:[%s6287_s1 + $0xc8] sm:$0xff]  }
  0x93   : > { %4439 = vmatprep.subr.bf16.mxu1 %v5108_v0 }
  0x96   : > { %4440 = vmatpush3.bf16.msra.mxu1 %v5108_v0  ;;  %v6032_v0 = vld [vmem:[%s5226_s14 + $0xcc] sm:$0xf] }
  0x97   : > { %4473 = vmatprep.subr.bf16.mxu1 %v5110_v62 }
  0x98   : > { %4410 = vmatmul.mubr.bf16.gmra.mrb[16].mxu1 %v5834_v33 }
  0x99   : > { %4634 = vmatmul.mubr.bf16.vlgmr.msra.gmra.mrb[0].mxu0 %v5431_v11  ;;  %4413 = vmatprep.mubr.bf16.mxu1 %v5845_v45 }
  0x9a   : > { %4666 = vmatpush3.bf16.msra.mxu0 %v5759_v30  ;;  %4637 = vmatprep.mubr.bf16.mxu0 %v5435_v15  ;;  %v5138_v30 = vld [vmem:[%s5226_s14 + $0x4] sm:$0xf] }
  0x9b   : > { %4667 = vmatprep.subr.bf16.mxu0 %v5101_v7  ;;  %v1272_v5 = vrot.slane %v5138_v30, 5  ;;  %v6323_v30 = vld [vmem:[#allocation2_spill] sm:$0xff] }
  0x9d   : > { %v1274_v34 = vrot.slane %v1272_v5, 4  ;;  %v1273_v63 = vsel %vm5478_vm5, %v3741_v54, %v1272_v5  ;;  %v5125_v5 = vld [vmem:[%s6287_s1 + $0x210] sm:$0xff]   ;;  %v5129_v54 = vld [vmem:[%s6287_s1 + $0x228] sm:$0xff]  }
  0x9e   : > { %4668 = vmatpush3.bf16.msra.mxu0 %v5101_v7  ;;  %v5126_v7 = vld [vmem:[%s6287_s1 + $0xf8] sm:$0xff]  }
  0x9f   : > { %4669 = vmatprep.subr.bf16.mxu0 %v5105_v20  ;;  %v1276_v25 = vsel %vm5478_vm5, %v1274_v34, %v1275_v52  ;;  %v6326_v52 = vld [vmem:[#allocation5_spill] sm:$0xff]  ;;  %v6327_v34 = vld [vmem:[#allocation6_spill] sm:$0xff] }
  0xa0   : > { %4414 = vmatmul.mubr.bf16.gmra.mrb[20].mxu1 %v5849_v40  ;;  %v3773_v22 = vcombine.low %v1273_v63, %v1276_v25  ;;  %v5130_v63 = vld [vmem:[%s6287_s1 + $0x230] sm:$0xff]   ;;  %v5131_v25 = vld [vmem:[%s6287_s1 + $0x238] sm:$0xff]  }
  0xa1   : > { %4638 = vmatmul.mubr.bf16.gmra.mrb[4].mxu0 %v5902_v12  ;;  %4417 = vmatprep.mubr.bf16.mxu1 %v5853_v53 }
  0xa2   : > { %4641 = vmatprep.mubr.bf16.mxu0 %v5908_v31  ;;  %4670 = vmatpush3.bf16.msra.mxu0 %v5105_v20  ;;  %v5123_v20 = vld [vmem:[%s6287_s1 + $0x208] sm:$0xff]  }
  0xa3   : > { %4671 = vmatprep.subr.bf16.mxu0 %v5109_v1 }
  0xa6   : > { %4672 = vmatpush3.bf16.msra.mxu0 %v5109_v1  ;;  %v5141_v1 = vld [vmem:[%s6287_s1 + $0x100] sm:$0xff]  }
  0xa7   : > { %4673 = vmatprep.subr.bf16.mxu0 %v5111_v32 }
  0xa8   : > { %4418 = vmatmul.mubr.bf16.gmra.mrb[24].mxu1 %v5857_v9 }
  0xa9   : > { %4642 = vmatmul.mubr.bf16.gmra.mrb[8].mxu0 %v5933_v41  ;;  %4421 = vmatprep.mubr.bf16.mxu1 %v5861_v16 }
  0xaa   : > { %4645 = vmatprep.mubr.bf16.mxu0 %v5823_v28  ;;  %4674 = vmatpush3.bf16.msra.mxu0 %v5111_v32  ;;  %v5127_v32 = vld [vmem:[%s6287_s1 + $0x218] sm:$0xff]  }
  0xab   : > { %4675 = vmatprep.subr.bf16.mxu0 %v5113_v59 }
  0xae   : > { %4676 = vmatpush3.bf16.msra.mxu0 %v5113_v59  ;;  %v6328_v59 = vld [vmem:[#allocation7_spill] sm:$0xff] }
  0xaf   : > { %4677 = vmatprep.subr.bf16.mxu0 %v5115_v49 }
  0xb0   : > { %4422 = vmatmul.mubr.bf16.gmra.mrb[28].mxu1 %v5868_v38 }
  0xb1   : > { %4646 = vmatmul.mubr.bf16.gmra.mrb[12].mxu0 %v5834_v33  ;;  %4441 = vmatprep.mubr.bf16.mxu1 %v3773_v22  ;;  %v6330_v22 = vld [vmem:[#allocation9_spill] sm:$0xff] }
  0xb2   : > { %4649 = vmatprep.mubr.bf16.mxu0 %v5845_v45  ;;  %4678 = vmatpush3.bf16.msra.mxu0 %v5115_v49  ;;  %v6329_v49 = vld [vmem:[#allocation8_spill] sm:$0xff] }
  0xb3   : > { %4679 = vmatprep.subr.bf16.mxu0 %v5119_v8 }
  0xb6   : > { %4680 = vmatpush3.bf16.msra.mxu0 %v5119_v8  ;;  %v6331_v8 = vld [vmem:[#allocation10_spill] sm:$0xff] }
  0xb7   : > { %4713 = vmatprep.subr.bf16.mxu0 %v5121_v56 }
  0xb8   : > { %4442 = vmatmul.mubr.bf16.vlgmr.msra.gmra.mrb[0].mxu1 %v5526_v39  ;;  %v5120_v39 = vld [vmem:[%s6287_s1 + $0xe0] sm:$0xff]  }
  0xb9   : > { %4650 = vmatmul.mubr.bf16.gmra.mrb[16].mxu0 %v5849_v40  ;;  %4474 = vmatpush3.bf16.msra.mxu1 %v5110_v62  ;;  %v6035_v62 = vld [vmem:[%s5226_s14 + $0xd0] sm:$0xf] }
  0xba   : > { %4445 = vmatprep.mubr.bf16.mxu1 %v5572_v26  ;;  %4653 = vmatprep.mubr.bf16.mxu0 %v5853_v53  ;;  %v3889_v14 = vcombine.low %v6032_v0, %v6035_v62 }
  0xbb   : > { %4475 = vmatprep.subr.bf16.mxu1 %v5112_v36 }
  0xbd   : > { %4476 = vmatpush3.bf16.msra.mxu1 %v5112_v36  ;;  %v2792_v36 = vshll.u32 %v6032_v0, 16 }
  0xbe   : > { %4477 = vmatprep.subr.bf16.mxu1 %v5114_v6 }
  0xc0   : > { %4446 = vmatmul.mubr.bf16.gmra.mrb[4].mxu1 %v5612_v46 }
  0xc1   : > { %4654 = vmatmul.mubr.bf16.gmra.mrb[20].mxu0 %v5857_v9  ;;  %4449 = vmatprep.mubr.bf16.mxu1 %v5649_v44 }
  0xc2   : > { %4657 = vmatprep.mubr.bf16.mxu0 %v5861_v16  ;;  %4478 = vmatpush3.bf16.msra.mxu1 %v5114_v6  ;;  %v2802_v6 = vshrl.u32 %v6035_v62, 16 }
  0xc3   : > { %4479 = vmatprep.subr.bf16.mxu1 %v5117_v10 }
  0xc6   : > { %4480 = vmatpush3.bf16.msra.mxu1 %v5117_v10  ;;  %v6332_v10 = vld [vmem:[#allocation11_spill] sm:$0xff] }
  0xc7   : > { %4481 = vmatprep.subr.bf16.mxu1 %v5120_v39 }
  0xc8   : > { %4450 = vmatmul.mubr.bf16.gmra.mrb[8].mxu1 %v5682_v19 }
  0xc9   : > { %4658 = vmatmul.mubr.bf16.gmra.mrb[24].mxu0 %v5868_v38  ;;  %4453 = vmatprep.mubr.bf16.mxu1 %v5714_v35 }
  0xca   : > { %4661 = vmatprep.mubr.bf16.mxu0 %v6022_v48  ;;  %4482 = vmatpush3.bf16.msra.mxu1 %v5120_v39 }
  0xcb   : > { %4483 = vmatprep.subr.bf16.mxu1 %v5122_v27 }
  0xce   : > { %4484 = vmatpush3.bf16.msra.mxu1 %v5122_v27  ;;  %v2794_v27 = vrot.slane %v2792_v36, 5 }
  0xcf   : > { %4485 = vmatprep.subr.bf16.mxu1 %v5124_v24 }
  0xd0   : > { %4454 = vmatmul.mubr.bf16.gmra.mrb[12].mxu1 %v5748_v21 }
  0xd1   : > { %4662 = vmatmul.mubr.bf16.gmra.mrb[28].mxu0 %v3889_v14  ;;  %4457 = vmatprep.mubr.bf16.mxu1 %v5780_v58  ;;  %v2804_v14 = vrot.slane %v2802_v6, 4 }
  0xd2   : > { %4681 = vmatprep.mubr.bf16.mxu0 %v5348_v51  ;;  %4486 = vmatpush3.bf16.msra.mxu1 %v5124_v24  ;;  %v6324_v51 = vld [vmem:[#allocation3_spill] sm:$0xff] }
  0xd3   : > { %4487 = vmatprep.subr.bf16.mxu1 %v5126_v7 }
  0xd6   : > { %4488 = vmatpush3.bf16.msra.mxu1 %v5126_v7  ;;  %v5143_v7 = vld [vmem:[%s6287_s1 + $0x110] sm:$0xff]  }
  0xd7   : > { %4761 = vmatprep.subr.bf16.mxu1 %v5141_v1 }
  0xd8   : > { %4458 = vmatmul.mubr.bf16.gmra.mrb[16].mxu1 %v5785_v18 }
  0xd9   : > { %4682 = vmatmul.mubr.bf16.vlgmr.msra.gmra.mrb[0].mxu0 %v6323_v30  ;;  %4461 = vmatprep.mubr.bf16.mxu1 %v5805_v13 }
  0xda   : > { %4714 = vmatpush3.bf16.msra.mxu0 %v5121_v56  ;;  %4685 = vmatprep.mubr.bf16.mxu0 %v6324_v51  ;;  %v2789_v56 = vshrl.u32 %v6032_v0, 16 }
  0xdb   : > { %4715 = vmatprep.subr.bf16.mxu0 %v5123_v20 }
  0xdc   : > { %v2791_v39 = vrot.slane %v2789_v56, 4 }
  0xde   : > { %4716 = vmatpush3.bf16.msra.mxu0 %v5123_v20  ;;  %v6333_v20 = vld [vmem:[#allocation12_spill] sm:$0xff] }
  0xdf   : > { %4717 = vmatprep.subr.bf16.mxu0 %v5125_v5 }
  0xe0   : > { %4462 = vmatmul.mubr.bf16.gmra.mrb[20].mxu1 %v5810_v29 }
  0xe1   : > { %4686 = vmatmul.mubr.bf16.gmra.mrb[4].mxu0 %v6325_v47  ;;  %4465 = vmatprep.mubr.bf16.mxu1 %v5863_v4 }
  0xe2   : > { %4689 = vmatprep.mubr.bf16.mxu0 %v6326_v52  ;;  %4718 = vmatpush3.bf16.msra.mxu0 %v5125_v5  ;;  %v5144_v5 = vld [vmem:[%s6287_s1 + $0x118] sm:$0xff]  }
  0xe3   : > { %4719 = vmatprep.subr.bf16.mxu0 %v5127_v32 }
  0xe6   : > { %4720 = vmatpush3.bf16.msra.mxu0 %v5127_v32 }
  0xe7   : > { %4721 = vmatprep.subr.bf16.mxu0 %v5128_v2 }
  0xe8   : > { %4466 = vmatmul.mubr.bf16.gmra.mrb[24].mxu1 %v5870_v3 }
  0xe9   : > { %4690 = vmatmul.mubr.bf16.gmra.mrb[8].mxu0 %v6327_v34  ;;  %4469 = vmatprep.mubr.bf16.mxu1 %v5904_v50 }
  0xea   : > { %4693 = vmatprep.mubr.bf16.mxu0 %v6328_v59  ;;  %4722 = vmatpush3.bf16.msra.mxu0 %v5128_v2 }
  0xeb   : > { %4723 = vmatprep.subr.bf16.mxu0 %v5129_v54 }
  0xee   : > { %4724 = vmatpush3.bf16.msra.mxu0 %v5129_v54  ;;  %v5146_v54 = vld [vmem:[%s6287_s1 + $0x128] sm:$0xff]  }
  0xef   : > { %4725 = vmatprep.subr.bf16.mxu0 %v5130_v63 }
  0xf0   : > { %4470 = vmatmul.mubr.bf16.gmra.mrb[28].mxu1 %v5914_v42 }
  0xf1   : > { %4694 = vmatmul.mubr.bf16.gmra.mrb[12].mxu0 %v6329_v49  ;;  %4489 = vmatprep.mubr.bf16.mxu1 %v5284_v43  ;;  %v2798_v43 = vshll.u32 %v6035_v62, 16 }
  0xf2   : > { %4697 = vmatprep.mubr.bf16.mxu0 %v6330_v22  ;;  %4726 = vmatpush3.bf16.msra.mxu0 %v5130_v63 }
  0xf3   : > { %4727 = vmatprep.subr.bf16.mxu0 %v5131_v25  ;;  %v2800_v24 = vrot.slane %v2798_v43, 5 }
  0xf5   : > { %v2805_v30 = vor.u32 %v2804_v14, %v2800_v24 }
  0xf6   : > { %4728 = vmatpush3.bf16.msra.mxu0 %v5131_v25 }
  0xf7   : > { %v2806_v47 = vrot.slane %v2805_v30, 4 }
  0xf8   : > { %4490 = vmatmul.mubr.bf16.vlgmr.msra.gmra.mrb[0].mxu1 %v5360_v60  ;;  %v5142_v60 = vld [vmem:[%s6287_s1 + $0x108] sm:$0xff]  }
  0xf9   : > { %4698 = vmatmul.mubr.bf16.gmra.mrb[16].mxu0 %v6331_v8  ;;  %4769 = vmatpush3.bf16.msra.mxu1 %v5141_v1  ;;  %v2795_v1 = vor.u32 %v2794_v27, %v2791_v39 }
  0xfa   : > { %4493 = vmatprep.mubr.bf16.mxu1 %v5431_v11  ;;  %4701 = vmatprep.mubr.bf16.mxu0 %v6332_v10  ;;  %v6103_v11 = vld [vmem:[%s5226_s14 + $0xd4] sm:$0x1] }
  0xfb   : > { %4762 = vmatprep.subr.bf16.mxu1 %v5142_v60  ;;  %v2808_v51 = vshll.u32 %v6103_v11, 16  ;;  %v2796_v32 = vrot.slane %v2795_v1, 4 }
  0xfd   : > { %4770 = vmatpush3.bf16.msra.mxu1 %v5142_v60  ;;  %v2810_v52 = vrot.slane %v2808_v51, 5 }
  0xfe   : > { %4763 = vmatprep.subr.bf16.mxu1 %v5143_v7 }
  0xff   : > { %v2811_v2 = vsel %vm5271_vm2, %v2806_v47, %v2810_v52 }
 0x100   : > { %4494 = vmatmul.mubr.bf16.gmra.mrb[4].mxu1 %v5435_v15  ;;  %v5145_v15 = vld [vmem:[%s6287_s1 + $0x120] sm:$0xff]  }
 0x101   : > { %4702 = vmatmul.mubr.bf16.gmra.mrb[20].mxu0 %v6333_v20  ;;  %4497 = vmatprep.mubr.bf16.mxu1 %v5902_v12  ;;  %v2801_v12 = vsel %vm5271_vm2, %v2796_v32, %v2800_v24 }
 0x102   : > { %4705 = vmatprep.mubr.bf16.mxu0 %v5744_v55  ;;  %4771 = vmatpush3.bf16.msra.mxu1 %v5143_v7  ;;  %v3914_v34 = vcombine.low %v2801_v12, %v2811_v2 }
 0x103   : > { %4764 = vmatprep.subr.bf16.mxu1 %v5144_v5 }
 0x106   : > { %4772 = vmatpush3.bf16.msra.mxu1 %v5144_v5 }
 0x107   : > { %4765 = vmatprep.subr.bf16.mxu1 %v5145_v15 }
 0x108   : > { %4498 = vmatmul.mubr.bf16.gmra.mrb[8].mxu1 %v5908_v31  ;;  %v5147_v31 = vld [vmem:[%s6287_s1 + $0x130] sm:$0xff]  }
 0x109   : > { %4706 = vmatmul.mubr.bf16.gmra.mrb[24].mxu0 %v5778_v61  ;;  %4501 = vmatprep.mubr.bf16.mxu1 %v5933_v41 }
 0x10a   : > { %4709 = vmatprep.mubr.bf16.mxu0 %v5941_v57  ;;  %4773 = vmatpush3.bf16.msra.mxu1 %v5145_v15 }
 0x10b   : > { %4766 = vmatprep.subr.bf16.mxu1 %v5146_v54 }
 0x10e   : > { %4774 = vmatpush3.bf16.msra.mxu1 %v5146_v54 }
 0x10f   : > { %4767 = vmatprep.subr.bf16.mxu1 %v5147_v31 }
 0x110   : > { %4502 = vmatmul.mubr.bf16.gmra.mrb[12].mxu1 %v5823_v28 }
 0x111   : > { %4710 = vmatmul.mubr.bf16.gmra.mrb[28].mxu0 %v3914_v34  ;;  %4505 = vmatprep.mubr.bf16.mxu1 %v5834_v33 }
 0x112   : > { %4729 = vmatprep.mubr.bf16.mxu0 %v5572_v26  ;;  %4775 = vmatpush3.bf16.msra.mxu1 %v5147_v31  ;;  %v3077_v26 = vrot.slane %v6035_v62, 5 }
 0x113   : > { %4768 = vmatprep.subr.bf16.mxu1 %v5148_v37 }
 0x116   : > { %4776 = vmatpush3.bf16.msra.mxu1 %v5148_v37 }
 0x118   : > { %4506 = vmatmul.mubr.bf16.gmra.mrb[16].mxu1 %v5845_v45 }
 0x119   : > { %4730 = vmatmul.mubr.bf16.vlgmr.msra.gmra.mrb[0].mxu0 %v5612_v46  ;;  %4509 = vmatprep.mubr.bf16.mxu1 %v5849_v40  ;;  %v3923_v46 = vrot.slane %v6032_v0, 9 }
 0x11a   : > { %4733 = vmatprep.mubr.bf16.mxu0 %v5649_v44  ;;  %v3079_v44 = vrot.slane %v3077_v26, 4 }
 0x120   : > { %4510 = vmatmul.mubr.bf16.gmra.mrb[20].mxu1 %v5853_v53 }
 0x121   : > { %4734 = vmatmul.mubr.bf16.gmra.mrb[4].mxu0 %v5682_v19  ;;  %4513 = vmatprep.mubr.bf16.mxu1 %v5857_v9  ;;  %v3080_v19 = vrot.slane %v6103_v11, 5 }
 0x122   : > { %4737 = vmatprep.mubr.bf16.mxu0 %v5714_v35  ;;  %v3078_v35 = vsel %vm5478_vm5, %v3923_v46, %v3077_v26 }
 0x128   : > { %4514 = vmatmul.mubr.bf16.gmra.mrb[24].mxu1 %v5861_v16 }
 0x129   : > { %4738 = vmatmul.mubr.bf16.gmra.mrb[8].mxu0 %v5748_v21  ;;  %4517 = vmatprep.mubr.bf16.mxu1 %v5868_v38  ;;  %v3081_v21 = vsel %vm5478_vm5, %v3079_v44, %v3080_v19 }
 0x12a   : > { %4741 = vmatprep.mubr.bf16.mxu0 %v5780_v58  ;;  %v3940_v58 = vcombine.low %v3078_v35, %v3081_v21 }
 0x130   : > { %4518 = vmatmul.mubr.bf16.gmra.mrb[28].mxu1 %v6022_v48 }
 0x131   : > { %4742 = vmatmul.mubr.bf16.gmra.mrb[12].mxu0 %v5785_v18  ;;  %4553 = vmatprep.mubr.bf16.mxu1 %v6329_v49 }
 0x132   : > { %4745 = vmatprep.mubr.bf16.mxu0 %v5805_v13 }
 0x138   : > { %4554 = vmatmul.mubr.bf16.vlgmr.msra.gmra.mrb[16].mxu1 %v6330_v22 }
 0x139   : > { %4746 = vmatmul.mubr.bf16.gmra.mrb[16].mxu0 %v5810_v29  ;;  %4557 = vmatprep.mubr.bf16.mxu1 %v6331_v8 }
 0x13a   : > { %4749 = vmatprep.mubr.bf16.mxu0 %v5863_v4 }
 0x140   : > { %4558 = vmatmul.mubr.bf16.gmra.mrb[20].mxu1 %v6332_v10 }
 0x141   : > { %4750 = vmatmul.mubr.bf16.gmra.mrb[20].mxu0 %v5870_v3  ;;  %4561 = vmatprep.mubr.bf16.mxu1 %v6333_v20 }
 0x142   : > { %4753 = vmatprep.mubr.bf16.mxu0 %v5904_v50 }
 0x148   : > { %4562 = vmatmul.mubr.bf16.gmra.mrb[24].mxu1 %v5744_v55 }
 0x149   : > { %4754 = vmatmul.mubr.bf16.gmra.mrb[24].mxu0 %v5914_v42  ;;  %4565 = vmatprep.mubr.bf16.mxu1 %v5778_v61  ;;  %v6185_v42 = vld [vmem:[%s6288_s2] ss:$0 sm:$0xff] }
 0x14a   : > { %4757 = vmatprep.mubr.bf16.mxu0 %v5935_v17 }
 0x150   : > { %4566 = vmatmul.mubr.bf16.gmra.mrb[28].mxu1 %v5941_v57  ;;  %v6190_v57 = vld [vmem:[%s6289_s3] ss:$0 sm:$0xff] }
 0x151   : > { %4758 = vmatmul.mubr.bf16.gmra.mrb[28].mxu0 %v3940_v58 }
 0x1cb   : > { %v4491_v18 = vpop.f32.mrb[0].mxu1 }
 0x1cc   : > { %v1809_v13 = vpop.f32.mrb[1].mxu1 }
 0x1cd   : > { %v4492_v29 = vpop.f32.mrb[2].mxu1 }
 0x1ce   : > { %v1812_v55 = vpop.f32.mrb[3].mxu1 }
 0x1d3   : > { %v4495_v28 = vpop.f32.mrb[4].mxu1 }
 0x1d4   : > { %v1825_v33 = vpop.f32.mrb[5].mxu1 }
 0x1d5   : > { %v4496_v45 = vpop.f32.mrb[6].mxu1 }
 0x1d6   : > { %v1828_v61 = vpop.f32.mrb[7].mxu1 }
 0x1db   : > { %v4499_v40 = vpop.f32.mrb[8].mxu1 }
 0x1dc   : > { %v1841_v53 = vpop.f32.mrb[9].mxu1 }
 0x1dd   : > { %v4500_v9 = vpop.f32.mrb[10].mxu1 }
 0x1de   : > { %v6172_v16 = vpop.f32.mrb[11].mxu1 }
 0x1e3   : > { %v6174_v4 = vpop.f32.mrb[12].mxu1 }
 0x1e4   : > { %v6176_v23 = vpop.f32.mrb[13].mxu1 }
 0x1e5   : > { %v6178_v38 = vpop.f32.mrb[14].mxu1 }
 0x1e6   : > { %v6180_v3 = vpop.f32.mrb[15].mxu1 }
 0x1ec   : > { %v4731_v50 = vpop.f32.mrb[0].mxu0 }
 0x1ed   : > { %v4777_v41 = vadd.f32 %v4731_v50, %v4491_v18  ;;  %v3185_v17 = vpop.f32.mrb[1].mxu0 }
 0x1ee   : > { %v4778_v48 = vadd.f32 %v3185_v17, %v1809_v13  ;;  %v4732_v0 = vpop.f32.mrb[2].mxu0 }
 0x1ef   : > { %v3353_v62 = vmul.f32 %v4777_v41, %v6185_v42  ;;  %v4779_v59 = vadd.f32 %v4732_v0, %v4492_v29  ;;  %v3188_v63 = vpop.f32.mrb[3].mxu0 }
 0x1f0   : > { %v3351_v25 = vmul.f32 %v4778_v48, %v6185_v42  ;;  %v4780_v49 = vadd.f32 %v3188_v63, %v1812_v55 }
 0x1f1   : > { %v3392_v22 = vadd.f32 %v6190_v57, %v3353_v62  ;;  %v3354_v8 = vmul.f32 %v4779_v59, %v6185_v42 }
 0x1f2   : > { %v3390_v56 = vadd.f32 %v6190_v57, %v3351_v25  ;;  %v3352_v36 = vmul.f32 %v4780_v49, %v6185_v42 }
 0x1f3   : > { %v3393_v6 = vadd.f32 %v6190_v57, %v3354_v8  ;;  %v3424_v60 = vmax.f32 %v3392_v22, 0.0 }
 0x1f4   : > { %v3391_v43 = vadd.f32 %v6190_v57, %v3352_v36  ;;  %v4735_v10 = vpop.f32.mrb[4].mxu0  ;;  %v3422_v14 = vmax.f32 %v3390_v56, 0.0 }
 0x1f5   : > { %v3425_v39 = vmax.f32 %v3393_v6, 0.0  ;;  %v4781_v27 = vadd.f32 %v4735_v10, %v4495_v28  ;;  %v3201_v24 = vpop.f32.mrb[5].mxu0 }
 0x1f6   : > { %v3423_v7 = vmax.f32 %v3391_v43, 0.0  ;;  %v4782_v11 = vadd.f32 %v3201_v24, %v1825_v33  ;;  %v4736_v20 = vpop.f32.mrb[6].mxu0 }
 0x1f7   : > { %v4026_v1 = vpack.c.bf16 %v3425_v39, %v3424_v60  ;;  %v3357_v30 = vmul.f32 %v4781_v27, %v6185_v42  ;;  %v4783_v51 = vadd.f32 %v4736_v20, %v4496_v45  ;;  %v3204_v5 = vpop.f32.mrb[7].mxu0 }
 0x1f8   : > { %v4021_v32 = vpack.c.bf16 %v3423_v7, %v3422_v14  ;;  %v3355_v47 = vmul.f32 %v4782_v11, %v6185_v42  ;;  %v4784_v52 = vadd.f32 %v3204_v5, %v1828_v61 }
 0x1f9   : > { %4098 = vst [vmem:[%s6204_s25 + $0x8] sm:$0xff] %v4026_v1   ;;  %v3396_v15 = vadd.f32 %v6190_v57, %v3357_v30  ;;  %v3358_v12 = vmul.f32 %v4783_v51, %v6185_v42 }
 0x1fa   : > { %4022 = vst [vmem:[%s6204_s25] sm:$0xff] %v4021_v32   ;;  %v3394_v2 = vadd.f32 %v6190_v57, %v3355_v47  ;;  %v3356_v54 = vmul.f32 %v4784_v52, %v6185_v42 }
 0x1fb   : > { %v3397_v34 = vadd.f32 %v6190_v57, %v3358_v12  ;;  %v3428_v26 = vmax.f32 %v3396_v15, 0.0 }
 0x1fc   : > { %v3395_v31 = vadd.f32 %v6190_v57, %v3356_v54  ;;  %v4739_v37 = vpop.f32.mrb[8].mxu0  ;;  %v3426_v35 = vmax.f32 %v3394_v2, 0.0 }
 0x1fd   : > { %v3429_v46 = vmax.f32 %v3397_v34, 0.0  ;;  %v4785_v44 = vadd.f32 %v4739_v37, %v4499_v40  ;;  %v3217_v19 = vpop.f32.mrb[9].mxu0 }
 0x1fe   : > { %v3427_v21 = vmax.f32 %v3395_v31, 0.0  ;;  %v4786_v58 = vadd.f32 %v3217_v19, %v1841_v53  ;;  %v4740_v18 = vpop.f32.mrb[10].mxu0 }
 0x1ff   : > { %v4036_v13 = vpack.c.bf16 %v3429_v46, %v3428_v26  ;;  %v3361_v29 = vmul.f32 %v4785_v44, %v6185_v42  ;;  %v4787_v55 = vadd.f32 %v4740_v18, %v4500_v9  ;;  %v3220_v28 = vpop.f32.mrb[11].mxu0 }
 0x200   : > { %v4031_v33 = vpack.c.bf16 %v3427_v21, %v3426_v35  ;;  %v3359_v45 = vmul.f32 %v4786_v58, %v6185_v42  ;;  %v4788_v61 = vadd.f32 %v3220_v28, %v6172_v16 }
 0x201   : > { %4100 = vst [vmem:[%s6204_s25 + $0x18] sm:$0xff] %v4036_v13   ;;  %v3400_v50 = vadd.f32 %v6190_v57, %v3361_v29  ;;  %v3362_v40 = vmul.f32 %v4787_v55, %v6185_v42 }
 0x202   : > { %4099 = vst [vmem:[%s6204_s25 + $0x10] sm:$0xff] %v4031_v33   ;;  %v3398_v41 = vadd.f32 %v6190_v57, %v3359_v45  ;;  %v3360_v53 = vmul.f32 %v4788_v61, %v6185_v42 }
 0x203   : > { %v3401_v17 = vadd.f32 %v6190_v57, %v3362_v40  ;;  %v3432_v0 = vmax.f32 %v3400_v50, 0.0 }
 0x204   : > { %v3399_v9 = vadd.f32 %v6190_v57, %v3360_v53  ;;  %v4743_v48 = vpop.f32.mrb[12].mxu0  ;;  %v3430_v63 = vmax.f32 %v3398_v41, 0.0 }
 0x205   : > { %v3433_v62 = vmax.f32 %v3401_v17, 0.0  ;;  %v4789_v16 = vadd.f32 %v4743_v48, %v6174_v4  ;;  %v3233_v59 = vpop.f32.mrb[13].mxu0 }
 0x206   : > { %v3431_v25 = vmax.f32 %v3399_v9, 0.0  ;;  %v4790_v49 = vadd.f32 %v3233_v59, %v6176_v23  ;;  %v4744_v22 = vpop.f32.mrb[14].mxu0 }
 0x207   : > { %v4046_v8 = vpack.c.bf16 %v3433_v62, %v3432_v0  ;;  %v3365_v56 = vmul.f32 %v4789_v16, %v6185_v42  ;;  %v4791_v36 = vadd.f32 %v4744_v22, %v6178_v38  ;;  %v3236_v6 = vpop.f32.mrb[15].mxu0 }
 0x208   : > { %v4041_v43 = vpack.c.bf16 %v3431_v25, %v3430_v63  ;;  %v3363_v10 = vmul.f32 %v4790_v49, %v6185_v42  ;;  %v4792_v60 = vadd.f32 %v3236_v6, %v6180_v3 }
 0x209   : > { %4102 = vst [vmem:[%s6204_s25 + $0x28] sm:$0xff] %v4046_v8   ;;  %v3404_v4 = vadd.f32 %v6190_v57, %v3365_v56  ;;  %v3366_v39 = vmul.f32 %v4791_v36, %v6185_v42 }
 0x20a   : > { %4101 = vst [vmem:[%s6204_s25 + $0x20] sm:$0xff] %v4041_v43   ;;  %v3402_v23 = vadd.f32 %v6190_v57, %v3363_v10  ;;  %v3364_v27 = vmul.f32 %v4792_v60, %v6185_v42 }
 0x20b   : > { %v3405_v24 = vadd.f32 %v6190_v57, %v3366_v39  ;;  %v4555_v14 = vpop.f32.mrb[16].mxu1  ;;  %v3436_v11 = vmax.f32 %v3404_v4, 0.0 }
 0x20c   : > { %v3403_v38 = vadd.f32 %v6190_v57, %v3364_v27  ;;  %v4747_v7 = vpop.f32.mrb[16].mxu0  ;;  %v2159_v3 = vpop.f32.mrb[17].mxu1  ;;  %v3434_v51 = vmax.f32 %v3402_v23, 0.0 }
 0x20d   : > { %v3437_v20 = vmax.f32 %v3405_v24, 0.0  ;;  %v4793_v1 = vadd.f32 %v4747_v7, %v4555_v14  ;;  %v3249_v30 = vpop.f32.mrb[17].mxu0  ;;  %v4556_v47 = vpop.f32.mrb[18].mxu1 }
 0x20e   : > { %v3435_v5 = vmax.f32 %v3403_v38, 0.0  ;;  %v4794_v32 = vadd.f32 %v3249_v30, %v2159_v3  ;;  %v4748_v52 = vpop.f32.mrb[18].mxu0  ;;  %v2162_v54 = vpop.f32.mrb[19].mxu1 }
 0x20f   : > { %v4056_v15 = vpack.c.bf16 %v3437_v20, %v3436_v11  ;;  %v3369_v12 = vmul.f32 %v4793_v1, %v6185_v42  ;;  %v4795_v2 = vadd.f32 %v4748_v52, %v4556_v47  ;;  %v3252_v34 = vpop.f32.mrb[19].mxu0 }
 0x210   : > { %v4051_v31 = vpack.c.bf16 %v3435_v5, %v3434_v51  ;;  %v3367_v37 = vmul.f32 %v4794_v32, %v6185_v42  ;;  %v4796_v26 = vadd.f32 %v3252_v34, %v2162_v54 }
 0x211   : > { %4104 = vst [vmem:[%s6204_s25 + $0x38] sm:$0xff] %v4056_v15   ;;  %v3408_v46 = vadd.f32 %v6190_v57, %v3369_v12  ;;  %v3370_v44 = vmul.f32 %v4795_v2, %v6185_v42 }
 0x212   : > { %4103 = vst [vmem:[%s6204_s25 + $0x30] sm:$0xff] %v4051_v31   ;;  %v3406_v19 = vadd.f32 %v6190_v57, %v3367_v37  ;;  %v3368_v35 = vmul.f32 %v4796_v26, %v6185_v42 }
 0x213   : > { %v3409_v21 = vadd.f32 %v6190_v57, %v3370_v44  ;;  %v4559_v18 = vpop.f32.mrb[20].mxu1  ;;  %v3440_v29 = vmax.f32 %v3408_v46, 0.0 }
 0x214   : > { %v3407_v58 = vadd.f32 %v6190_v57, %v3368_v35  ;;  %v4751_v13 = vpop.f32.mrb[20].mxu0  ;;  %v2175_v33 = vpop.f32.mrb[21].mxu1  ;;  %v3438_v61 = vmax.f32 %v3406_v19, 0.0 }
 0x215   : > { %v3441_v55 = vmax.f32 %v3409_v21, 0.0  ;;  %v4797_v28 = vadd.f32 %v4751_v13, %v4559_v18  ;;  %v3265_v45 = vpop.f32.mrb[21].mxu0  ;;  %v4560_v41 = vpop.f32.mrb[22].mxu1 }
 0x216   : > { %v3439_v50 = vmax.f32 %v3407_v58, 0.0  ;;  %v4798_v40 = vadd.f32 %v3265_v45, %v2175_v33  ;;  %v4752_v53 = vpop.f32.mrb[22].mxu0  ;;  %v2178_v0 = vpop.f32.mrb[23].mxu1 }
 0x217   : > { %v4066_v17 = vpack.c.bf16 %v3441_v55, %v3440_v29  ;;  %v3373_v9 = vmul.f32 %v4797_v28, %v6185_v42  ;;  %v4799_v48 = vadd.f32 %v4752_v53, %v4560_v41  ;;  %v3268_v62 = vpop.f32.mrb[23].mxu0 }
 0x218   : > { %v4061_v16 = vpack.c.bf16 %v3439_v50, %v3438_v61  ;;  %v3371_v59 = vmul.f32 %v4798_v40, %v6185_v42  ;;  %v4800_v63 = vadd.f32 %v3268_v62, %v2178_v0 }
 0x219   : > { %4106 = vst [vmem:[%s6204_s25 + $0x48] sm:$0xff] %v4066_v17   ;;  %v3412_v25 = vadd.f32 %v6190_v57, %v3373_v9  ;;  %v3374_v49 = vmul.f32 %v4799_v48, %v6185_v42 }
 0x21a   : > { %4105 = vst [vmem:[%s6204_s25 + $0x40] sm:$0xff] %v4061_v16   ;;  %v3410_v22 = vadd.f32 %v6190_v57, %v3371_v59  ;;  %v3372_v8 = vmul.f32 %v4800_v63, %v6185_v42 }
 0x21b   : > { %v3413_v56 = vadd.f32 %v6190_v57, %v3374_v49  ;;  %v4563_v6 = vpop.f32.mrb[24].mxu1  ;;  %v3444_v10 = vmax.f32 %v3412_v25, 0.0 }
 0x21c   : > { %v3411_v36 = vadd.f32 %v6190_v57, %v3372_v8  ;;  %v4755_v43 = vpop.f32.mrb[24].mxu0  ;;  %v2191_v39 = vpop.f32.mrb[25].mxu1  ;;  %v3442_v27 = vmax.f32 %v3410_v22, 0.0 }
 0x21d   : > { %v3445_v60 = vmax.f32 %v3413_v56, 0.0  ;;  %v4801_v4 = vadd.f32 %v4755_v43, %v4563_v6  ;;  %v3281_v23 = vpop.f32.mrb[25].mxu0  ;;  %v4564_v14 = vpop.f32.mrb[26].mxu1 }
 0x21e   : > { %v3443_v24 = vmax.f32 %v3411_v36, 0.0  ;;  %v4802_v38 = vadd.f32 %v3281_v23, %v2191_v39  ;;  %v4756_v7 = vpop.f32.mrb[26].mxu0  ;;  %v2194_v3 = vpop.f32.mrb[27].mxu1 }
 0x21f   : > { %v4076_v11 = vpack.c.bf16 %v3445_v60, %v3444_v10  ;;  %v3377_v20 = vmul.f32 %v4801_v4, %v6185_v42  ;;  %v4803_v1 = vadd.f32 %v4756_v7, %v4564_v14  ;;  %v3284_v30 = vpop.f32.mrb[27].mxu0 }
 0x220   : > { %v4071_v51 = vpack.c.bf16 %v3443_v24, %v3442_v27  ;;  %v3375_v5 = vmul.f32 %v4802_v38, %v6185_v42  ;;  %v4804_v32 = vadd.f32 %v3284_v30, %v2194_v3 }
 0x221   : > { %4108 = vst [vmem:[%s6204_s25 + $0x58] sm:$0xff] %v4076_v11   ;;  %v3416_v47 = vadd.f32 %v6190_v57, %v3377_v20  ;;  %v3378_v52 = vmul.f32 %v4803_v1, %v6185_v42 }
 0x222   : > { %4107 = vst [vmem:[%s6204_s25 + $0x50] sm:$0xff] %v4071_v51   ;;  %v3414_v15 = vadd.f32 %v6190_v57, %v3375_v5  ;;  %v3376_v12 = vmul.f32 %v4804_v32, %v6185_v42 }
 0x223   : > { %v3417_v2 = vadd.f32 %v6190_v57, %v3378_v52  ;;  %v4567_v34 = vpop.f32.mrb[28].mxu1  ;;  %v3448_v37 = vmax.f32 %v3416_v47, 0.0 }
 0x224   : > { %v3415_v54 = vadd.f32 %v6190_v57, %v3376_v12  ;;  %v4759_v31 = vpop.f32.mrb[28].mxu0  ;;  %v2207_v44 = vpop.f32.mrb[29].mxu1  ;;  %v3446_v35 = vmax.f32 %v3414_v15, 0.0 }
 0x225   : > { %v3449_v26 = vmax.f32 %v3417_v2, 0.0  ;;  %v4805_v46 = vadd.f32 %v4759_v31, %v4567_v34  ;;  %v3297_v19 = vpop.f32.mrb[29].mxu0  ;;  %v4568_v18 = vpop.f32.mrb[30].mxu1 }
 0x226   : > { %v3447_v21 = vmax.f32 %v3415_v54, 0.0  ;;  %v4806_v58 = vadd.f32 %v3297_v19, %v2207_v44  ;;  %v4760_v13 = vpop.f32.mrb[30].mxu0  ;;  %v2210_v33 = vpop.f32.mrb[31].mxu1 }
 0x227   : > { %v4086_v29 = vpack.c.bf16 %v3449_v26, %v3448_v37  ;;  %v3381_v55 = vmul.f32 %v4805_v46, %v6185_v42  ;;  %v4807_v28 = vadd.f32 %v4760_v13, %v4568_v18  ;;  %v3300_v45 = vpop.f32.mrb[31].mxu0 }
 0x228   : > { %v4081_v61 = vpack.c.bf16 %v3447_v21, %v3446_v35  ;;  %v3379_v50 = vmul.f32 %v4806_v58, %v6185_v42  ;;  %v4808_v40 = vadd.f32 %v3300_v45, %v2210_v33 }
 0x229   : > { %4110 = vst [vmem:[%s6204_s25 + $0x68] sm:$0xff] %v4086_v29   ;;  %v3420_v41 = vadd.f32 %v6190_v57, %v3381_v55  ;;  %v3382_v53 = vmul.f32 %v4807_v28, %v6185_v42 }
 0x22a   : > { %4109 = vst [vmem:[%s6204_s25 + $0x60] sm:$0xff] %v4081_v61   ;;  %v3418_v17 = vadd.f32 %v6190_v57, %v3379_v50  ;;  %v3380_v9 = vmul.f32 %v4808_v40, %v6185_v42 }
 0x22b   : > { %v3421_v48 = vadd.f32 %v6190_v57, %v3382_v53  ;;  %v3452_v62 = vmax.f32 %v3420_v41, 0.0 }
 0x22c   : > { %v3419_v0 = vadd.f32 %v6190_v57, %v3380_v9  ;;  %v3450_v59 = vmax.f32 %v3418_v17, 0.0 }
 0x22d   : > { %v3453_v16 = vmax.f32 %v3421_v48, 0.0 }
 0x22e   : > { %v3451_v63 = vmax.f32 %v3419_v0, 0.0 }
 0x22f   : > { %v4096_v25 = vpack.c.bf16 %v3453_v16, %v3452_v62 }
 0x230   : > { %v4091_v49 = vpack.c.bf16 %v3451_v63, %v3450_v59 }
 0x231   : > { %4112 = vst [vmem:[%s6204_s25 + $0x78] sm:$0xff] %v4096_v25  }
 0x232   : > { %4111 = vst [vmem:[%s6204_s25 + $0x70] sm:$0xff] %v4091_v49  }
 0x233 PF: > { %s14_s15 = sadd.s32 1, %s5155_s15  }
 0x234   : > { %p11_p4 = scmp.ge.s32.totalorder %s14_s15, 4  }
 0x236   :  { %13 = sbr.rel (!%p11_p4) target bundleno = 1 (0x1), region = 74 }

// kernel: model_and_loss_forward.6
= control target key start
LH: loop header
LB: loop body
LE: loop exit
PB: predicated region body
PF: predicated region fallthrough
CT: control target
= control target key end

     0   :  { %s5129_s18 = smov 0   ;;  %s6246_s0 = inlined_call_operand.vmem [shape: bf16[2,18,18,128], index: 0, kind: input, shape index: {}]   ;;  %s6247_s1 = inlined_call_operand.vmem [shape: bf16[9,128,128], index: 1, kind: input, shape index: {}]   ;;  %s6248_s2 = inlined_call_operand.vmem [shape: f32[1,128], index: 2, kind: input, shape index: {}]   ;;  %s6249_s3 = inlined_call_operand.vmem [shape: f32[1,128], index: 3, kind: input, shape index: {}]   ;;  %s6250_s4 = inlined_call_operand.vmem [shape: bf16[2,16,16,128], index: 4, kind: input, shape index: {}]   ;;  %s6251_s5 = inlined_call_operand.vmem [shape: f32[2,1,128], index: 5, kind: output, shape index: {}]  }
   0x1 LB: > { %s3691_s19 = sadd.s32 4294967295, %s5097_s18   ;;  %p3695_p0 = scmp.ge.s32.totalorder %s5097_s18, 1  ;;  %s5097_s18 = sphi %s5129_s18, %s15_s18  }
   0x2   : > { %p197_p1 = scmp.lt.s32.totalorder %s5097_s18, 3 }
   0x4   : > { %p198_p2 = pnand %p3695_p0, %p197_p1 }
   0x6   : > { %201 = sbr.rel (%p198_p2) target bundleno = 583 (0x247), region = 40 }
   0xd   : > { %v4984_v0 = vld [vmem:[%s6247_s1 + $0x40] sm:$0xff]   ;;  %p228_p3 = scmp.lt.s32.totalorder %s3691_s19, 1  ;;  %v4986_v2 = vld [vmem:[%s6247_s1 + $0x48] sm:$0xff]   ;;  %v4988_v4 = vld [vmem:[%s6247_s1 + $0x50] sm:$0xff]   ;;  %vm312_vm0 = vsmask.f32 3328 }
   0xe   : > { %v4985_v1 = vld [vmem:[%s6247_s1 + $0x100] sm:$0xff]   ;;  %4271 = vmatprep.subr.bf16.mxu1 %v4984_v0  ;;  %v4987_v3 = vld [vmem:[%s6247_s1 + $0x108] sm:$0xff]   ;;  %v4989_v5 = vld [vmem:[%s6247_s1 + $0x110] sm:$0xff]   ;;  %vm313_vm1 = vsmask.f32 7440  ;;  %vm1310_vm3 = vcmask 1042432  }
   0xf   : > { %4463 = vmatprep.subr.bf16.mxu0 %v4985_v1  ;;  %4272 = vmatpush3.bf16.msra.mxu1 %v4984_v0  ;;  %s6296_s19 = smov (!%p228_p3, %s3691_s19), 1  ;;  %v4990_v6 = vld [vmem:[%s6247_s1 + $0x58] sm:$0xff]   ;;  %v4992_v8 = vld [vmem:[%s6247_s1 + $0x60] sm:$0xff]   ;;  %v4994_v10 = vld [vmem:[%s6247_s1 + $0x68] sm:$0xff]   ;;  %vm1311_vm4 = vcmask 1046532  }
  0x10   : > { %4464 = vmatpush3.bf16.msra.mxu0 %v4985_v1  ;;  %4273 = vmatprep.subr.bf16.mxu1 %v4986_v2  ;;  %v4991_v7 = vld [vmem:[%s6247_s1 + $0x118] sm:$0xff]   ;;  %s4975_s11 = smul.u32 216, %s6296_s19  ;;  %v4993_v9 = vld [vmem:[%s6247_s1 + $0x120] sm:$0xff]   ;;  %v4995_v11 = vld [vmem:[%s6247_s1 + $0x128] sm:$0xff]   ;;  %s3975_s28 = sshll.u32 %s6296_s19, 7 }
  0x11   : > { %4465 = vmatprep.subr.bf16.mxu0 %v4987_v3  ;;  %v4996_v17 = vld [vmem:[%s6247_s1 + $0x70] sm:$0xff]   ;;  %v4998_v36 = vld [vmem:[%s6247_s1 + $0x78] sm:$0xff]   ;;  %vm5218_vm2 = vmor %vm312_vm0, %vm313_vm1  ;;  %s6139_s6 = scalar_lea.vmem %s6250_s4, %s3975_s28  ;;  %s240_s13 = scalar_lea.vmem %s6251_s5, %s6296_s19 }
  0x12   : > { %s5173_s20 = scalar_lea.vmem %s6246_s0, %s4975_s11  ;;  %v4997_v31 = vld [vmem:[%s6247_s1 + $0x130] sm:$0xff]   ;;  %v4999_v53 = vld [vmem:[%s6247_s1 + $0x138] sm:$0xff]   ;;  %v5000_v1 = vld [vmem:[%s6247_s1] sm:$0xff]  }
  0x13   : > { %4274 = vmatpush3.bf16.msra.mxu1 %v4986_v2  ;;  %v5182_v12 = vld [vmem:[%s5173_s20] sm:$0xf]  ;;  %v5185_v13 = vld [vmem:[%s5173_s20 + $0x4] sm:$0xf]  ;;  %v244_v14 = vld [vmem:[%s5173_s20 + $0x8] sm:$0x1] }
  0x14   : > { %4466 = vmatpush3.bf16.msra.mxu0 %v4987_v3  ;;  %4275 = vmatprep.subr.bf16.mxu1 %v4988_v4  ;;  %v316_v15 = vshrl.u32 %v5182_v12, 16  ;;  %v319_v16 = vshll.u32 %v5182_v12, 16  ;;  %v325_v18 = vshll.u32 %v5185_v13, 16  ;;  %v329_v19 = vshrl.u32 %v5185_v13, 16  ;;  %v5196_v21 = vld [vmem:[%s5173_s20 + $0xc] sm:$0xf]  ;;  %vm5425_vm5 = vmor %vm1310_vm3, %vm1311_vm4 }
  0x15   : > { %4467 = vmatprep.subr.bf16.mxu0 %v4989_v5  ;;  %v335_v20 = vshll.u32 %v244_v14, 16  ;;  %v5199_v24 = vld [vmem:[%s5173_s20 + $0x10] sm:$0xf]  ;;  %v5202_v25 = vld [vmem:[%s5173_s20 + $0x14] sm:$0x1]  ;;  %v340_v30 = vshrl.u32 %v5196_v21, 16 }
  0x16   : > { %v318_v22 = vrot.slane %v316_v15, 4  ;;  %v321_v23 = vrot.slane %v319_v16, 5  ;;  %v327_v27 = vrot.slane %v325_v18, 5  ;;  %v331_v28 = vrot.slane %v329_v19, 4  ;;  %v5224_v41 = vld [vmem:[%s5173_s20 + $0x18] sm:$0xf] }
  0x17   : > { %4276 = vmatpush3.bf16.msra.mxu1 %v4988_v4  ;;  %v337_v29 = vrot.slane %v335_v20, 5  ;;  %v343_v33 = vshll.u32 %v5196_v21, 16  ;;  %v349_v34 = vshll.u32 %v5199_v24, 16  ;;  %v353_v35 = vshrl.u32 %v5199_v24, 16  ;;  %v5227_v42 = vld [vmem:[%s5173_s20 + $0x1c] sm:$0xf] }
  0x18   : > { %4468 = vmatpush3.bf16.msra.mxu0 %v4989_v5  ;;  %4277 = vmatprep.subr.bf16.mxu1 %v4990_v6  ;;  %v322_v32 = vor.u32 %v321_v23, %v318_v22  ;;  %v332_v38 = vor.u32 %v331_v28, %v327_v27  ;;  %v342_v39 = vrot.slane %v340_v30, 4  ;;  %v359_v40 = vshll.u32 %v5202_v25, 16  ;;  %v5234_v48 = vld [vmem:[%s5173_s20 + $0x20] sm:$0x1]  ;;  %v5251_v3 = vld [vmem:[%s5173_s20 + $0x24] sm:$0xf] }
  0x19   : > { %4469 = vmatprep.subr.bf16.mxu0 %v4991_v7  ;;  %v5231_v43 = vcombine.low %v5196_v21, %v5199_v24  ;;  %v345_v45 = vrot.slane %v343_v33, 5  ;;  %v351_v46 = vrot.slane %v349_v34, 5  ;;  %v355_v47 = vrot.slane %v353_v35, 4  ;;  %v5266_v14 = vld [vmem:[%s5173_s20 + $0x2c] sm:$0x1]  ;;  %v5090_v37 = vld [vmem:[%s6247_s1 + $0x138] sm:$0xff]  }
  0x1a   : > { %v323_v44 = vrot.slane %v322_v32, 4  ;;  %v333_v49 = vrot.slane %v332_v38, 4  ;;  %v361_v50 = vrot.slane %v359_v40, 5  ;;  %v364_v51 = vshrl.u32 %v5224_v41, 16  ;;  %v5271_v22 = vld [vmem:[%s5173_s20 + $0x30] sm:$0xf] }
  0x1b   : > { %4278 = vmatpush3.bf16.msra.mxu1 %v4990_v6  ;;  %v367_v52 = vshll.u32 %v5224_v41, 16  ;;  %v346_v55 = vor.u32 %v345_v45, %v342_v39  ;;  %v356_v56 = vor.u32 %v355_v47, %v351_v46  ;;  %v373_v57 = vshll.u32 %v5227_v42, 16  ;;  %v5276_v30 = vld [vmem:[%s5173_s20 + $0x34] sm:$0xf]  ;;  %v5003_v34 = vld [vmem:[%s6247_s1 + $0x8] sm:$0xff]  }
  0x1c   : > { %4470 = vmatpush3.bf16.msra.mxu0 %v4991_v7  ;;  %4279 = vmatprep.subr.bf16.mxu1 %v4992_v8  ;;  %v328_v54 = vsel %vm5218_vm2, %v323_v44, %v327_v27  ;;  %v338_v58 = vsel %vm5218_vm2, %v333_v49, %v337_v29  ;;  %v366_v59 = vrot.slane %v364_v51, 4  ;;  %v377_v61 = vshrl.u32 %v5227_v42, 16  ;;  %v5285_v35 = vld [vmem:[%s5173_s20 + $0x38] sm:$0x1] }
  0x1d   : > { %4471 = vmatprep.subr.bf16.mxu0 %v4993_v9  ;;  %v369_v60 = vrot.slane %v367_v52, 5  ;;  %v3715_v62 = vcombine.low %v328_v54, %v338_v58  ;;  %v347_v63 = vrot.slane %v346_v55, 4  ;;  %v357_v0 = vrot.slane %v356_v56, 4  ;;  %v5300_v58 = vld [vmem:[%s5173_s20 + $0x3c] sm:$0xf] }
  0x1e   : > { %v375_v2 = vrot.slane %v373_v57, 5  ;;  %v379_v5 = vrot.slane %v377_v61, 4  ;;  %v383_v6 = vshll.u32 %v5234_v48, 16  ;;  %v1332_v7 = vrot.slane %v5234_v48, 5 }
  0x1f   : > { %4280 = vmatpush3.bf16.msra.mxu1 %v4992_v8  ;;  %v370_v4 = vor.u32 %v369_v60, %v366_v59  ;;  %v5001_v8 = vld [vmem:[%s6247_s1 + $0x140] sm:$0xff]   ;;  %4287 = vmatprep.mubr.bf16.mxu1 %v3715_v62  ;;  %v388_v15 = vshrl.u32 %v5251_v3, 16  ;;  %v391_v16 = vshll.u32 %v5251_v3, 16  ;;  %v407_v33 = vshll.u32 %v5266_v14, 16  ;;  %v5006_v59 = vld [vmem:[%s6247_s1 + $0x10] sm:$0xff]  }
  0x20   : > { %4472 = vmatpush3.bf16.msra.mxu0 %v4993_v9  ;;  %4281 = vmatprep.subr.bf16.mxu1 %v4994_v10  ;;  %v5259_v9 = vld [vmem:[%s5173_s20 + $0x28] sm:$0xf]  ;;  %v380_v19 = vor.u32 %v379_v5, %v375_v2  ;;  %v385_v20 = vrot.slane %v383_v6, 5  ;;  %v415_v44 = vshll.u32 %v5271_v22, 16  ;;  %v425_v56 = vshrl.u32 %v5276_v30, 16 }
  0x21   : > { %4473 = vmatprep.subr.bf16.mxu0 %v4995_v11  ;;  %v371_v18 = vrot.slane %v370_v4, 4  ;;  %v390_v23 = vrot.slane %v388_v15, 4  ;;  %v393_v27 = vrot.slane %v391_v16, 5  ;;  %v397_v28 = vshll.u32 %v5259_v9, 16  ;;  %v5004_v16 = vld [vmem:[%s6247_s1 + $0x150] sm:$0xff]  }
  0x22   : > { %v401_v29 = vshrl.u32 %v5259_v9, 16  ;;  %v381_v32 = vrot.slane %v380_v19, 4  ;;  %v409_v47 = vrot.slane %v407_v33, 5  ;;  %v417_v54 = vrot.slane %v415_v44, 5  ;;  %v5340_v33 = vld [vmem:[%s5173_s20 + $0x50] sm:$0x1] }
  0x23   : > { %4282 = vmatpush3.bf16.msra.mxu1 %v4994_v10  ;;  %v352_v10 = vsel %vm5218_vm2, %v347_v63, %v351_v46  ;;  %v394_v38 = vor.u32 %v393_v27, %v390_v23  ;;  %v399_v39 = vrot.slane %v397_v28, 5  ;;  %v5002_v46 = vld [vmem:[%s6247_s1 + $0x148] sm:$0xff]   ;;  %v431_v57 = vshll.u32 %v5285_v35, 16 }
  0x24   : > { %4474 = vmatpush3.bf16.msra.mxu0 %v4995_v11  ;;  %4283 = vmatprep.subr.bf16.mxu1 %v4996_v17  ;;  %v362_v11 = vsel %vm5218_vm2, %v357_v0, %v361_v50  ;;  %v403_v40 = vrot.slane %v401_v29, 4  ;;  %v386_v45 = vsel %vm5218_vm2, %v381_v32, %v385_v20  ;;  %v421_v50 = vshll.u32 %v5276_v30, 16  ;;  %v5314_v0 = vld [vmem:[%s5173_s20 + $0x40] sm:$0xf]  ;;  %v5331_v27 = vld [vmem:[%s5173_s20 + $0x48] sm:$0xf] }
  0x25   : > { %4475 = vmatprep.subr.bf16.mxu0 %v4997_v31  ;;  %v395_v52 = vrot.slane %v394_v38, 4  ;;  %v5307_v60 = vcombine.low %v5224_v41, %v5227_v42  ;;  %v427_v4 = vrot.slane %v425_v56, 4  ;;  %v433_v5 = vrot.slane %v431_v57, 5  ;;  %v5334_v28 = vld [vmem:[%s5173_s20 + $0x4c] sm:$0xf] }
  0x26   : > { %v423_v55 = vrot.slane %v421_v50, 5  ;;  %v439_v6 = vshll.u32 %v5300_v58, 16  ;;  %v469_v44 = vshll.u32 %v5334_v28, 16  ;;  %v473_v50 = vshrl.u32 %v5334_v28, 16 }
  0x27   : > { %4284 = vmatpush3.bf16.msra.mxu1 %v4996_v17  ;;  %v3716_v17 = vcombine.low %v352_v10, %v362_v11  ;;  %v400_v61 = vsel %vm5218_vm2, %v395_v52, %v399_v39  ;;  %v445_v10 = vshll.u32 %v5314_v0, 16 }
  0x28   : > { %4476 = vmatpush3.bf16.msra.mxu0 %v4997_v31  ;;  %4285 = vmatprep.subr.bf16.mxu1 %v4998_v36  ;;  %v376_v31 = vsel %vm5218_vm2, %v371_v18, %v375_v2  ;;  %v436_v2 = vshrl.u32 %v5300_v58, 16  ;;  %v428_v19 = vor.u32 %v427_v4, %v423_v55  ;;  %v441_v20 = vrot.slane %v439_v6, 5  ;;  %v5371_v6 = vld [vmem:[%s5173_s20 + $0x58] sm:$0xf] }
  0x29   : > { %4477 = vmatprep.subr.bf16.mxu0 %v4999_v53  ;;  %4479 = vmatprep.mubr.bf16.mxu0 %v3716_v17  ;;  %v5295_v51 = vcombine.low %v376_v31, %v386_v45  ;;  %v447_v23 = vrot.slane %v445_v10, 5  ;;  %v5005_v45 = vld [vmem:[%s6247_s1 + $0x158] sm:$0xff]  }
  0x2a   : > { %v429_v38 = vrot.slane %v428_v19, 4  ;;  %v5374_v10 = vld [vmem:[%s5173_s20 + $0x5c] sm:$0x1] }
  0x2b   : > { %4286 = vmatpush3.bf16.msra.mxu1 %v4998_v36  ;;  %v412_v36 = vshrl.u32 %v5271_v22, 16 }
  0x2c   : > { %4478 = vmatpush3.bf16.msra.mxu0 %v4999_v53  ;;  %4319 = vmatprep.subr.bf16.mxu1 %v5000_v1  ;;  %v404_v53 = vor.u32 %v403_v40, %v399_v39  ;;  %v463_v40 = vshll.u32 %v5331_v27, 16  ;;  %v434_v52 = vsel %vm5218_vm2, %v429_v38, %v433_v5  ;;  %v5368_v5 = vld [vmem:[%s5173_s20 + $0x54] sm:$0xf] }
  0x2d   : > { %4511 = vmatprep.subr.bf16.mxu0 %v5001_v8  ;;  %v414_v49 = vrot.slane %v412_v36, 4  ;;  %v5009_v36 = vld [vmem:[%s6247_s1 + $0x18] sm:$0xff]   ;;  %v484_v19 = vshrl.u32 %v5368_v5, 16 }
  0x2e   : > { %4288 = vmatmul.mubr.bf16.vlgmr.msra.gmra.mrb[0].mxu1 %v3716_v17  ;;  %v405_v62 = vrot.slane %v404_v53, 4  ;;  %v449_v17 = vshrl.u32 %v5314_v0, 16 }
  0x2f   : > { %4320 = vmatpush3.bf16.msra.mxu1 %v5000_v1  ;;  %4480 = vmatmul.mubr.bf16.vlgmr.msra.gmra.mrb[0].mxu0 %v5295_v51  ;;  %v418_v63 = vor.u32 %v417_v54, %v414_v49  ;;  %v5317_v1 = vld [vmem:[%s5173_s20 + $0x44] sm:$0x1]  ;;  %v465_v54 = vrot.slane %v463_v40, 5  ;;  %v497_v40 = vshrl.u32 %v5371_v6, 16 }
  0x30   : > { %4321 = vmatprep.subr.bf16.mxu1 %v5003_v34  ;;  %4291 = vmatprep.mubr.bf16.mxu1 %v5295_v51  ;;  %v410_v11 = vsel %vm5218_vm2, %v405_v62, %v409_v47  ;;  %v451_v31 = vrot.slane %v449_v17, 4  ;;  %v455_v32 = vshll.u32 %v5317_v1, 16  ;;  %v479_v62 = vshll.u32 %v5340_v33, 16 }
  0x31   : > { %4512 = vmatpush3.bf16.msra.mxu0 %v5001_v8  ;;  %v419_v15 = vrot.slane %v418_v63, 4  ;;  %v438_v8 = vrot.slane %v436_v2, 4  ;;  %v5328_v18 = vcombine.low %v400_v61, %v410_v11  ;;  %v475_v61 = vrot.slane %v473_v50, 4  ;;  %v5007_v63 = vld [vmem:[%s6247_s1 + $0x160] sm:$0xff]   ;;  %v5408_v50 = vld [vmem:[%s5173_s20 + $0x68] sm:$0x1] }
  0x32   : > { %4513 = vmatprep.subr.bf16.mxu0 %v5002_v46  ;;  %v452_v47 = vor.u32 %v451_v31, %v447_v23  ;;  %v457_v49 = vrot.slane %v455_v32, 5  ;;  %v5012_v2 = vld [vmem:[%s6247_s1 + $0x20] sm:$0xff]   ;;  %v5378_v11 = vcombine.low %v5251_v3, %v5259_v9  ;;  %v481_v17 = vrot.slane %v479_v62, 5 }
  0x33   : > { %4322 = vmatpush3.bf16.msra.mxu1 %v5003_v34  ;;  %6270 = vst [vmem:[#allocation2_spill] sm:$0xff] %v5328_v18  ;;  %v424_v29 = vsel %vm5218_vm2, %v419_v15, %v423_v55  ;;  %v460_v34 = vshrl.u32 %v5331_v27, 16  ;;  %4483 = vmatprep.mubr.bf16.mxu0 %v5328_v18  ;;  %v442_v39 = vor.u32 %v441_v20, %v438_v8  ;;  %v471_v55 = vrot.slane %v469_v44, 5  ;;  %v5394_v32 = vld [vmem:[%s5173_s20 + $0x60] sm:$0xf] }
  0x34   : > { %4323 = vmatprep.subr.bf16.mxu1 %v5006_v59  ;;  %v5356_v56 = vcombine.low %v424_v29, %v434_v52  ;;  %v453_v57 = vrot.slane %v452_v47, 4  ;;  %v5382_v15 = vcombine.low %v5271_v22, %v5276_v30  ;;  %v487_v29 = vshll.u32 %v5368_v5, 16  ;;  %v5402_v47 = vld [vmem:[%s5173_s20 + $0x64] sm:$0xf] }
  0x35   : > { %4514 = vmatpush3.bf16.msra.mxu0 %v5002_v46  ;;  %v462_v46 = vrot.slane %v460_v34, 4  ;;  %v443_v53 = vrot.slane %v442_v39, 4  ;;  %v476_v8 = vor.u32 %v475_v61, %v471_v55  ;;  %v493_v31 = vshll.u32 %v5371_v6, 16  ;;  %v5014_v34 = vld [vmem:[%s6247_s1 + $0x28] sm:$0xff]  }
  0x36   : > { %4292 = vmatmul.mubr.bf16.gmra.mrb[4].mxu1 %v5328_v18  ;;  %4515 = vmatprep.subr.bf16.mxu0 %v5004_v16  ;;  %6271 = vst [vmem:[#allocation3_spill] sm:$0xff] %v5356_v56  ;;  %v486_v39 = vrot.slane %v484_v19, 4  ;;  %v503_v44 = vshll.u32 %v5374_v10, 16  ;;  %v508_v52 = vshrl.u32 %v5394_v32, 16  ;;  %v527_v19 = vshll.u32 %v5408_v50, 16 }
  0x37   : > { %4324 = vmatpush3.bf16.msra.mxu1 %v5006_v59  ;;  %v448_v4 = vsel %vm5218_vm2, %v443_v53, %v447_v23  ;;  %v466_v59 = vor.u32 %v465_v54, %v462_v46  ;;  %4484 = vmatmul.mubr.bf16.gmra.mrb[4].mxu0 %v5356_v56  ;;  %v477_v38 = vrot.slane %v476_v8, 4  ;;  %v495_v46 = vrot.slane %v493_v31, 5 }
  0x38   : > { %4325 = vmatprep.subr.bf16.mxu1 %v5009_v36  ;;  %4295 = vmatprep.mubr.bf16.mxu1 %v5356_v56  ;;  %v499_v54 = vrot.slane %v497_v40, 4  ;;  %v5436_v40 = vld [vmem:[%s5173_s20 + $0x6c] sm:$0xf] }
  0x39   : > { %4516 = vmatpush3.bf16.msra.mxu0 %v5004_v16  ;;  %v458_v16 = vsel %vm5218_vm2, %v453_v57, %v457_v49  ;;  %v467_v23 = vrot.slane %v466_v59, 4  ;;  %v482_v53 = vsel %vm5218_vm2, %v477_v38, %v481_v17  ;;  %v505_v57 = vrot.slane %v503_v44, 5 }
  0x3a   : > { %4517 = vmatprep.subr.bf16.mxu0 %v5005_v45  ;;  %v5389_v20 = vcombine.low %v448_v4, %v458_v16  ;;  %v510_v4 = vrot.slane %v508_v52, 4  ;;  %v517_v59 = vshll.u32 %v5402_v47, 16  ;;  %v500_v16 = vor.u32 %v499_v54, %v495_v46 }
  0x3b   : > { %4326 = vmatpush3.bf16.msra.mxu1 %v5009_v36  ;;  %v472_v49 = vsel %vm5218_vm2, %v467_v23, %v471_v55  ;;  %v489_v36 = vrot.slane %v487_v29, 5  ;;  %v511_v55 = vshll.u32 %v5394_v32, 16  ;;  %v521_v17 = vshrl.u32 %v5402_v47, 16  ;;  %v5016_v29 = vld [vmem:[%s6247_s1 + $0x30] sm:$0xff]  }
  0x3c   : > { %6272 = vst [vmem:[#allocation4_spill] sm:$0xff] %v5389_v20  ;;  %4327 = vmatprep.subr.bf16.mxu1 %v5012_v2  ;;  %4487 = vmatprep.mubr.bf16.mxu0 %v5389_v20  ;;  %v5418_v61 = vcombine.low %v472_v49, %v482_v53  ;;  %v519_v31 = vrot.slane %v517_v59, 5  ;;  %v3764_v38 = vrot.slane %v5196_v21, 9  ;;  %v501_v44 = vrot.slane %v500_v16, 4  ;;  %v5443_v53 = vld [vmem:[%s5173_s20 + $0x70] sm:$0xf] }
  0x3d   : > { %4518 = vmatpush3.bf16.msra.mxu0 %v5005_v45  ;;  %v5008_v45 = vld [vmem:[%s6247_s1 + $0x168] sm:$0xff]   ;;  %v490_v62 = vor.u32 %v489_v36, %v486_v39  ;;  %v513_v8 = vrot.slane %v511_v55, 5  ;;  %v1322_v39 = vrot.slane %v5199_v24, 5  ;;  %v523_v36 = vrot.slane %v521_v17, 4 }
  0x3e   : > { %4296 = vmatmul.mubr.bf16.gmra.mrb[8].mxu1 %v5389_v20  ;;  %4519 = vmatprep.subr.bf16.mxu0 %v5007_v63  ;;  %6273 = vst [vmem:[#allocation5_spill] sm:$0xff] %v5418_v61  ;;  %v529_v52 = vrot.slane %v527_v19, 5  ;;  %v1325_v55 = vrot.slane %v5202_v25, 5  ;;  %v506_v59 = vsel %vm5218_vm2, %v501_v44, %v505_v57  ;;  %v541_v19 = vshll.u32 %v5443_v53, 16 }
  0x3f   : > { %4328 = vmatpush3.bf16.msra.mxu1 %v5012_v2  ;;  %4299 = vmatprep.mubr.bf16.mxu1 %v5418_v61  ;;  %v491_v2 = vrot.slane %v490_v62, 4  ;;  %v514_v49 = vor.u32 %v513_v8, %v510_v4  ;;  %v1323_v24 = vsel %vm5425_vm5, %v3764_v38, %v1322_v39  ;;  %v1324_v54 = vrot.slane %v1322_v39, 4  ;;  %v5451_v62 = vld [vmem:[%s5173_s20 + $0x74] sm:$0x1]  ;;  %v5018_v4 = vld [vmem:[%s6247_s1 + $0x38] sm:$0xff]  }
  0x40   : > { %4329 = vmatprep.subr.bf16.mxu1 %v5014_v34  ;;  %4488 = vmatmul.mubr.bf16.gmra.mrb[8].mxu0 %v5418_v61  ;;  %v524_v8 = vor.u32 %v523_v36, %v519_v31  ;;  %v543_v36 = vrot.slane %v541_v19, 5  ;;  %v1343_v20 = vrot.slane %v5276_v30, 5 }
  0x41   : > { %4520 = vmatpush3.bf16.msra.mxu0 %v5007_v63  ;;  %v5010_v63 = vld [vmem:[%s6247_s1 + $0x170] sm:$0xff]   ;;  %v496_v21 = vsel %vm5218_vm2, %v491_v2, %v495_v46  ;;  %v515_v16 = vrot.slane %v514_v49, 4  ;;  %v532_v46 = vshrl.u32 %v5436_v40, 16  ;;  %v1326_v25 = vsel %vm5425_vm5, %v1324_v54, %v1325_v55  ;;  %v5466_v2 = vld [vmem:[%s5173_s20 + $0x78] sm:$0xf] }
  0x42   : > { %4521 = vmatprep.subr.bf16.mxu0 %v5008_v45  ;;  %v5459_v17 = vcombine.low %v496_v21, %v506_v59  ;;  %v525_v38 = vrot.slane %v524_v8, 4  ;;  %v5473_v39 = vcombine.low %v1323_v24, %v1326_v25  ;;  %v545_v21 = vshrl.u32 %v5443_v53, 16  ;;  %v5480_v54 = vld [vmem:[%s5173_s20 + $0x7c] sm:$0xf] }
  0x43   : > { %4330 = vmatpush3.bf16.msra.mxu1 %v5014_v34  ;;  %v535_v34 = vshll.u32 %v5436_v40, 16  ;;  %v520_v57 = vsel %vm5218_vm2, %v515_v16, %v519_v31  ;;  %v534_v44 = vrot.slane %v532_v46, 4  ;;  %v551_v31 = vshll.u32 %v5451_v62, 16  ;;  %v5487_v16 = vld [vmem:[%s5173_s20 + $0x80] sm:$0x1] }
  0x44   : > { %4331 = vmatprep.subr.bf16.mxu1 %v5016_v29  ;;  %6276 = vst [vmem:[#allocation6_spill] sm:$0xff] %v5459_v17  ;;  %4491 = vmatprep.mubr.bf16.mxu0 %v5459_v17  ;;  %v530_v55 = vsel %vm5218_vm2, %v525_v38, %v529_v52  ;;  %v3765_v59 = vrot.slane %v5224_v41, 9  ;;  %v1329_v24 = vrot.slane %v5227_v42, 5  ;;  %v556_v8 = vshrl.u32 %v5466_v2, 16  ;;  %v5495_v52 = vld [vmem:[%s6247_s1 + $0x80] sm:$0xff]  }
  0x45   : > { %4522 = vmatpush3.bf16.msra.mxu0 %v5008_v45  ;;  %v5011_v45 = vld [vmem:[%s6247_s1 + $0x178] sm:$0xff]   ;;  %v537_v49 = vrot.slane %v535_v34, 5  ;;  %v5490_v46 = vcombine.low %v520_v57, %v530_v55  ;;  %v547_v34 = vrot.slane %v545_v21, 4  ;;  %v553_v19 = vrot.slane %v551_v31, 5  ;;  %v5504_v38 = vld [vmem:[%s5173_s20 + $0x84] sm:$0xf] }
  0x46   : > { %4523 = vmatprep.subr.bf16.mxu0 %v5010_v63  ;;  %4300 = vmatmul.mubr.bf16.gmra.mrb[12].mxu1 %v5459_v17  ;;  %v1330_v41 = vsel %vm5425_vm5, %v3765_v59, %v1329_v24  ;;  %v1331_v42 = vrot.slane %v1329_v24, 4  ;;  %v558_v57 = vrot.slane %v556_v8, 4  ;;  %v565_v21 = vshll.u32 %v5480_v54, 16 }
  0x47   : > { %4332 = vmatpush3.bf16.msra.mxu1 %v5016_v29  ;;  %6277 = vst [vmem:[#allocation7_spill] sm:$0xff] %v5490_v46  ;;  %v538_v25 = vor.u32 %v537_v49, %v534_v44  ;;  %v5013_v29 = vld [vmem:[%s6247_s1 + $0x180] sm:$0xff]   ;;  %4303 = vmatprep.mubr.bf16.mxu1 %v5490_v46  ;;  %v548_v49 = vor.u32 %v547_v34, %v543_v36  ;;  %v569_v31 = vshrl.u32 %v5480_v54, 16  ;;  %v575_v24 = vshll.u32 %v5487_v16, 16 }
  0x48   : > { %4333 = vmatprep.subr.bf16.mxu1 %v5018_v4  ;;  %4492 = vmatmul.mubr.bf16.gmra.mrb[12].mxu0 %v5490_v46  ;;  %v1333_v55 = vsel %vm5425_vm5, %v1331_v42, %v1332_v7  ;;  %v3766_v8 = vrot.slane %v5251_v3, 9  ;;  %v567_v46 = vrot.slane %v565_v21, 5  ;;  %v5524_v3 = vld [vmem:[%s5173_s20 + $0x88] sm:$0xf] }
  0x49   : > { %4524 = vmatpush3.bf16.msra.mxu0 %v5010_v63  ;;  %v559_v63 = vshll.u32 %v5466_v2, 16  ;;  %v539_v44 = vrot.slane %v538_v25, 4  ;;  %4527 = vmatprep.mubr.bf16.mxu0 %v5473_v39  ;;  %v549_v34 = vrot.slane %v548_v49, 4  ;;  %v5519_v26 = vcombine.low %v1330_v41, %v1333_v55 }
  0x4a   : > { %4525 = vmatprep.subr.bf16.mxu0 %v5011_v45  ;;  %v571_v7 = vrot.slane %v569_v31, 4  ;;  %v577_v42 = vrot.slane %v575_v24, 5  ;;  %v580_v41 = vshrl.u32 %v5504_v38, 16  ;;  %v5015_v31 = vld [vmem:[%s6247_s1 + $0x188] sm:$0xff]   ;;  %v5543_v24 = vld [vmem:[%s5173_s20 + $0x90] sm:$0xf] }
  0x4b   : > { %v561_v59 = vrot.slane %v559_v63, 5  ;;  %4334 = vmatpush3.bf16.msra.mxu1 %v5018_v4  ;;  %v544_v25 = vsel %vm5218_vm2, %v539_v44, %v543_v36  ;;  %v1336_v63 = vrot.slane %v5259_v9, 5  ;;  %v554_v4 = vsel %vm5218_vm2, %v549_v34, %v553_v19  ;;  %v5530_v36 = vld [vmem:[%s5173_s20 + $0x8c] sm:$0x1]  ;;  %v5546_v34 = vld [vmem:[%s5173_s20 + $0x94] sm:$0xf] }
  0x4c   : > { %4367 = vmatprep.subr.bf16.mxu1 %v5495_v52  ;;  %v583_v44 = vshll.u32 %v5504_v38, 16  ;;  %v572_v21 = vor.u32 %v571_v7, %v567_v46  ;;  %v582_v55 = vrot.slane %v580_v41, 4  ;;  %v599_v7 = vshll.u32 %v5530_v36, 16 }
  0x4d   : > { %4526 = vmatpush3.bf16.msra.mxu0 %v5011_v45  ;;  %v562_v48 = vor.u32 %v561_v59, %v558_v57  ;;  %v1339_v45 = vrot.slane %v5266_v14, 5  ;;  %v5534_v57 = vcombine.low %v544_v25, %v554_v4  ;;  %v1337_v9 = vsel %vm5425_vm5, %v3766_v8, %v1336_v63 }
  0x4e   : > { %4559 = vmatprep.subr.bf16.mxu0 %v5013_v29  ;;  %v1338_v19 = vrot.slane %v1336_v63, 4  ;;  %v585_v14 = vrot.slane %v583_v44, 5  ;;  %v589_v59 = vshll.u32 %v5524_v3, 16  ;;  %v593_v8 = vshrl.u32 %v5524_v3, 16 }
  0x4f   : > { %6278 = vst [vmem:[#allocation8_spill] sm:$0xff] %v5534_v57  ;;  %v563_v49 = vrot.slane %v562_v48, 4  ;;  %4304 = vmatmul.mubr.bf16.gmra.mrb[16].mxu1 %v5534_v57  ;;  %v573_v48 = vrot.slane %v572_v21, 4  ;;  %v3767_v44 = vrot.slane %v5271_v22, 9  ;;  %v601_v21 = vrot.slane %v599_v7, 5  ;;  %v5017_v22 = vld [vmem:[%s6247_s1 + $0x190] sm:$0xff]  }
  0x50   : > { %4528 = vmatmul.mubr.bf16.vlgmr.msra.gmra.mrb[0].mxu0 %v5519_v26  ;;  %v1340_v63 = vsel %vm5425_vm5, %v1338_v19, %v1339_v45  ;;  %v586_v4 = vor.u32 %v585_v14, %v582_v55  ;;  %v591_v41 = vrot.slane %v589_v59, 5  ;;  %v1346_v45 = vrot.slane %v5285_v35, 5  ;;  %v5582_v59 = vld [vmem:[%s5173_s20 + $0x9c] sm:$0xf] }
  0x51   : > { %v568_v25 = vsel %vm5218_vm2, %v563_v49, %v567_v46  ;;  %4560 = vmatpush3.bf16.msra.mxu0 %v5013_v29  ;;  %v578_v57 = vsel %vm5218_vm2, %v573_v48, %v577_v42  ;;  %v5559_v46 = vcombine.low %v1337_v9, %v1340_v63  ;;  %v595_v49 = vrot.slane %v593_v8, 4  ;;  %v5570_v42 = vld [vmem:[%s5173_s20 + $0x98] sm:$0x1]  ;;  %v5585_v63 = vld [vmem:[%s5173_s20 + $0xa0] sm:$0xf] }
  0x52   : > { %v5561_v17 = vcombine.low %v568_v25, %v578_v57  ;;  %v587_v61 = vrot.slane %v586_v4, 4  ;;  %4561 = vmatprep.subr.bf16.mxu0 %v5015_v31  ;;  %v604_v57 = vshrl.u32 %v5543_v24, 16  ;;  %v607_v9 = vshll.u32 %v5543_v24, 16 }
  0x53   : > { %4531 = vmatprep.mubr.bf16.mxu0 %v5559_v46  ;;  %v596_v29 = vor.u32 %v595_v49, %v591_v41  ;;  %v613_v19 = vshll.u32 %v5546_v34, 16  ;;  %v1344_v35 = vsel %vm5425_vm5, %v3767_v44, %v1343_v20  ;;  %v1345_v55 = vrot.slane %v1343_v20, 4  ;;  %v5592_v20 = vld [vmem:[%s5173_s20 + $0xa4] sm:$0x1] }
  0x54   : > { %6279 = vst [vmem:[#allocation9_spill] sm:$0xff] %v5561_v17  ;;  %4307 = vmatprep.mubr.bf16.mxu1 %v5561_v17  ;;  %v592_v30 = vsel %vm5218_vm2, %v587_v61, %v591_v41  ;;  %v617_v14 = vshrl.u32 %v5546_v34, 16  ;;  %v606_v48 = vrot.slane %v604_v57, 4  ;;  %v609_v8 = vrot.slane %v607_v9, 5 }
  0x55   : > { %v597_v25 = vrot.slane %v596_v29, 4  ;;  %4562 = vmatpush3.bf16.msra.mxu0 %v5015_v31  ;;  %v615_v7 = vrot.slane %v613_v19, 5  ;;  %v1347_v4 = vsel %vm5425_vm5, %v1345_v55, %v1346_v45  ;;  %v623_v61 = vshll.u32 %v5570_v42, 16  ;;  %v5019_v45 = vld [vmem:[%s6247_s1 + $0x198] sm:$0xff]  }
  0x56   : > { %v619_v49 = vrot.slane %v617_v14, 4  ;;  %v3768_v41 = vrot.slane %v5300_v58, 9  ;;  %4563 = vmatprep.subr.bf16.mxu0 %v5017_v22  ;;  %v5596_v44 = vcombine.low %v1344_v35, %v1347_v4  ;;  %v610_v29 = vor.u32 %v609_v8, %v606_v48 }
  0x57   : > { %v602_v31 = vsel %vm5218_vm2, %v597_v25, %v601_v21  ;;  %v1350_v57 = vrot.slane %v5314_v0, 5  ;;  %v625_v58 = vrot.slane %v623_v61, 5  ;;  %v1353_v55 = vrot.slane %v5317_v1, 5  ;;  %v5610_v25 = vld [vmem:[%s5173_s20 + $0xa8] sm:$0xf] }
  0x58   : > { %v5602_v9 = vcombine.low %v592_v30, %v602_v31  ;;  %v620_v19 = vor.u32 %v619_v49, %v615_v7  ;;  %4532 = vmatmul.mubr.bf16.gmra.mrb[4].mxu0 %v5596_v44  ;;  %v611_v14 = vrot.slane %v610_v29, 4  ;;  %v628_v0 = vshrl.u32 %v5582_v59, 16  ;;  %v5023_v30 = vld [vmem:[%s6247_s1 + $0x1a0] sm:$0xff]   ;;  %v5620_v49 = vld [vmem:[%s5173_s20 + $0xac] sm:$0xf] }
  0x59   : > { %v1351_v21 = vsel %vm5425_vm5, %v3768_v41, %v1350_v57  ;;  %v1352_v35 = vrot.slane %v1350_v57, 4  ;;  %v631_v1 = vshll.u32 %v5582_v59, 16  ;;  %v637_v8 = vshll.u32 %v5585_v63, 16  ;;  %4564 = vmatpush3.bf16.msra.mxu0 %v5017_v22 }
  0x5a   : > { %6280 = vst [vmem:[#allocation10_spill] sm:$0xff] %v5602_v9  ;;  %4308 = vmatmul.mubr.bf16.gmra.mrb[20].mxu1 %v5602_v9  ;;  %v621_v48 = vrot.slane %v620_v19, 4  ;;  %v641_v4 = vshrl.u32 %v5585_v63, 16  ;;  %v616_v61 = vsel %vm5218_vm2, %v611_v14, %v615_v7  ;;  %v630_v31 = vrot.slane %v628_v0, 4  ;;  %4565 = vmatprep.subr.bf16.mxu0 %v5019_v45  ;;  %v5635_v14 = vld [vmem:[%s5173_s20 + $0xb0] sm:$0x1] }
  0x5b   : > { %v1354_v41 = vsel %vm5425_vm5, %v1352_v35, %v1353_v55  ;;  %v647_v29 = vshll.u32 %v5592_v20, 16  ;;  %v633_v9 = vrot.slane %v631_v1, 5  ;;  %v639_v17 = vrot.slane %v637_v8, 5 }
  0x5c   : > { %v626_v57 = vsel %vm5218_vm2, %v621_v48, %v625_v58  ;;  %v5629_v19 = vcombine.low %v1351_v21, %v1354_v41  ;;  %v643_v56 = vrot.slane %v641_v4, 4  ;;  %v3769_v7 = vrot.slane %v5331_v27, 9 }
  0x5d   : > { %v5631_v22 = vcombine.low %v616_v61, %v626_v57  ;;  %v649_v18 = vrot.slane %v647_v29, 5  ;;  %v634_v55 = vor.u32 %v633_v9, %v630_v31  ;;  %v1357_v35 = vrot.slane %v5334_v28, 5  ;;  %4566 = vmatpush3.bf16.msra.mxu0 %v5019_v45  ;;  %v5027_v28 = vld [vmem:[%s6247_s1 + $0x1a8] sm:$0xff]  }
  0x5e   : > { %4535 = vmatprep.mubr.bf16.mxu0 %v5629_v19  ;;  %v1360_v0 = vrot.slane %v5340_v33, 5  ;;  %v652_v58 = vshrl.u32 %v5610_v25, 16  ;;  %v644_v21 = vor.u32 %v643_v56, %v639_v17  ;;  %v655_v48 = vshll.u32 %v5610_v25, 16  ;;  %4567 = vmatprep.subr.bf16.mxu0 %v5023_v30 }
  0x5f   : > { %6281 = vst [vmem:[#allocation11_spill] sm:$0xff] %v5631_v22  ;;  %4311 = vmatprep.mubr.bf16.mxu1 %v5631_v22  ;;  %v661_v1 = vshll.u32 %v5620_v49, 16  ;;  %v665_v27 = vshrl.u32 %v5620_v49, 16  ;;  %v635_v9 = vrot.slane %v634_v55, 4  ;;  %v1358_v33 = vsel %vm5425_vm5, %v3769_v7, %v1357_v35  ;;  %v5657_v22 = vld [vmem:[%s5173_s20 + $0xb4] sm:$0xf] }
  0x60   : > { %v1359_v45 = vrot.slane %v1357_v35, 4  ;;  %v654_v8 = vrot.slane %v652_v58, 4  ;;  %v645_v56 = vrot.slane %v644_v21, 4  ;;  %v657_v4 = vrot.slane %v655_v48, 5  ;;  %v5664_v48 = vld [vmem:[%s5173_s20 + $0xb8] sm:$0xf] }
  0x61   : > { %v663_v61 = vrot.slane %v661_v1, 5  ;;  %v667_v41 = vrot.slane %v665_v27, 4  ;;  %v640_v31 = vsel %vm5218_vm2, %v635_v9, %v639_v17  ;;  %v671_v57 = vshll.u32 %v5635_v14, 16  ;;  %4568 = vmatpush3.bf16.msra.mxu0 %v5023_v30  ;;  %v5031_v17 = vld [vmem:[%s6247_s1 + $0x1b0] sm:$0xff]   ;;  %v5674_v27 = vld [vmem:[%s5173_s20 + $0xbc] sm:$0x1] }
  0x62   : > { %v1361_v29 = vsel %vm5425_vm5, %v1359_v45, %v1360_v0  ;;  %v3770_v55 = vrot.slane %v5368_v5, 9  ;;  %v650_v7 = vsel %vm5218_vm2, %v645_v56, %v649_v18  ;;  %v658_v58 = vor.u32 %v657_v4, %v654_v8  ;;  %4569 = vmatprep.subr.bf16.mxu0 %v5027_v28  ;;  %v5035_v4 = vld [vmem:[%s6247_s1 + $0x1b8] sm:$0xff]  }
  0x63   : > { %v5661_v35 = vcombine.low %v1358_v33, %v1361_v29  ;;  %v668_v21 = vor.u32 %v667_v41, %v663_v61  ;;  %v5669_v0 = vcombine.low %v640_v31, %v650_v7  ;;  %v673_v5 = vrot.slane %v671_v57, 5 }
  0x64   : > { %v1364_v1 = vrot.slane %v5371_v6, 5  ;;  %v1367_v30 = vrot.slane %v5374_v10, 5  ;;  %v659_v18 = vrot.slane %v658_v58, 4  ;;  %v676_v33 = vshrl.u32 %v5657_v22, 16 }
  0x65   : > { %6282 = vst [vmem:[#allocation12_spill] sm:$0xff] %v5669_v0  ;;  %4536 = vmatmul.mubr.bf16.gmra.mrb[8].mxu0 %v5661_v35  ;;  %v669_v9 = vrot.slane %v668_v21, 4  ;;  %v679_v45 = vshll.u32 %v5657_v22, 16  ;;  %4312 = vmatmul.mubr.bf16.gmra.mrb[24].mxu1 %v5669_v0  ;;  %v685_v6 = vshll.u32 %v5664_v48, 16  ;;  %v689_v10 = vshrl.u32 %v5664_v48, 16 }
  0x66   : > { %v1365_v8 = vsel %vm5425_vm5, %v3770_v55, %v1364_v1  ;;  %v1366_v56 = vrot.slane %v1364_v1, 4  ;;  %4570 = vmatpush3.bf16.msra.mxu0 %v5027_v28  ;;  %v664_v41 = vsel %vm5218_vm2, %v659_v18, %v663_v61  ;;  %v678_v29 = vrot.slane %v676_v33, 4 }
  0x67   : > { %v674_v31 = vsel %vm5218_vm2, %v669_v9, %v673_v5  ;;  %v681_v57 = vrot.slane %v679_v45, 5  ;;  %4571 = vmatprep.subr.bf16.mxu0 %v5031_v17  ;;  %v687_v58 = vrot.slane %v685_v6, 5  ;;  %v691_v28 = vrot.slane %v689_v10, 4 }
  0x68   : > { %v5691_v55 = vcombine.low %v664_v41, %v674_v31  ;;  %v1368_v7 = vsel %vm5425_vm5, %v1366_v56, %v1367_v30  ;;  %v695_v0 = vshll.u32 %v5674_v27, 16  ;;  %v3771_v61 = vrot.slane %v5394_v32, 9  ;;  %v5706_v30 = vld [vmem:[%s6247_s1 + $0x1c0] sm:$0xff]  }
  0x69   : > { %v5695_v21 = vcombine.low %v1365_v8, %v1368_v7  ;;  %v682_v1 = vor.u32 %v681_v57, %v678_v29  ;;  %v692_v5 = vor.u32 %v691_v28, %v687_v58  ;;  %v1371_v18 = vrot.slane %v5402_v47, 5 }
  0x6a   : > { %4315 = vmatprep.mubr.bf16.mxu1 %v5691_v55  ;;  %v1374_v9 = vrot.slane %v5408_v50, 5  ;;  %v3772_v33 = vrot.slane %v5436_v40, 9  ;;  %4572 = vmatpush3.bf16.msra.mxu0 %v5031_v17  ;;  %v697_v8 = vrot.slane %v695_v0, 5  ;;  %v1378_v56 = vrot.slane %v5443_v53, 5 }
  0x6b   : > { %4539 = vmatprep.mubr.bf16.mxu0 %v5695_v21  ;;  %v683_v45 = vrot.slane %v682_v1, 4  ;;  %v1381_v6 = vrot.slane %v5451_v62, 5  ;;  %4573 = vmatprep.subr.bf16.mxu0 %v5035_v4  ;;  %v693_v10 = vrot.slane %v692_v5, 4  ;;  %v1372_v50 = vsel %vm5425_vm5, %v3771_v61, %v1371_v18 }
  0x6c   : > { %v1373_v41 = vrot.slane %v1371_v18, 4  ;;  %v3773_v17 = vrot.slane %v5466_v2, 9  ;;  %v1379_v29 = vsel %vm5425_vm5, %v3772_v33, %v1378_v56  ;;  %v1380_v57 = vrot.slane %v1378_v56, 4 }
  0x6d   : > { %v688_v31 = vsel %vm5218_vm2, %v683_v45, %v687_v58  ;;  %v1385_v0 = vrot.slane %v5480_v54, 5  ;;  %v698_v62 = vsel %vm5218_vm2, %v693_v10, %v697_v8  ;;  %v1388_v28 = vrot.slane %v5487_v16, 5 }
  0x6e   : > { %v1375_v7 = vsel %vm5425_vm5, %v1373_v41, %v1374_v9  ;;  %v3774_v1 = vrot.slane %v5504_v38, 9  ;;  %4574 = vmatpush3.bf16.msra.mxu0 %v5035_v4  ;;  %v5725_v61 = vcombine.low %v688_v31, %v698_v62  ;;  %v1382_v5 = vsel %vm5425_vm5, %v1380_v57, %v1381_v6  ;;  %v5026_v57 = vld [vmem:[%s6247_s1 + $0x88] sm:$0xff]  }
  0x6f   : > { %v5727_v58 = vcombine.low %v1372_v50, %v1375_v7  ;;  %4607 = vmatprep.subr.bf16.mxu0 %v5706_v30  ;;  %v5732_v18 = vcombine.low %v1379_v29, %v1382_v5  ;;  %v1387_v33 = vrot.slane %v1385_v0, 4  ;;  %v1392_v45 = vrot.slane %v5524_v3, 5 }
  0x70   : > { %v1395_v9 = vrot.slane %v5530_v36, 5  ;;  %4316 = vmatmul.mubr.bf16.gmra.mrb[28].mxu1 %v5725_v61  ;;  %v6283_v16 = vcombine.low %v5182_v12, %v5185_v13  ;;  %v1386_v4 = vsel %vm5425_vm5, %v3773_v17, %v1385_v0  ;;  %v1399_v6 = vrot.slane %v5546_v34, 5 }
  0x71   : > { %4540 = vmatmul.mubr.bf16.gmra.mrb[12].mxu0 %v5727_v58  ;;  %v1389_v8 = vsel %vm5425_vm5, %v1387_v33, %v1388_v28  ;;  %v1394_v56 = vrot.slane %v1392_v45, 4  ;;  %v1406_v36 = vrot.slane %v5585_v63, 5  ;;  %v1393_v10 = vsel %vm5425_vm5, %v3774_v1, %v1392_v45 }
  0x72   : > { %4335 = vmatprep.mubr.bf16.mxu1 %v6283_v16  ;;  %4543 = vmatprep.mubr.bf16.mxu0 %v5732_v18  ;;  %v5752_v13 = vcombine.low %v1386_v4, %v1389_v8  ;;  %v3775_v50 = vrot.slane %v5543_v24, 9  ;;  %v1402_v41 = vrot.slane %v5570_v42, 5  ;;  %v1401_v17 = vrot.slane %v1399_v6, 4 }
  0x73   : > { %v1396_v12 = vsel %vm5425_vm5, %v1394_v56, %v1395_v9  ;;  %v3776_v31 = vrot.slane %v5582_v59, 9  ;;  %v1408_v0 = vrot.slane %v1406_v36, 4  ;;  %v1409_v62 = vrot.slane %v5592_v20, 5 }
  0x74   : > { %v5757_v29 = vcombine.low %v1393_v10, %v1396_v12  ;;  %v1400_v7 = vsel %vm5425_vm5, %v3775_v50, %v1399_v6  ;;  %v1413_v42 = vrot.slane %v5620_v49, 5  ;;  %v5770_v28 = vcombine.low %v5394_v32, %v5402_v47  ;;  %v5030_v47 = vld [vmem:[%s6247_s1 + $0x90] sm:$0xff]   ;;  %v292_v6 = vld [vmem:[%s5173_s20 + $0xc8] sm:$0x1]  ;;  %v5075_v10 = vld [vmem:[%s5173_s20 + $0x40] sm:$0xf] }
  0x75   : > { %v1403_v20 = vsel %vm5425_vm5, %v1401_v17, %v1402_v41  ;;  %v1407_v1 = vsel %vm5425_vm5, %v3776_v31, %v1406_v36  ;;  %v3777_v5 = vrot.slane %v5610_v25, 9  ;;  %v5781_v33 = vcombine.low %v5436_v40, %v5443_v53  ;;  %v5074_v36 = vld [vmem:[%s5173_s20 + $0x3c] sm:$0xf]  ;;  %v5076_v41 = vld [vmem:[%s5173_s20 + $0x48] sm:$0xf] }
  0x76   : > { %v1410_v32 = vsel %vm5425_vm5, %v1408_v0, %v1409_v62  ;;  %v5792_v45 = vcombine.low %v5466_v2, %v5480_v54  ;;  %v5796_v40 = vcombine.low %v5504_v38, %v5524_v3  ;;  %v5800_v53 = vcombine.low %v5543_v24, %v5546_v34  ;;  %v5820_v24 = vld [vmem:[%s5173_s20 + $0xc4] sm:$0xf]  ;;  %v5077_v17 = vld [vmem:[%s5173_s20 + $0x4c] sm:$0xf] }
  0x77   : > { %v5804_v9 = vcombine.low %v5582_v59, %v5585_v63  ;;  %v5808_v16 = vcombine.low %v5610_v25, %v5620_v49  ;;  %v5810_v4 = vcombine.low %v1400_v7, %v1403_v20  ;;  %v1415_v2 = vrot.slane %v1413_v42, 4  ;;  %v5034_v25 = vld [vmem:[%s6247_s1 + $0x98] sm:$0xff]  }
  0x78   : > { %4336 = vmatmul.mubr.bf16.vlgmr.msra.gmra.mrb[0].mxu1 %v5231_v43  ;;  %v1416_v54 = vrot.slane %v5635_v14, 5  ;;  %v5815_v38 = vcombine.low %v5657_v22, %v5664_v48  ;;  %v5817_v3 = vcombine.low %v1407_v1, %v1410_v32  ;;  %v3778_v34 = vrot.slane %v5657_v22, 9  ;;  %v5834_v14 = vld [vmem:[%s5173_s20 + $0xc0] sm:$0xf] }
  0x79   : > { %4544 = vmatmul.mubr.bf16.gmra.mrb[16].mxu0 %v5752_v13  ;;  %4368 = vmatpush3.bf16.msra.mxu1 %v5495_v52  ;;  %v1420_v52 = vrot.slane %v5664_v48, 5  ;;  %v1423_v63 = vrot.slane %v5674_v27, 5  ;;  %v1414_v49 = vsel %vm5425_vm5, %v3777_v5, %v1413_v42  ;;  %v2300_v48 = vrot.slane %v5820_v24, 5  ;;  %v5038_v27 = vld [vmem:[%s6247_s1 + $0xa0] sm:$0xff]  }
  0x7a   : > { %4339 = vmatprep.mubr.bf16.mxu1 %v5307_v60  ;;  %4547 = vmatprep.mubr.bf16.mxu0 %v5757_v29  ;;  %v1417_v22 = vsel %vm5425_vm5, %v1415_v2, %v1416_v54  ;;  %v5849_v12 = vcombine.low %v5074_v36, %v5075_v10  ;;  %v5855_v31 = vcombine.low %v5076_v41, %v5077_v17  ;;  %v2015_v0 = vshll.u32 %v5834_v14, 16  ;;  %v5042_v54 = vld [vmem:[%s6247_s1 + $0xa8] sm:$0xff]   ;;  %v5046_v36 = vld [vmem:[%s6247_s1 + $0xb0] sm:$0xff]   ;;  %v5079_v10 = vld [vmem:[%s5173_s20 + $0x58] sm:$0xf] }
  0x7b   : > { %4369 = vmatprep.subr.bf16.mxu1 %v5026_v57  ;;  %v1422_v59 = vrot.slane %v1420_v52, 4  ;;  %v1421_v8 = vsel %vm5425_vm5, %v3778_v34, %v1420_v52  ;;  %v5851_v50 = vcombine.low %v1414_v49, %v1417_v22  ;;  %v2021_v62 = vshll.u32 %v5820_v24, 16 }
  0x7c   : > { %v2025_v7 = vshrl.u32 %v5820_v24, 16  ;;  %v3869_v20 = vrot.slane %v5834_v14, 9  ;;  %v2302_v1 = vrot.slane %v2300_v48, 4  ;;  %v2303_v5 = vrot.slane %v292_v6, 5 }
  0x7d   : > { %4370 = vmatpush3.bf16.msra.mxu1 %v5026_v57  ;;  %v1424_v56 = vsel %vm5425_vm5, %v1422_v59, %v1423_v63  ;;  %v2012_v57 = vshrl.u32 %v5834_v14, 16  ;;  %v2023_v52 = vrot.slane %v2021_v62, 5  ;;  %v2031_v63 = vshll.u32 %v292_v6, 16  ;;  %v5078_v6 = vld [vmem:[%s5173_s20 + $0x54] sm:$0xf]  ;;  %v5052_v62 = vld [vmem:[%s6247_s1 + $0xc0] sm:$0xff]  }
  0x7e   : > { %4371 = vmatprep.subr.bf16.mxu1 %v5030_v47  ;;  %v5861_v42 = vcombine.low %v1421_v8, %v1424_v56  ;;  %v2027_v2 = vrot.slane %v2025_v7, 4  ;;  %v2304_v49 = vsel %vm5425_vm5, %v2302_v1, %v2303_v5  ;;  %v5880_v41 = vcombine.low %v5078_v6, %v5079_v10  ;;  %v5043_v7 = vld [vmem:[%s6247_s1 + $0x1c8] sm:$0xff]   ;;  %v5051_v1 = vld [vmem:[%s6247_s1 + $0x1d8] sm:$0xff]   ;;  %v5056_v6 = vld [vmem:[%s6247_s1 + $0xd0] sm:$0xff]  }
  0x7f   : > { %v2014_v32 = vrot.slane %v2012_v57, 4  ;;  %v2033_v56 = vrot.slane %v2031_v63, 5  ;;  %v5059_v10 = vld [vmem:[%s6247_s1 + $0xd8] sm:$0xff]  }
  0x80   : > { %4340 = vmatmul.mubr.bf16.gmra.mrb[4].mxu1 %v5378_v11  ;;  %v2028_v59 = vor.u32 %v2027_v2, %v2023_v52  ;;  %v5082_v2 = vld [vmem:[%s5173_s20] sm:$0xf] }
  0x81   : > { %4548 = vmatmul.mubr.bf16.gmra.mrb[20].mxu0 %v5810_v4  ;;  %4343 = vmatprep.mubr.bf16.mxu1 %v5382_v15 }
  0x82   : > { %4551 = vmatprep.mubr.bf16.mxu0 %v5817_v3  ;;  %4372 = vmatpush3.bf16.msra.mxu1 %v5030_v47  ;;  %v2017_v47 = vrot.slane %v2015_v0, 5  ;;  %v2029_v8 = vrot.slane %v2028_v59, 4  ;;  %v5050_v0 = vld [vmem:[%s6247_s1 + $0xb8] sm:$0xff]   ;;  %v5055_v59 = vld [vmem:[%s6247_s1 + $0x1e8] sm:$0xff]  }
  0x83   : > { %4373 = vmatprep.subr.bf16.mxu1 %v5034_v25 }
  0x84   : > { %v2018_v34 = vor.u32 %v2017_v47, %v2014_v32  ;;  %v5053_v32 = vld [vmem:[%s6247_s1 + $0x1e0] sm:$0xff]   ;;  %v5081_v47 = vld [vmem:[%s5173_s20 + $0x8] sm:$0x1] }
  0x86   : > { %4374 = vmatpush3.bf16.msra.mxu1 %v5034_v25  ;;  %v2301_v25 = vsel %vm5425_vm5, %v3869_v20, %v2300_v48  ;;  %v2019_v22 = vrot.slane %v2018_v34, 4  ;;  %v5047_v20 = vld [vmem:[%s6247_s1 + $0x1d0] sm:$0xff]  }
  0x87   : > { %4375 = vmatprep.subr.bf16.mxu1 %v5038_v27  ;;  %v5882_v17 = vcombine.low %v2301_v25, %v2304_v49  ;;  %v5057_v49 = vld [vmem:[%s6247_s1 + $0x1f0] sm:$0xff]  }
  0x88   : > { %4344 = vmatmul.mubr.bf16.gmra.mrb[8].mxu1 %v5849_v12  ;;  %v2024_v48 = vsel %vm5218_vm2, %v2019_v22, %v2023_v52  ;;  %v1318_v52 = vrot.slane %v5081_v47, 5  ;;  %v6286_v47 = vld [vmem:[#allocation4_spill] sm:$0xff] }
  0x89   : > { %4552 = vmatmul.mubr.bf16.gmra.mrb[24].mxu0 %v5851_v50  ;;  %4347 = vmatprep.mubr.bf16.mxu1 %v5855_v31 }
  0x8a   : > { %4555 = vmatprep.mubr.bf16.mxu0 %v5861_v42  ;;  %4376 = vmatpush3.bf16.msra.mxu1 %v5038_v27  ;;  %v2034_v27 = vsel %vm5218_vm2, %v2029_v8, %v2033_v56  ;;  %v5061_v8 = vld [vmem:[%s6247_s1 + $0x1f8] sm:$0xff]   ;;  %v5063_v56 = vld [vmem:[%s6247_s1 + $0x200] sm:$0xff]  }
  0x8b   : > { %4377 = vmatprep.subr.bf16.mxu1 %v5042_v54  ;;  %v5888_v57 = vcombine.low %v2024_v48, %v2034_v27  ;;  %v5969_v48 = vcombine.low %v5834_v14, %v5820_v24  ;;  %v5064_v27 = vld [vmem:[%s6247_s1 + $0xe8] sm:$0xff]   ;;  %v5066_v24 = vld [vmem:[%s6247_s1 + $0xf0] sm:$0xff]  }
  0x8e   : > { %4378 = vmatpush3.bf16.msra.mxu1 %v5042_v54  ;;  %v3763_v54 = vrot.slane %v5082_v2, 9  ;;  %v5070_v2 = vld [vmem:[%s6247_s1 + $0x220] sm:$0xff]  }
  0x8f   : > { %4379 = vmatprep.subr.bf16.mxu1 %v5046_v36 }
  0x90   : > { %4348 = vmatmul.mubr.bf16.gmra.mrb[12].mxu1 %v5880_v41 }
  0x91   : > { %4556 = vmatmul.mubr.bf16.gmra.mrb[28].mxu0 %v5882_v17  ;;  %4351 = vmatprep.mubr.bf16.mxu1 %v5770_v28 }
  0x92   : > { %4575 = vmatprep.mubr.bf16.mxu0 %v5307_v60  ;;  %4380 = vmatpush3.bf16.msra.mxu1 %v5046_v36  ;;  %v5054_v36 = vld [vmem:[%s6247_s1 + $0xc8] sm:$0xff]  }
  0x93   : > { %4381 = vmatprep.subr.bf16.mxu1 %v5050_v0 }
  0x96   : > { %4382 = vmatpush3.bf16.msra.mxu1 %v5050_v0  ;;  %v5979_v0 = vld [vmem:[%s5173_s20 + $0xcc] sm:$0xf] }
  0x97   : > { %4415 = vmatprep.subr.bf16.mxu1 %v5052_v62 }
  0x98   : > { %4352 = vmatmul.mubr.bf16.gmra.mrb[16].mxu1 %v5781_v33 }
  0x99   : > { %4576 = vmatmul.mubr.bf16.vlgmr.msra.gmra.mrb[0].mxu0 %v5378_v11  ;;  %4355 = vmatprep.mubr.bf16.mxu1 %v5792_v45 }
  0x9a   : > { %4608 = vmatpush3.bf16.msra.mxu0 %v5706_v30  ;;  %4579 = vmatprep.mubr.bf16.mxu0 %v5382_v15  ;;  %v5080_v30 = vld [vmem:[%s5173_s20 + $0x4] sm:$0xf] }
  0x9b   : > { %4609 = vmatprep.subr.bf16.mxu0 %v5043_v7  ;;  %v1315_v5 = vrot.slane %v5080_v30, 5  ;;  %v6284_v30 = vld [vmem:[#allocation2_spill] sm:$0xff] }
  0x9d   : > { %v1317_v34 = vrot.slane %v1315_v5, 4  ;;  %v1316_v63 = vsel %vm5425_vm5, %v3763_v54, %v1315_v5  ;;  %v5067_v5 = vld [vmem:[%s6247_s1 + $0x210] sm:$0xff]   ;;  %v5071_v54 = vld [vmem:[%s6247_s1 + $0x228] sm:$0xff]  }
  0x9e   : > { %4610 = vmatpush3.bf16.msra.mxu0 %v5043_v7  ;;  %v5068_v7 = vld [vmem:[%s6247_s1 + $0xf8] sm:$0xff]  }
  0x9f   : > { %4611 = vmatprep.subr.bf16.mxu0 %v5047_v20  ;;  %v1319_v25 = vsel %vm5425_vm5, %v1317_v34, %v1318_v52  ;;  %v6287_v52 = vld [vmem:[#allocation5_spill] sm:$0xff]  ;;  %v6288_v34 = vld [vmem:[#allocation6_spill] sm:$0xff] }
  0xa0   : > { %4356 = vmatmul.mubr.bf16.gmra.mrb[20].mxu1 %v5796_v40  ;;  %v3795_v22 = vcombine.low %v1316_v63, %v1319_v25  ;;  %v5072_v63 = vld [vmem:[%s6247_s1 + $0x230] sm:$0xff]   ;;  %v5073_v25 = vld [vmem:[%s6247_s1 + $0x238] sm:$0xff]  }
  0xa1   : > { %4580 = vmatmul.mubr.bf16.gmra.mrb[4].mxu0 %v5849_v12  ;;  %4359 = vmatprep.mubr.bf16.mxu1 %v5800_v53 }
  0xa2   : > { %4583 = vmatprep.mubr.bf16.mxu0 %v5855_v31  ;;  %4612 = vmatpush3.bf16.msra.mxu0 %v5047_v20  ;;  %v5065_v20 = vld [vmem:[%s6247_s1 + $0x208] sm:$0xff]  }
  0xa3   : > { %4613 = vmatprep.subr.bf16.mxu0 %v5051_v1 }
  0xa6   : > { %4614 = vmatpush3.bf16.msra.mxu0 %v5051_v1  ;;  %v5083_v1 = vld [vmem:[%s6247_s1 + $0x100] sm:$0xff]  }
  0xa7   : > { %4615 = vmatprep.subr.bf16.mxu0 %v5053_v32 }
  0xa8   : > { %4360 = vmatmul.mubr.bf16.gmra.mrb[24].mxu1 %v5804_v9 }
  0xa9   : > { %4584 = vmatmul.mubr.bf16.gmra.mrb[8].mxu0 %v5880_v41  ;;  %4363 = vmatprep.mubr.bf16.mxu1 %v5808_v16 }
  0xaa   : > { %4587 = vmatprep.mubr.bf16.mxu0 %v5770_v28  ;;  %4616 = vmatpush3.bf16.msra.mxu0 %v5053_v32  ;;  %v5069_v32 = vld [vmem:[%s6247_s1 + $0x218] sm:$0xff]  }
  0xab   : > { %4617 = vmatprep.subr.bf16.mxu0 %v5055_v59 }
  0xae   : > { %4618 = vmatpush3.bf16.msra.mxu0 %v5055_v59  ;;  %v6289_v59 = vld [vmem:[#allocation7_spill] sm:$0xff] }
  0xaf   : > { %4619 = vmatprep.subr.bf16.mxu0 %v5057_v49 }
  0xb0   : > { %4364 = vmatmul.mubr.bf16.gmra.mrb[28].mxu1 %v5815_v38 }
  0xb1   : > { %4588 = vmatmul.mubr.bf16.gmra.mrb[12].mxu0 %v5781_v33  ;;  %4383 = vmatprep.mubr.bf16.mxu1 %v3795_v22  ;;  %v6291_v22 = vld [vmem:[#allocation9_spill] sm:$0xff] }
  0xb2   : > { %4591 = vmatprep.mubr.bf16.mxu0 %v5792_v45  ;;  %4620 = vmatpush3.bf16.msra.mxu0 %v5057_v49  ;;  %v6290_v49 = vld [vmem:[#allocation8_spill] sm:$0xff] }
  0xb3   : > { %4621 = vmatprep.subr.bf16.mxu0 %v5061_v8 }
  0xb6   : > { %4622 = vmatpush3.bf16.msra.mxu0 %v5061_v8  ;;  %v6292_v8 = vld [vmem:[#allocation10_spill] sm:$0xff] }
  0xb7   : > { %4655 = vmatprep.subr.bf16.mxu0 %v5063_v56 }
  0xb8   : > { %4384 = vmatmul.mubr.bf16.vlgmr.msra.gmra.mrb[0].mxu1 %v5473_v39  ;;  %v5062_v39 = vld [vmem:[%s6247_s1 + $0xe0] sm:$0xff]  }
  0xb9   : > { %4592 = vmatmul.mubr.bf16.gmra.mrb[16].mxu0 %v5796_v40  ;;  %4416 = vmatpush3.bf16.msra.mxu1 %v5052_v62  ;;  %v5982_v62 = vld [vmem:[%s5173_s20 + $0xd0] sm:$0xf] }
  0xba   : > { %4387 = vmatprep.mubr.bf16.mxu1 %v5519_v26  ;;  %4595 = vmatprep.mubr.bf16.mxu0 %v5800_v53  ;;  %v3911_v14 = vcombine.low %v5979_v0, %v5982_v62 }
  0xbb   : > { %4417 = vmatprep.subr.bf16.mxu1 %v5054_v36 }
  0xbd   : > { %4418 = vmatpush3.bf16.msra.mxu1 %v5054_v36  ;;  %v2835_v36 = vshll.u32 %v5979_v0, 16 }
  0xbe   : > { %4419 = vmatprep.subr.bf16.mxu1 %v5056_v6 }
  0xc0   : > { %4388 = vmatmul.mubr.bf16.gmra.mrb[4].mxu1 %v5559_v46 }
  0xc1   : > { %4596 = vmatmul.mubr.bf16.gmra.mrb[20].mxu0 %v5804_v9  ;;  %4391 = vmatprep.mubr.bf16.mxu1 %v5596_v44 }
  0xc2   : > { %4599 = vmatprep.mubr.bf16.mxu0 %v5808_v16  ;;  %4420 = vmatpush3.bf16.msra.mxu1 %v5056_v6  ;;  %v2845_v6 = vshrl.u32 %v5982_v62, 16 }
  0xc3   : > { %4421 = vmatprep.subr.bf16.mxu1 %v5059_v10 }
  0xc6   : > { %4422 = vmatpush3.bf16.msra.mxu1 %v5059_v10  ;;  %v6293_v10 = vld [vmem:[#allocation11_spill] sm:$0xff] }
  0xc7   : > { %4423 = vmatprep.subr.bf16.mxu1 %v5062_v39 }
  0xc8   : > { %4392 = vmatmul.mubr.bf16.gmra.mrb[8].mxu1 %v5629_v19 }
  0xc9   : > { %4600 = vmatmul.mubr.bf16.gmra.mrb[24].mxu0 %v5815_v38  ;;  %4395 = vmatprep.mubr.bf16.mxu1 %v5661_v35 }
  0xca   : > { %4603 = vmatprep.mubr.bf16.mxu0 %v5969_v48  ;;  %4424 = vmatpush3.bf16.msra.mxu1 %v5062_v39 }
  0xcb   : > { %4425 = vmatprep.subr.bf16.mxu1 %v5064_v27 }
  0xce   : > { %4426 = vmatpush3.bf16.msra.mxu1 %v5064_v27  ;;  %v2837_v27 = vrot.slane %v2835_v36, 5 }
  0xcf   : > { %4427 = vmatprep.subr.bf16.mxu1 %v5066_v24 }
  0xd0   : > { %4396 = vmatmul.mubr.bf16.gmra.mrb[12].mxu1 %v5695_v21 }
  0xd1   : > { %4604 = vmatmul.mubr.bf16.gmra.mrb[28].mxu0 %v3911_v14  ;;  %4399 = vmatprep.mubr.bf16.mxu1 %v5727_v58  ;;  %v2847_v14 = vrot.slane %v2845_v6, 4 }
  0xd2   : > { %4623 = vmatprep.mubr.bf16.mxu0 %v5295_v51  ;;  %4428 = vmatpush3.bf16.msra.mxu1 %v5066_v24  ;;  %v6285_v51 = vld [vmem:[#allocation3_spill] sm:$0xff] }
  0xd3   : > { %4429 = vmatprep.subr.bf16.mxu1 %v5068_v7 }
  0xd6   : > { %4430 = vmatpush3.bf16.msra.mxu1 %v5068_v7  ;;  %v5085_v7 = vld [vmem:[%s6247_s1 + $0x110] sm:$0xff]  }
  0xd7   : > { %4703 = vmatprep.subr.bf16.mxu1 %v5083_v1 }
  0xd8   : > { %4400 = vmatmul.mubr.bf16.gmra.mrb[16].mxu1 %v5732_v18 }
  0xd9   : > { %4624 = vmatmul.mubr.bf16.vlgmr.msra.gmra.mrb[0].mxu0 %v6284_v30  ;;  %4403 = vmatprep.mubr.bf16.mxu1 %v5752_v13 }
  0xda   : > { %4656 = vmatpush3.bf16.msra.mxu0 %v5063_v56  ;;  %4627 = vmatprep.mubr.bf16.mxu0 %v6285_v51  ;;  %v2832_v56 = vshrl.u32 %v5979_v0, 16 }
  0xdb   : > { %4657 = vmatprep.subr.bf16.mxu0 %v5065_v20 }
  0xdc   : > { %v2834_v39 = vrot.slane %v2832_v56, 4 }
  0xde   : > { %4658 = vmatpush3.bf16.msra.mxu0 %v5065_v20  ;;  %v6294_v20 = vld [vmem:[#allocation12_spill] sm:$0xff] }
  0xdf   : > { %4659 = vmatprep.subr.bf16.mxu0 %v5067_v5 }
  0xe0   : > { %4404 = vmatmul.mubr.bf16.gmra.mrb[20].mxu1 %v5757_v29 }
  0xe1   : > { %4628 = vmatmul.mubr.bf16.gmra.mrb[4].mxu0 %v6286_v47  ;;  %4407 = vmatprep.mubr.bf16.mxu1 %v5810_v4 }
  0xe2   : > { %4631 = vmatprep.mubr.bf16.mxu0 %v6287_v52  ;;  %4660 = vmatpush3.bf16.msra.mxu0 %v5067_v5  ;;  %v5086_v5 = vld [vmem:[%s6247_s1 + $0x118] sm:$0xff]  }
  0xe3   : > { %4661 = vmatprep.subr.bf16.mxu0 %v5069_v32 }
  0xe6   : > { %4662 = vmatpush3.bf16.msra.mxu0 %v5069_v32 }
  0xe7   : > { %4663 = vmatprep.subr.bf16.mxu0 %v5070_v2 }
  0xe8   : > { %4408 = vmatmul.mubr.bf16.gmra.mrb[24].mxu1 %v5817_v3 }
  0xe9   : > { %4632 = vmatmul.mubr.bf16.gmra.mrb[8].mxu0 %v6288_v34  ;;  %4411 = vmatprep.mubr.bf16.mxu1 %v5851_v50 }
  0xea   : > { %4635 = vmatprep.mubr.bf16.mxu0 %v6289_v59  ;;  %4664 = vmatpush3.bf16.msra.mxu0 %v5070_v2 }
  0xeb   : > { %4665 = vmatprep.subr.bf16.mxu0 %v5071_v54 }
  0xee   : > { %4666 = vmatpush3.bf16.msra.mxu0 %v5071_v54  ;;  %v5088_v54 = vld [vmem:[%s6247_s1 + $0x128] sm:$0xff]  }
  0xef   : > { %4667 = vmatprep.subr.bf16.mxu0 %v5072_v63 }
  0xf0   : > { %4412 = vmatmul.mubr.bf16.gmra.mrb[28].mxu1 %v5861_v42 }
  0xf1   : > { %4636 = vmatmul.mubr.bf16.gmra.mrb[12].mxu0 %v6290_v49  ;;  %4431 = vmatprep.mubr.bf16.mxu1 %v5231_v43  ;;  %v2841_v43 = vshll.u32 %v5982_v62, 16 }
  0xf2   : > { %4639 = vmatprep.mubr.bf16.mxu0 %v6291_v22  ;;  %4668 = vmatpush3.bf16.msra.mxu0 %v5072_v63  ;;  %v6152_v63 = vld [vmem:[%s6249_s3] ss:$0 sm:$0xff] }
  0xf3   : > { %4669 = vmatprep.subr.bf16.mxu0 %v5073_v25  ;;  %v2843_v24 = vrot.slane %v2841_v43, 5 }
  0xf5   : > { %v2848_v30 = vor.u32 %v2847_v14, %v2843_v24 }
  0xf6   : > { %4670 = vmatpush3.bf16.msra.mxu0 %v5073_v25 }
  0xf7   : > { %v2849_v47 = vrot.slane %v2848_v30, 4 }
  0xf8   : > { %4432 = vmatmul.mubr.bf16.vlgmr.msra.gmra.mrb[0].mxu1 %v5307_v60  ;;  %v5084_v60 = vld [vmem:[%s6247_s1 + $0x108] sm:$0xff]  }
  0xf9   : > { %4640 = vmatmul.mubr.bf16.gmra.mrb[16].mxu0 %v6292_v8  ;;  %4711 = vmatpush3.bf16.msra.mxu1 %v5083_v1  ;;  %v2838_v1 = vor.u32 %v2837_v27, %v2834_v39 }
  0xfa   : > { %4435 = vmatprep.mubr.bf16.mxu1 %v5378_v11  ;;  %4643 = vmatprep.mubr.bf16.mxu0 %v6293_v10  ;;  %v6050_v11 = vld [vmem:[%s5173_s20 + $0xd4] sm:$0x1] }
  0xfb   : > { %4704 = vmatprep.subr.bf16.mxu1 %v5084_v60  ;;  %v2851_v51 = vshll.u32 %v6050_v11, 16  ;;  %v2839_v32 = vrot.slane %v2838_v1, 4 }
  0xfd   : > { %4712 = vmatpush3.bf16.msra.mxu1 %v5084_v60  ;;  %v2853_v52 = vrot.slane %v2851_v51, 5 }
  0xfe   : > { %4705 = vmatprep.subr.bf16.mxu1 %v5085_v7 }
  0xff   : > { %v2854_v2 = vsel %vm5218_vm2, %v2849_v47, %v2853_v52 }
 0x100   : > { %4436 = vmatmul.mubr.bf16.gmra.mrb[4].mxu1 %v5382_v15  ;;  %v5087_v15 = vld [vmem:[%s6247_s1 + $0x120] sm:$0xff]  }
 0x101   : > { %4644 = vmatmul.mubr.bf16.gmra.mrb[20].mxu0 %v6294_v20  ;;  %4439 = vmatprep.mubr.bf16.mxu1 %v5849_v12  ;;  %v2844_v12 = vsel %vm5218_vm2, %v2839_v32, %v2843_v24  ;;  %v4042_v32 = vld [vmem:[%s6139_s6 + $0x18] sm:$0xff]  }
 0x102   : > { %4647 = vmatprep.mubr.bf16.mxu0 %v5691_v55  ;;  %4713 = vmatpush3.bf16.msra.mxu1 %v5085_v7  ;;  %v3936_v34 = vcombine.low %v2844_v12, %v2854_v2 }
 0x103   : > { %4706 = vmatprep.subr.bf16.mxu1 %v5086_v5 }
 0x106   : > { %4714 = vmatpush3.bf16.msra.mxu1 %v5086_v5 }
 0x107   : > { %4707 = vmatprep.subr.bf16.mxu1 %v5087_v15 }
 0x108   : > { %4440 = vmatmul.mubr.bf16.gmra.mrb[8].mxu1 %v5855_v31  ;;  %v5089_v31 = vld [vmem:[%s6247_s1 + $0x130] sm:$0xff]  }
 0x109   : > { %4648 = vmatmul.mubr.bf16.gmra.mrb[24].mxu0 %v5725_v61  ;;  %4443 = vmatprep.mubr.bf16.mxu1 %v5880_v41 }
 0x10a   : > { %4651 = vmatprep.mubr.bf16.mxu0 %v5888_v57  ;;  %4715 = vmatpush3.bf16.msra.mxu1 %v5087_v15 }
 0x10b   : > { %4708 = vmatprep.subr.bf16.mxu1 %v5088_v54 }
 0x10e   : > { %4716 = vmatpush3.bf16.msra.mxu1 %v5088_v54 }
 0x10f   : > { %4709 = vmatprep.subr.bf16.mxu1 %v5089_v31 }
 0x110   : > { %4444 = vmatmul.mubr.bf16.gmra.mrb[12].mxu1 %v5770_v28 }
 0x111   : > { %4652 = vmatmul.mubr.bf16.gmra.mrb[28].mxu0 %v3936_v34  ;;  %4447 = vmatprep.mubr.bf16.mxu1 %v5781_v33 }
 0x112   : > { %4671 = vmatprep.mubr.bf16.mxu0 %v5519_v26  ;;  %4717 = vmatpush3.bf16.msra.mxu1 %v5089_v31  ;;  %v3120_v26 = vrot.slane %v5982_v62, 5 }
 0x113   : > { %4710 = vmatprep.subr.bf16.mxu1 %v5090_v37 }
 0x116   : > { %4718 = vmatpush3.bf16.msra.mxu1 %v5090_v37 }
 0x118   : > { %4448 = vmatmul.mubr.bf16.gmra.mrb[16].mxu1 %v5792_v45 }
 0x119   : > { %4672 = vmatmul.mubr.bf16.vlgmr.msra.gmra.mrb[0].mxu0 %v5559_v46  ;;  %4451 = vmatprep.mubr.bf16.mxu1 %v5796_v40  ;;  %v3945_v46 = vrot.slane %v5979_v0, 9 }
 0x11a   : > { %4675 = vmatprep.mubr.bf16.mxu0 %v5596_v44  ;;  %v3122_v44 = vrot.slane %v3120_v26, 4 }
 0x120   : > { %4452 = vmatmul.mubr.bf16.gmra.mrb[20].mxu1 %v5800_v53 }
 0x121   : > { %4676 = vmatmul.mubr.bf16.gmra.mrb[4].mxu0 %v5629_v19  ;;  %4455 = vmatprep.mubr.bf16.mxu1 %v5804_v9  ;;  %v3123_v19 = vrot.slane %v6050_v11, 5 }
 0x122   : > { %4679 = vmatprep.mubr.bf16.mxu0 %v5661_v35  ;;  %v3121_v35 = vsel %vm5425_vm5, %v3945_v46, %v3120_v26 }
 0x128   : > { %4456 = vmatmul.mubr.bf16.gmra.mrb[24].mxu1 %v5808_v16 }
 0x129   : > { %4680 = vmatmul.mubr.bf16.gmra.mrb[8].mxu0 %v5695_v21  ;;  %4459 = vmatprep.mubr.bf16.mxu1 %v5815_v38  ;;  %v3124_v21 = vsel %vm5425_vm5, %v3122_v44, %v3123_v19  ;;  %v3990_v19 = vunpack.c.l.bf16 %v4042_v32 }
 0x12a   : > { %4683 = vmatprep.mubr.bf16.mxu0 %v5727_v58  ;;  %v3962_v58 = vcombine.low %v3121_v35, %v3124_v21 }
 0x130   : > { %4460 = vmatmul.mubr.bf16.gmra.mrb[28].mxu1 %v5969_v48  ;;  %v4040_v48 = vld [vmem:[%s6139_s6 + $0x8] sm:$0xff]  }
 0x131   : > { %4684 = vmatmul.mubr.bf16.gmra.mrb[12].mxu0 %v5732_v18  ;;  %4495 = vmatprep.mubr.bf16.mxu1 %v6290_v49  ;;  %v3982_v36 = vunpack.c.l.bf16 %v4040_v48  ;;  %v3983_v24 = vunpack.c.h.bf16 %v4040_v48 }
 0x132   : > { %4687 = vmatprep.mubr.bf16.mxu0 %v5752_v13 }
 0x138   : > { %4496 = vmatmul.mubr.bf16.vlgmr.msra.gmra.mrb[16].mxu1 %v6291_v22 }
 0x139   : > { %4688 = vmatmul.mubr.bf16.gmra.mrb[16].mxu0 %v5757_v29  ;;  %4499 = vmatprep.mubr.bf16.mxu1 %v6292_v8 }
 0x13a   : > { %4691 = vmatprep.mubr.bf16.mxu0 %v5810_v4 }
 0x140   : > { %4500 = vmatmul.mubr.bf16.gmra.mrb[20].mxu1 %v6293_v10 }
 0x141   : > { %4692 = vmatmul.mubr.bf16.gmra.mrb[20].mxu0 %v5817_v3  ;;  %4503 = vmatprep.mubr.bf16.mxu1 %v6294_v20  ;;  %v4041_v20 = vld [vmem:[%s6139_s6 + $0x10] sm:$0xff]  }
 0x142   : > { %4695 = vmatprep.mubr.bf16.mxu0 %v5851_v50  ;;  %v3986_v2 = vunpack.c.l.bf16 %v4041_v20  ;;  %v3987_v21 = vunpack.c.h.bf16 %v4041_v20 }
 0x148   : > { %4504 = vmatmul.mubr.bf16.gmra.mrb[24].mxu1 %v5691_v55 }
 0x149   : > { %4696 = vmatmul.mubr.bf16.gmra.mrb[24].mxu0 %v5861_v42  ;;  %4507 = vmatprep.mubr.bf16.mxu1 %v5725_v61  ;;  %v6144_v42 = vld [vmem:[%s6248_s2] ss:$0 sm:$0xff] }
 0x14a   : > { %4699 = vmatprep.mubr.bf16.mxu0 %v5882_v17 }
 0x150   : > { %4508 = vmatmul.mubr.bf16.gmra.mrb[28].mxu1 %v5888_v57  ;;  %v3977_v57 = vld [vmem:[%s6139_s6] sm:$0xff]  }
 0x151   : > { %4700 = vmatmul.mubr.bf16.gmra.mrb[28].mxu0 %v3962_v58  ;;  %v3978_v8 = vunpack.c.l.bf16 %v3977_v57  ;;  %v3979_v39 = vunpack.c.h.bf16 %v3977_v57 }
 0x1cb   : > { %v4433_v18 = vpop.f32.mrb[0].mxu1 }
 0x1cc   : > { %v1852_v13 = vpop.f32.mrb[1].mxu1 }
 0x1cd   : > { %v4434_v55 = vpop.f32.mrb[2].mxu1 }
 0x1ce   : > { %v1855_v29 = vpop.f32.mrb[3].mxu1 }
 0x1d3   : > { %v4437_v28 = vpop.f32.mrb[4].mxu1 }
 0x1d4   : > { %v1868_v33 = vpop.f32.mrb[5].mxu1 }
 0x1d5   : > { %v4438_v61 = vpop.f32.mrb[6].mxu1 }
 0x1d6   : > { %v1871_v45 = vpop.f32.mrb[7].mxu1 }
 0x1db   : > { %v6119_v40 = vpop.f32.mrb[8].mxu1 }
 0x1dc   : > { %v6121_v53 = vpop.f32.mrb[9].mxu1 }
 0x1dd   : > { %v6123_v9 = vpop.f32.mrb[10].mxu1 }
 0x1de   : > { %v6125_v23 = vpop.f32.mrb[11].mxu1 }
 0x1e3   : > { %v6127_v16 = vpop.f32.mrb[12].mxu1 }
 0x1e4   : > { %v6129_v4 = vpop.f32.mrb[13].mxu1 }
 0x1e5   : > { %v6131_v38 = vpop.f32.mrb[14].mxu1 }
 0x1e6   : > { %v6133_v3 = vpop.f32.mrb[15].mxu1 }
 0x1ec   : > { %v4673_v50 = vpop.f32.mrb[0].mxu0 }
 0x1ed   : > { %v4719_v41 = vadd.f32 %v4673_v50, %v4433_v18  ;;  %v3228_v17 = vpop.f32.mrb[1].mxu0 }
 0x1ee   : > { %v4720_v0 = vadd.f32 %v3228_v17, %v1852_v13  ;;  %v4674_v62 = vpop.f32.mrb[2].mxu0  ;;  %v4043_v17 = vld [vmem:[%s6139_s6 + $0x20] sm:$0xff]  }
 0x1ef   : > { %v3396_v59 = vmul.f32 %v4719_v41, %v6144_v42  ;;  %v4721_v25 = vadd.f32 %v4674_v62, %v4434_v55  ;;  %v3231_v49 = vpop.f32.mrb[3].mxu0 }
 0x1f0   : > { %v3394_v22 = vmul.f32 %v4720_v0, %v6144_v42  ;;  %v4722_v56 = vadd.f32 %v3231_v49, %v1855_v29  ;;  %v4044_v49 = vld [vmem:[%s6139_s6 + $0x28] sm:$0xff]  }
 0x1f1   : > { %v3397_v6 = vmul.f32 %v4721_v25, %v6144_v42  ;;  %v3435_v43 = vadd.f32 %v6152_v63, %v3396_v59 }
 0x1f2   : > { %v3433_v10 = vadd.f32 %v6152_v63, %v3394_v22  ;;  %v3395_v60 = vmul.f32 %v4722_v56, %v6144_v42 }
 0x1f3   : > { %v3436_v27 = vadd.f32 %v6152_v63, %v3397_v6  ;;  %v3531_v51 = vadd.f32 %v3982_v36, %v3435_v43  ;;  %v3994_v6 = vunpack.c.l.bf16 %v4043_v17 }
 0x1f4   : > { %v3529_v14 = vadd.f32 %v3978_v8, %v3433_v10  ;;  %v3434_v7 = vadd.f32 %v6152_v63, %v3395_v60  ;;  %v4677_v11 = vpop.f32.mrb[4].mxu0 }
 0x1f5   : > { %v4723_v1 = vadd.f32 %v4677_v11, %v4437_v28  ;;  %v3244_v30 = vpop.f32.mrb[5].mxu0  ;;  %v3532_v15 = vadd.f32 %v3983_v24, %v3436_v27  ;;  %v3563_v58 = vmax.f32 %v3531_v51, 0.0  ;;  %v3991_v28 = vunpack.c.h.bf16 %v4042_v32 }
 0x1f6   : > { %v3530_v5 = vadd.f32 %v3979_v39, %v3434_v7  ;;  %v4724_v47 = vadd.f32 %v3244_v30, %v1868_v33  ;;  %v4678_v52 = vpop.f32.mrb[6].mxu0  ;;  %v3561_v31 = vmax.f32 %v3529_v14, 0.0  ;;  %v3998_v14 = vunpack.c.l.bf16 %v4044_v49 }
 0x1f7   : > { %v3400_v12 = vmul.f32 %v4723_v1, %v6144_v42  ;;  %v4725_v54 = vadd.f32 %v4678_v52, %v4438_v61  ;;  %v3247_v34 = vpop.f32.mrb[7].mxu0  ;;  %v3564_v33 = vmax.f32 %v3532_v15, 0.0  ;;  %v3995_v7 = vunpack.c.h.bf16 %v4043_v17  ;;  %v4045_v15 = vld [vmem:[%s6139_s6 + $0x30] sm:$0xff]  }
 0x1f8   : > { %v3562_v37 = vmax.f32 %v3530_v5, 0.0  ;;  %v3398_v26 = vmul.f32 %v4724_v47, %v6144_v42  ;;  %v4726_v46 = vadd.f32 %v3247_v34, %v1871_v45  ;;  %v3999_v51 = vunpack.c.h.bf16 %v4044_v49  ;;  %v4047_v49 = vld [vmem:[%s6139_s6 + $0x40] sm:$0xff]  }
 0x1f9   : > { %v3439_v44 = vadd.f32 %v6152_v63, %v3400_v12  ;;  %v3401_v35 = vmul.f32 %v4725_v54, %v6144_v42 }
 0x1fa   : > { %v3593_v18 = vadd.f32 %v3562_v37, %v3561_v31  ;;  %v3437_v13 = vadd.f32 %v6152_v63, %v3398_v26  ;;  %v3399_v55 = vmul.f32 %v4726_v46, %v6144_v42  ;;  %v4046_v26 = vld [vmem:[%s6139_s6 + $0x38] sm:$0xff]  }
 0x1fb   : > { %v3440_v29 = vadd.f32 %v6152_v63, %v3401_v35  ;;  %v3535_v57 = vadd.f32 %v3990_v19, %v3439_v44 }
 0x1fc   : > { %v3594_v61 = vadd.f32 %v3593_v18, %v3563_v58  ;;  %v3533_v45 = vadd.f32 %v3986_v2, %v3437_v13  ;;  %v3438_v50 = vadd.f32 %v6152_v63, %v3399_v55  ;;  %v4681_v41 = vpop.f32.mrb[8].mxu0 }
 0x1fd   : > { %v4727_v48 = vadd.f32 %v4681_v41, %v6119_v40  ;;  %v3260_v0 = vpop.f32.mrb[9].mxu0  ;;  %v3536_v56 = vadd.f32 %v3991_v28, %v3440_v29  ;;  %v3567_v11 = vmax.f32 %v3535_v57, 0.0  ;;  %v4007_v57 = vunpack.c.h.bf16 %v4046_v26 }
 0x1fe   : > { %v3565_v62 = vmax.f32 %v3533_v45, 0.0  ;;  %v3595_v59 = vadd.f32 %v3594_v61, %v3564_v33  ;;  %v3534_v25 = vadd.f32 %v3987_v21, %v3438_v50  ;;  %v4728_v22 = vadd.f32 %v3260_v0, %v6121_v53  ;;  %v4682_v8 = vpop.f32.mrb[10].mxu0 }
 0x1ff   : > { %v3404_v36 = vmul.f32 %v4727_v48, %v6144_v42  ;;  %v4729_v43 = vadd.f32 %v4682_v8, %v6123_v9  ;;  %v3263_v10 = vpop.f32.mrb[11].mxu0  ;;  %v3568_v5 = vmax.f32 %v3536_v56, 0.0  ;;  %v4002_v21 = vunpack.c.l.bf16 %v4045_v15 }
 0x200   : > { %v3596_v60 = vadd.f32 %v3595_v59, %v3565_v62  ;;  %v3566_v39 = vmax.f32 %v3534_v25, 0.0  ;;  %v3402_v27 = vmul.f32 %v4728_v22, %v6144_v42  ;;  %v4730_v40 = vadd.f32 %v3263_v10, %v6125_v23 }
 0x201   : > { %v3443_v24 = vadd.f32 %v6152_v63, %v3404_v36  ;;  %v3405_v53 = vmul.f32 %v4729_v43, %v6144_v42  ;;  %v4006_v33 = vunpack.c.l.bf16 %v4046_v26  ;;  %v4003_v61 = vunpack.c.h.bf16 %v4045_v15 }
 0x202   : > { %v3597_v20 = vadd.f32 %v3596_v60, %v3566_v39  ;;  %v3441_v1 = vadd.f32 %v6152_v63, %v3402_v27  ;;  %v3403_v9 = vmul.f32 %v4730_v40, %v6144_v42  ;;  %v4048_v60 = vld [vmem:[%s6139_s6 + $0x48] sm:$0xff]  }
 0x203   : > { %v3444_v30 = vadd.f32 %v6152_v63, %v3405_v53  ;;  %v3539_v12 = vadd.f32 %v3998_v14, %v3443_v24  ;;  %v4010_v53 = vunpack.c.l.bf16 %v4047_v49 }
 0x204   : > { %v3598_v32 = vadd.f32 %v3597_v20, %v3567_v11  ;;  %v3537_v23 = vadd.f32 %v3994_v6, %v3441_v1  ;;  %v3442_v47 = vadd.f32 %v6152_v63, %v3403_v9  ;;  %v4685_v52 = vpop.f32.mrb[12].mxu0 }
 0x205   : > { %v4731_v2 = vadd.f32 %v4685_v52, %v6127_v16  ;;  %v3276_v54 = vpop.f32.mrb[13].mxu0  ;;  %v3540_v19 = vadd.f32 %v3999_v51, %v3444_v30  ;;  %v3571_v45 = vmax.f32 %v3539_v12, 0.0 }
 0x206   : > { %v3569_v34 = vmax.f32 %v3537_v23, 0.0  ;;  %v3599_v31 = vadd.f32 %v3598_v32, %v3568_v5  ;;  %v3538_v37 = vadd.f32 %v3995_v7, %v3442_v47  ;;  %v4732_v46 = vadd.f32 %v3276_v54, %v6129_v4  ;;  %v4686_v44 = vpop.f32.mrb[14].mxu0 }
 0x207   : > { %v3408_v35 = vmul.f32 %v4731_v2, %v6144_v42  ;;  %v4733_v58 = vadd.f32 %v4686_v44, %v6131_v38  ;;  %v3279_v18 = vpop.f32.mrb[15].mxu0  ;;  %v3572_v48 = vmax.f32 %v3540_v19, 0.0  ;;  %v4014_v32 = vunpack.c.l.bf16 %v4048_v60 }
 0x208   : > { %v3600_v13 = vadd.f32 %v3599_v31, %v3569_v34  ;;  %v3570_v55 = vmax.f32 %v3538_v37, 0.0  ;;  %v3406_v29 = vmul.f32 %v4732_v46, %v6144_v42  ;;  %v4734_v16 = vadd.f32 %v3279_v18, %v6133_v3 }
 0x209   : > { %v3447_v28 = vadd.f32 %v6152_v63, %v3408_v35  ;;  %v3409_v4 = vmul.f32 %v4733_v58, %v6144_v42  ;;  %v4011_v47 = vunpack.c.h.bf16 %v4047_v49  ;;  %v4015_v34 = vunpack.c.h.bf16 %v4048_v60  ;;  %v4049_v35 = vld [vmem:[%s6139_s6 + $0x50] sm:$0xff]  }
 0x20a   : > { %v3601_v50 = vadd.f32 %v3600_v13, %v3570_v55  ;;  %v3445_v41 = vadd.f32 %v6152_v63, %v3406_v29  ;;  %v3407_v38 = vmul.f32 %v4734_v16, %v6144_v42 }
 0x20b   : > { %v3448_v17 = vadd.f32 %v6152_v63, %v3409_v4  ;;  %v4497_v59 = vpop.f32.mrb[16].mxu1  ;;  %v3543_v22 = vadd.f32 %v4006_v33, %v3447_v28  ;;  %v4050_v28 = vld [vmem:[%s6139_s6 + $0x58] sm:$0xff]  }
 0x20c   : > { %v3602_v0 = vadd.f32 %v3601_v50, %v3571_v45  ;;  %v3541_v3 = vadd.f32 %v4002_v21, %v3445_v41  ;;  %v3446_v62 = vadd.f32 %v6152_v63, %v3407_v38  ;;  %v4689_v25 = vpop.f32.mrb[16].mxu0  ;;  %v2202_v56 = vpop.f32.mrb[17].mxu1  ;;  %v4018_v41 = vunpack.c.l.bf16 %v4049_v35 }
 0x20d   : > { %v4735_v8 = vadd.f32 %v4689_v25, %v4497_v59  ;;  %v3292_v36 = vpop.f32.mrb[17].mxu0  ;;  %v4498_v27 = vpop.f32.mrb[18].mxu1  ;;  %v3544_v24 = vadd.f32 %v4007_v57, %v3448_v17  ;;  %v3575_v52 = vmax.f32 %v3543_v22, 0.0  ;;  %v4022_v25 = vunpack.c.l.bf16 %v4050_v28 }
 0x20e   : > { %v3573_v6 = vmax.f32 %v3541_v3, 0.0  ;;  %v3603_v43 = vadd.f32 %v3602_v0, %v3572_v48  ;;  %v3542_v10 = vadd.f32 %v4003_v61, %v3446_v62  ;;  %v4736_v39 = vadd.f32 %v3292_v36, %v2202_v56  ;;  %v4690_v40 = vpop.f32.mrb[18].mxu0  ;;  %v2205_v11 = vpop.f32.mrb[19].mxu1 }
 0x20f   : > { %v3412_v14 = vmul.f32 %v4735_v8, %v6144_v42  ;;  %v4737_v7 = vadd.f32 %v4690_v40, %v4498_v27  ;;  %v3295_v20 = vpop.f32.mrb[19].mxu0  ;;  %v3576_v31 = vmax.f32 %v3544_v24, 0.0  ;;  %v4019_v22 = vunpack.c.h.bf16 %v4049_v35 }
 0x210   : > { %v3604_v1 = vadd.f32 %v3603_v43, %v3573_v6  ;;  %v3574_v9 = vmax.f32 %v3542_v10, 0.0  ;;  %v3410_v30 = vmul.f32 %v4736_v39, %v6144_v42  ;;  %v4738_v51 = vadd.f32 %v3295_v20, %v2205_v11 }
 0x211   : > { %v3451_v5 = vadd.f32 %v6152_v63, %v3412_v14  ;;  %v3413_v23 = vmul.f32 %v4737_v7, %v6144_v42  ;;  %v4023_v10 = vunpack.c.h.bf16 %v4050_v28 }
 0x212   : > { %v3605_v15 = vadd.f32 %v3604_v1, %v3574_v9  ;;  %v3449_v12 = vadd.f32 %v6152_v63, %v3410_v30  ;;  %v3411_v2 = vmul.f32 %v4738_v51, %v6144_v42 }
 0x213   : > { %v3452_v54 = vadd.f32 %v6152_v63, %v3413_v23  ;;  %v4501_v44 = vpop.f32.mrb[20].mxu1  ;;  %v3547_v21 = vadd.f32 %v4014_v32, %v3451_v5  ;;  %v4052_v5 = vld [vmem:[%s6139_s6 + $0x68] sm:$0xff]  }
 0x214   : > { %v3606_v37 = vadd.f32 %v3605_v15, %v3575_v52  ;;  %v3545_v26 = vadd.f32 %v4010_v53, %v3449_v12  ;;  %v3450_v46 = vadd.f32 %v6152_v63, %v3411_v2  ;;  %v4693_v19 = vpop.f32.mrb[20].mxu0  ;;  %v2218_v18 = vpop.f32.mrb[21].mxu1  ;;  %v4051_v53 = vld [vmem:[%s6139_s6 + $0x60] sm:$0xff]  }
 0x215   : > { %v4739_v58 = vadd.f32 %v4693_v19, %v4501_v44  ;;  %v3308_v13 = vpop.f32.mrb[21].mxu0  ;;  %v4502_v4 = vpop.f32.mrb[22].mxu1  ;;  %v3548_v45 = vadd.f32 %v4015_v34, %v3452_v54  ;;  %v3579_v8 = vmax.f32 %v3547_v21, 0.0  ;;  %v4026_v12 = vunpack.c.l.bf16 %v4051_v53 }
 0x216   : > { %v3577_v55 = vmax.f32 %v3545_v26, 0.0  ;;  %v3607_v29 = vadd.f32 %v3606_v37, %v3576_v31  ;;  %v3546_v16 = vadd.f32 %v4011_v47, %v3450_v46  ;;  %v4740_v33 = vadd.f32 %v3308_v13, %v2218_v18  ;;  %v4694_v61 = vpop.f32.mrb[22].mxu0  ;;  %v2221_v17 = vpop.f32.mrb[23].mxu1 }
 0x217   : > { %v3416_v50 = vmul.f32 %v4739_v58, %v6144_v42  ;;  %v4741_v38 = vadd.f32 %v4694_v61, %v4502_v4  ;;  %v3311_v57 = vpop.f32.mrb[23].mxu0  ;;  %v3580_v60 = vmax.f32 %v3548_v45, 0.0  ;;  %v4030_v19 = vunpack.c.l.bf16 %v4052_v5 }
 0x218   : > { %v3608_v48 = vadd.f32 %v3607_v29, %v3577_v55  ;;  %v3578_v0 = vmax.f32 %v3546_v16, 0.0  ;;  %v3414_v3 = vmul.f32 %v4740_v33, %v6144_v42  ;;  %v4742_v62 = vadd.f32 %v3311_v57, %v2221_v17 }
 0x219   : > { %v3455_v59 = vadd.f32 %v6152_v63, %v3416_v50  ;;  %v3417_v49 = vmul.f32 %v4741_v38, %v6144_v42  ;;  %v4027_v21 = vunpack.c.h.bf16 %v4051_v53  ;;  %v4031_v16 = vunpack.c.h.bf16 %v4052_v5 }
 0x21a   : > { %v3609_v56 = vadd.f32 %v3608_v48, %v3578_v0  ;;  %v3453_v36 = vadd.f32 %v6152_v63, %v3414_v3  ;;  %v3415_v6 = vmul.f32 %v4742_v62, %v6144_v42 }
 0x21b   : > { %v3456_v43 = vadd.f32 %v6152_v63, %v3417_v49  ;;  %v4505_v24 = vpop.f32.mrb[24].mxu1  ;;  %v3551_v7 = vadd.f32 %v4022_v25, %v3455_v59  ;;  %v4054_v59 = vld [vmem:[%s6139_s6 + $0x78] sm:$0xff]  }
 0x21c   : > { %v3610_v39 = vadd.f32 %v3609_v56, %v3579_v8  ;;  %v3549_v27 = vadd.f32 %v4018_v41, %v3453_v36  ;;  %v3454_v40 = vadd.f32 %v6152_v63, %v3415_v6  ;;  %v4697_v14 = vpop.f32.mrb[24].mxu0  ;;  %v2234_v20 = vpop.f32.mrb[25].mxu1  ;;  %v4053_v41 = vld [vmem:[%s6139_s6 + $0x70] sm:$0xff]  }
 0x21d   : > { %v4743_v11 = vadd.f32 %v4697_v14, %v4505_v24  ;;  %v3324_v1 = vpop.f32.mrb[25].mxu0  ;;  %v4506_v23 = vpop.f32.mrb[26].mxu1  ;;  %v3552_v52 = vadd.f32 %v4023_v10, %v3456_v43  ;;  %v3583_v58 = vmax.f32 %v3551_v7, 0.0  ;;  %v4034_v36 = vunpack.c.l.bf16 %v4053_v41 }
 0x21e   : > { %v3581_v9 = vmax.f32 %v3549_v27, 0.0  ;;  %v3611_v30 = vadd.f32 %v3610_v39, %v3580_v60  ;;  %v3550_v51 = vadd.f32 %v4019_v22, %v3454_v40  ;;  %v4744_v32 = vadd.f32 %v3324_v1, %v2234_v20  ;;  %v4698_v47 = vpop.f32.mrb[26].mxu0  ;;  %v2237_v54 = vpop.f32.mrb[27].mxu1 }
 0x21f   : > { %v3420_v15 = vmul.f32 %v4743_v11, %v6144_v42  ;;  %v4745_v2 = vadd.f32 %v4698_v47, %v4506_v23  ;;  %v3327_v34 = vpop.f32.mrb[27].mxu0  ;;  %v3584_v28 = vmax.f32 %v3552_v52, 0.0  ;;  %v4038_v14 = vunpack.c.l.bf16 %v4054_v59 }
 0x220   : > { %v3612_v31 = vadd.f32 %v3611_v30, %v3581_v9  ;;  %v3582_v37 = vmax.f32 %v3550_v51, 0.0  ;;  %v3418_v26 = vmul.f32 %v4744_v32, %v6144_v42  ;;  %v4746_v46 = vadd.f32 %v3327_v34, %v2237_v54 }
 0x221   : > { %v3459_v44 = vadd.f32 %v6152_v63, %v3420_v15  ;;  %v3421_v35 = vmul.f32 %v4745_v2, %v6144_v42  ;;  %v4035_v7 = vunpack.c.h.bf16 %v4053_v41  ;;  %v4039_v51 = vunpack.c.h.bf16 %v4054_v59 }
 0x222   : > { %v3613_v18 = vadd.f32 %v3612_v31, %v3582_v37  ;;  %v3457_v13 = vadd.f32 %v6152_v63, %v3418_v26  ;;  %v3419_v55 = vmul.f32 %v4746_v46, %v6144_v42 }
 0x223   : > { %v3460_v29 = vadd.f32 %v6152_v63, %v3421_v35  ;;  %v4509_v45 = vpop.f32.mrb[28].mxu1  ;;  %v3555_v38 = vadd.f32 %v4030_v19, %v3459_v44 }
 0x224   : > { %v3614_v33 = vadd.f32 %v3613_v18, %v3583_v58  ;;  %v3553_v4 = vadd.f32 %v4026_v12, %v3457_v13  ;;  %v3458_v61 = vadd.f32 %v6152_v63, %v3419_v55  ;;  %v4701_v50 = vpop.f32.mrb[28].mxu0  ;;  %v2250_v57 = vpop.f32.mrb[29].mxu1 }
 0x225   : > { %v4747_v17 = vadd.f32 %v4701_v50, %v4509_v45  ;;  %v3340_v48 = vpop.f32.mrb[29].mxu0  ;;  %v4510_v49 = vpop.f32.mrb[30].mxu1  ;;  %v3556_v8 = vadd.f32 %v4031_v16, %v3460_v29  ;;  %v3587_v24 = vmax.f32 %v3555_v38, 0.0 }
 0x226   : > { %v3585_v0 = vmax.f32 %v3553_v4, 0.0  ;;  %v3615_v3 = vadd.f32 %v3614_v33, %v3584_v28  ;;  %v3554_v62 = vadd.f32 %v4027_v21, %v3458_v61  ;;  %v4748_v25 = vadd.f32 %v3340_v48, %v2250_v57  ;;  %v4702_v22 = vpop.f32.mrb[30].mxu0  ;;  %v2253_v43 = vpop.f32.mrb[31].mxu1 }
 0x227   : > { %v3424_v56 = vmul.f32 %v4747_v17, %v6144_v42  ;;  %v4749_v6 = vadd.f32 %v4702_v22, %v4510_v49  ;;  %v3343_v10 = vpop.f32.mrb[31].mxu0  ;;  %v3588_v30 = vmax.f32 %v3556_v8, 0.0 }
 0x228   : > { %v3616_v60 = vadd.f32 %v3615_v3, %v3585_v0  ;;  %v3586_v39 = vmax.f32 %v3554_v62, 0.0  ;;  %v3422_v27 = vmul.f32 %v4748_v25, %v6144_v42  ;;  %v4750_v40 = vadd.f32 %v3343_v10, %v2253_v43 }
 0x229   : > { %v3425_v53 = vmul.f32 %v4749_v6, %v6144_v42  ;;  %v3463_v20 = vadd.f32 %v6152_v63, %v3424_v56 }
 0x22a   : > { %v3617_v11 = vadd.f32 %v3616_v60, %v3586_v39  ;;  %v3461_v1 = vadd.f32 %v6152_v63, %v3422_v27  ;;  %v3423_v9 = vmul.f32 %v4750_v40, %v6144_v42 }
 0x22b   : > { %v3464_v23 = vadd.f32 %v6152_v63, %v3425_v53  ;;  %v3559_v52 = vadd.f32 %v4038_v14, %v3463_v20 }
 0x22c   : > { %v3618_v5 = vadd.f32 %v3617_v11, %v3587_v24  ;;  %v3557_v32 = vadd.f32 %v4034_v36, %v3461_v1  ;;  %v3462_v47 = vadd.f32 %v6152_v63, %v3423_v9 }
 0x22d   : > { %v3560_v34 = vadd.f32 %v4039_v51, %v3464_v23  ;;  %v3591_v37 = vmax.f32 %v3559_v52, 0.0 }
 0x22e   : > { %v3589_v15 = vmax.f32 %v3557_v32, 0.0  ;;  %v3619_v12 = vadd.f32 %v3618_v5, %v3588_v30  ;;  %v3558_v2 = vadd.f32 %v4035_v7, %v3462_v47 }
 0x22f   : > { %v3592_v46 = vmax.f32 %v3560_v34, 0.0 }
 0x230   : > { %v3620_v54 = vadd.f32 %v3619_v12, %v3589_v15  ;;  %v3590_v31 = vmax.f32 %v3558_v2, 0.0 }
 0x232   : > { %v3621_v26 = vadd.f32 %v3620_v54, %v3590_v31 }
 0x234   : > { %v3622_v42 = vadd.f32 %v3621_v26, %v3591_v37 }
 0x236   : > { %v3623_v44 = vadd.f32 %v3622_v42, %v3592_v46 }
 0x238   : > { %v3624_v19 = vrot.slane %v3623_v44, 4 }
 0x23a   : > { %v3625_v35 = vadd.f32 %v3624_v19, %v3623_v44 }
 0x23c   : > { %v3626_v21 = vrot.slane %v3625_v35, 2 }
 0x23e   : > { %v3627_v58 = vadd.f32 %v3626_v21, %v3625_v35 }
 0x240   : > { %v3628_v18 = vrot.slane %v3627_v58, 1 }
 0x242   : > { %v3629_v13 = vadd.f32 %v3628_v18, %v3627_v58 }
 0x244   : > { %v3630_v63 = vmul.f32 0.00390625, %v3629_v13 }
 0x246   : > { %3631 = vst [vmem:[%s240_s13] sm:$0x1] %v3630_v63 }
 0x247 PF: > { %s15_s18 = sadd.s32 1, %s5097_s18  }
 0x248   : > { %p12_p4 = scmp.ge.s32.totalorder %s15_s18, 4  }
 0x24a   :  { %14 = sbr.rel (!%p12_p4) target bundleno = 1 (0x1), region = 81 }

</bundles_post_ra>
